<compile_context>
chip_gen: v7x
topology: tpu7x:2x2x1
jax: 0.10.0
libtpu: 0.0.40
codegen_flags: <defaults>
</compile_context>

<pallas_src>
import jax
import jax.numpy as jnp
from jax.experimental import pallas as pl
from jax.experimental.pallas import tpu as pltpu


def nnue_kernel(ut_ref, w_in_ref, b_in_ref,
                wi_ref, bi_ref,
                w1a_ref, w1b_ref, b1_ref,
                w2_ref, b2_ref,
                wo_ref, bo_ref,
                out_ref):
    tb = w_in_ref.shape[0]

    # Fused feature transform: one MXU pass covering both perspectives (M = 2*tb).
    x = jnp.concatenate([w_in_ref[...], b_in_ref[...]], axis=0).astype(jnp.float32)
    wb = jnp.dot(x, wi_ref[...], preferred_element_type=jnp.float32) + bi_ref[...]
    w = wb[:tb]          # == input(w_in)
    b = wb[tb:]          # == input(b_in)

    us = ut_ref[:, 0:1]      # (tb, 1) -> broadcasts over the feature dim
    them = ut_ref[:, 1:2]    # (tb, 1)

    # l0 = clamp(us*cat([w,b],1) + them*cat([b,w],1), 0, 1), kept as two halves.
    l0a = jnp.clip(us * w + them * b, 0.0, 1.0)
    l0b = jnp.clip(us * b + them * w, 0.0, 1.0)

    l1 = jnp.clip(jnp.dot(l0a, w1a_ref[...], preferred_element_type=jnp.float32)
                  + jnp.dot(l0b, w1b_ref[...], preferred_element_type=jnp.float32)
                  + b1_ref[...], 0.0, 1.0)
    l2 = jnp.clip(jnp.dot(l1, w2_ref[...], preferred_element_type=jnp.float32)
                  + b2_ref[...], 0.0, 1.0)

    # Output layer (L3 -> 1) as a VPU multiply + lane reduction (keeps MXU free).
    out = jnp.sum(l2 * wo_ref[...], axis=-1, keepdims=True) + bo_ref[...]
    out_ref[...] = out.astype(out_ref.dtype)


def nnue_forward(us, them, w_in, b_in, params, *, tb=256,
                 input_dtype=jnp.bfloat16):
    """params: pre-transposed weights Wi (F,L1), W1 (2L1,L2), W2 (L2,L3),
    Wo (L3,1) and biases bi (1,L1), b1 (1,L2), b2 (1,L3), bo (1,1)."""
    B, F = w_in.shape
    L1 = params["Wi"].shape[1]
    L2 = params["W1"].shape[1]
    L3 = params["W2"].shape[1]

    tb = min(tb, B)   # keep >= 2 grid steps when possible (v7x megacore sharding)
    assert B % tb == 0, "batch must be divisible by the batch tile"
    assert tb % 16 == 0, "batch tile must be a multiple of 16 (bf16 sublane pack)"

    # Pack the two per-row scalars into a single lane-adjacent tile.
    ut = jnp.concatenate([us, them], axis=1).astype(jnp.float32)        # (B, 2)
    # 0/1 feature indicators are exact in bf16 -> halves batch-scaled HBM traffic.
    w_in_s = w_in.astype(input_dtype)
    b_in_s = b_in.astype(input_dtype)
    # Split W1 so the kernel never materializes cat([w, b], dim=1).
    W1a = params["W1"][:L1]
    W1b = params["W1"][L1:]
    Wo_row = params["Wo"].reshape(1, L3)                                # (1, L3)

    full = lambda shape: pl.BlockSpec(shape, lambda i: (0, 0))
    batch = lambda shape: pl.BlockSpec(shape, lambda i: (i, 0))

    return pl.pallas_call(
        nnue_kernel,
        out_shape=jax.ShapeDtypeStruct((B, 1), jnp.float32),
        grid_spec=pltpu.PrefetchScalarGridSpec(
            num_scalar_prefetch=0,
            grid=(B // tb,),
            in_specs=[
                batch((tb, 2)),        # [us, them]
                batch((tb, F)),        # w_in  (bf16)
                batch((tb, F)),        # b_in  (bf16)
                full((F, L1)),         # Wi
                full((1, L1)),         # bi
                full((L1, L2)),        # W1[:L1]
                full((L1, L2)),        # W1[L1:]
                full((1, L2)),         # b1
                full((L2, L3)),        # W2
                full((1, L3)),         # b2
                full((1, L3)),         # Wo^T
                full((1, 1)),          # bo
            ],
            out_specs=batch((tb, 1)),
        ),
        compiler_params=pltpu.CompilerParams(
            dimension_semantics=("parallel",)),
    )(ut, w_in_s, b_in_s,
      params["Wi"], params["bi"], W1a, W1b, params["b1"],
      params["W2"], params["b2"], Wo_row, params["bo"])


def nnue_reference(us, them, w_in, b_in, p):
    w = w_in @ p["Wi"] + p["bi"]
    b = b_in @ p["Wi"] + p["bi"]
    l0 = jnp.clip(us * jnp.concatenate([w, b], 1)
                  + them * jnp.concatenate([b, w], 1), 0.0, 1.0)
    l1 = jnp.clip(l0 @ p["W1"] + p["b1"], 0.0, 1.0)
    l2 = jnp.clip(l1 @ p["W2"] + p["b2"], 0.0, 1.0)
    return l2 @ p["Wo"] + p["bo"]


if __name__ == "__main__":
    # Shapes consistent with the module: s=1 -> L1=256, L2=L3=32,
    # feature_set.num_features = 128.  batch=512 so the grid has 2 parallel steps.
    B, F, L1, L2, L3 = 512, 128, 256, 32, 32
    key = jax.random.PRNGKey(0)
    ks = jax.random.split(key, 12)

    params = {
        # pre-transposed (in_features, out_features)
        "Wi": jax.random.normal(ks[0], (F, L1), jnp.float32) * 0.05,
        "bi": jax.random.normal(ks[1], (1, L1), jnp.float32) * 0.05,
        "W1": jax.random.normal(ks[2], (2 * L1, L2), jnp.float32) * 0.05,
        "b1": jax.random.normal(ks[3], (1, L2), jnp.float32) * 0.05,
        "W2": jax.random.normal(ks[4], (L2, L3), jnp.float32) * 0.05,
        "b2": jax.random.normal(ks[5], (1, L3), jnp.float32) * 0.05,
        "Wo": jax.random.normal(ks[6], (L3, 1), jnp.float32) * 0.05,
        "bo": jax.random.normal(ks[7], (1, 1), jnp.float32) * 0.05,
    }
    # NOTE: _zero_virtual_feature_weights / set_feature_set are init-time parameter
    # surgery; with an empty virtual-feature range they are no-ops for forward.

    us = (jax.random.uniform(ks[8], (B, 1)) > 0.5).astype(jnp.float32)
    them = 1.0 - us
    w_in = (jax.random.uniform(ks[9], (B, F)) > 0.9).astype(jnp.float32)
    b_in = (jax.random.uniform(ks[10], (B, F)) > 0.9).astype(jnp.float32)

    out = nnue_forward(us, them, w_in, b_in, params, tb=256)
    out = jax.block_until_ready(out)

    ref = nnue_reference(us, them, w_in, b_in, params)
    assert out.shape == (B, 1)
    assert jnp.allclose(out, ref, atol=2e-5, rtol=2e-5)

    print("KERNEL_OK")
</pallas_src>

<mosaic_0001>
module attributes {stable_mosaic.version = 11 : i64} {
  func.func @nnue_kernel(%arg0: i32, %arg1: memref<256x2xf32, #tpu.memory_space<vmem>>, %arg2: memref<256x128xbf16, #tpu.memory_space<vmem>>, %arg3: memref<256x128xbf16, #tpu.memory_space<vmem>>, %arg4: memref<128x256xf32, #tpu.memory_space<vmem>>, %arg5: memref<1x256xf32, #tpu.memory_space<vmem>>, %arg6: memref<256x32xf32, #tpu.memory_space<vmem>>, %arg7: memref<256x32xf32, #tpu.memory_space<vmem>>, %arg8: memref<1x32xf32, #tpu.memory_space<vmem>>, %arg9: memref<32x32xf32, #tpu.memory_space<vmem>>, %arg10: memref<1x32xf32, #tpu.memory_space<vmem>>, %arg11: memref<1x32xf32, #tpu.memory_space<vmem>>, %arg12: memref<1x1xf32, #tpu.memory_space<vmem>>, %arg13: memref<256x1xf32, #tpu.memory_space<vmem>>) attributes {dimension_semantics = [#tpu.dimension_semantics<parallel>], iteration_bounds = array<i64: 2>, scalar_prefetch = 0 : i64, scratch_operands = 0 : i64, tpu.core_type = #tpu.core_type<tc>, window_params = [{transform_indices = @transform_0, window_bounds = array<i64: 256, 2>}, {transform_indices = @transform_1, window_bounds = array<i64: 256, 128>}, {transform_indices = @transform_2, window_bounds = array<i64: 256, 128>}, {pipeline_mode = #tpu.pipeline_mode<synchronous>, transform_indices = @transform_3, window_bounds = array<i64: 128, 256>}, {pipeline_mode = #tpu.pipeline_mode<synchronous>, transform_indices = @transform_4, window_bounds = array<i64: 1, 256>}, {pipeline_mode = #tpu.pipeline_mode<synchronous>, transform_indices = @transform_5, window_bounds = array<i64: 256, 32>}, {pipeline_mode = #tpu.pipeline_mode<synchronous>, transform_indices = @transform_6, window_bounds = array<i64: 256, 32>}, {pipeline_mode = #tpu.pipeline_mode<synchronous>, transform_indices = @transform_7, window_bounds = array<i64: 1, 32>}, {pipeline_mode = #tpu.pipeline_mode<synchronous>, transform_indices = @transform_8, window_bounds = array<i64: 32, 32>}, {pipeline_mode = #tpu.pipeline_mode<synchronous>, transform_indices = @transform_9, window_bounds = array<i64: 1, 32>}, {pipeline_mode = #tpu.pipeline_mode<synchronous>, transform_indices = @transform_10, window_bounds = array<i64: 1, 32>}, {pipeline_mode = #tpu.pipeline_mode<synchronous>, transform_indices = @transform_11, window_bounds = array<i64: 1, 1>}, {transform_indices = @transform_12, window_bounds = array<i64: 256, 1>}]} {
    %c0 = arith.constant 0 : index
    %c0_0 = arith.constant 0 : index
    %0 = vector.load %arg2[%c0, %c0_0] : memref<256x128xbf16, #tpu.memory_space<vmem>>, vector<256x128xbf16>
    %c0_1 = arith.constant 0 : index
    %c0_2 = arith.constant 0 : index
    %1 = vector.load %arg3[%c0_1, %c0_2] : memref<256x128xbf16, #tpu.memory_space<vmem>>, vector<256x128xbf16>
    %2 = tpu.concatenate %0, %1 in 0 : vector<256x128xbf16>, vector<256x128xbf16> -> vector<512x128xbf16>
    %3 = arith.extf %2 : vector<512x128xbf16> to vector<512x128xf32>
    %c0_3 = arith.constant 0 : index
    %c0_4 = arith.constant 0 : index
    %4 = vector.load %arg4[%c0_3, %c0_4] : memref<128x256xf32, #tpu.memory_space<vmem>>, vector<128x256xf32>
    %cst = arith.constant dense<0.000000e+00> : vector<512x256xf32>
    %5 = tpu.matmul %3, %4, %cst {dimension_numbers = #tpu.dot_dimension_numbers<[1], [0], [0], [1], [0, 0, 1, 1], [], []>} : vector<512x128xf32>, vector<128x256xf32>, vector<512x256xf32> -> vector<512x256xf32>
    %c0_5 = arith.constant 0 : index
    %c0_6 = arith.constant 0 : index
    %6 = vector.load %arg5[%c0_5, %c0_6] : memref<1x256xf32, #tpu.memory_space<vmem>>, vector<1x256xf32>
    %7 = vector.broadcast %6 : vector<1x256xf32> to vector<512x256xf32>
    %8 = arith.addf %5, %7 : vector<512x256xf32>
    %9 = vector.extract_strided_slice %8 {offsets = [0, 0], sizes = [256, 256], strides = [1, 1]} : vector<512x256xf32> to vector<256x256xf32>
    %10 = vector.extract_strided_slice %8 {offsets = [256, 0], sizes = [256, 256], strides = [1, 1]} : vector<512x256xf32> to vector<256x256xf32>
    %c0_7 = arith.constant 0 : index
    %c0_8 = arith.constant 0 : index
    %11 = vector.load %arg1[%c0_7, %c0_8] : memref<256x2xf32, #tpu.memory_space<vmem>>, vector<256x1xf32>
    %c0_9 = arith.constant 0 : index
    %c1 = arith.constant 1 : index
    %12 = vector.load %arg1[%c0_9, %c1] : memref<256x2xf32, #tpu.memory_space<vmem>>, vector<256x1xf32>
    %13 = vector.broadcast %11 : vector<256x1xf32> to vector<256x256xf32>
    %14 = arith.mulf %13, %9 : vector<256x256xf32>
    %15 = vector.broadcast %12 : vector<256x1xf32> to vector<256x256xf32>
    %16 = arith.mulf %15, %10 : vector<256x256xf32>
    %17 = arith.addf %14, %16 : vector<256x256xf32>
    %cst_10 = arith.constant 0.000000e+00 : f32
    %cst_11 = arith.constant 1.000000e+00 : f32
    %18 = vector.broadcast %cst_10 : f32 to vector<256x256xf32>
    %19 = arith.maximumf %18, %17 : vector<256x256xf32>
    %20 = vector.broadcast %cst_11 : f32 to vector<256x256xf32>
    %21 = arith.minimumf %20, %19 : vector<256x256xf32>
    %22 = vector.broadcast %11 : vector<256x1xf32> to vector<256x256xf32>
    %23 = arith.mulf %22, %10 : vector<256x256xf32>
    %24 = vector.broadcast %12 : vector<256x1xf32> to vector<256x256xf32>
    %25 = arith.mulf %24, %9 : vector<256x256xf32>
    %26 = arith.addf %23, %25 : vector<256x256xf32>
    %cst_12 = arith.constant 0.000000e+00 : f32
    %cst_13 = arith.constant 1.000000e+00 : f32
    %27 = vector.broadcast %cst_12 : f32 to vector<256x256xf32>
    %28 = arith.maximumf %27, %26 : vector<256x256xf32>
    %29 = vector.broadcast %cst_13 : f32 to vector<256x256xf32>
    %30 = arith.minimumf %29, %28 : vector<256x256xf32>
    %c0_14 = arith.constant 0 : index
    %c0_15 = arith.constant 0 : index
    %31 = vector.load %arg6[%c0_14, %c0_15] : memref<256x32xf32, #tpu.memory_space<vmem>>, vector<256x32xf32>
    %cst_16 = arith.constant dense<0.000000e+00> : vector<256x32xf32>
    %32 = tpu.matmul %21, %31, %cst_16 {dimension_numbers = #tpu.dot_dimension_numbers<[1], [0], [0], [1], [0, 0, 1, 1], [], []>} : vector<256x256xf32>, vector<256x32xf32>, vector<256x32xf32> -> vector<256x32xf32>
    %c0_17 = arith.constant 0 : index
    %c0_18 = arith.constant 0 : index
    %33 = vector.load %arg7[%c0_17, %c0_18] : memref<256x32xf32, #tpu.memory_space<vmem>>, vector<256x32xf32>
    %cst_19 = arith.constant dense<0.000000e+00> : vector<256x32xf32>
    %34 = tpu.matmul %30, %33, %cst_19 {dimension_numbers = #tpu.dot_dimension_numbers<[1], [0], [0], [1], [0, 0, 1, 1], [], []>} : vector<256x256xf32>, vector<256x32xf32>, vector<256x32xf32> -> vector<256x32xf32>
    %35 = arith.addf %32, %34 : vector<256x32xf32>
    %c0_20 = arith.constant 0 : index
    %c0_21 = arith.constant 0 : index
    %36 = vector.load %arg8[%c0_20, %c0_21] : memref<1x32xf32, #tpu.memory_space<vmem>>, vector<1x32xf32>
    %37 = vector.broadcast %36 : vector<1x32xf32> to vector<256x32xf32>
    %38 = arith.addf %35, %37 : vector<256x32xf32>
    %cst_22 = arith.constant 0.000000e+00 : f32
    %cst_23 = arith.constant 1.000000e+00 : f32
    %39 = vector.broadcast %cst_22 : f32 to vector<256x32xf32>
    %40 = arith.maximumf %39, %38 : vector<256x32xf32>
    %41 = vector.broadcast %cst_23 : f32 to vector<256x32xf32>
    %42 = arith.minimumf %41, %40 : vector<256x32xf32>
    %c0_24 = arith.constant 0 : index
    %c0_25 = arith.constant 0 : index
    %43 = vector.load %arg9[%c0_24, %c0_25] : memref<32x32xf32, #tpu.memory_space<vmem>>, vector<32x32xf32>
    %cst_26 = arith.constant dense<0.000000e+00> : vector<256x32xf32>
    %44 = tpu.matmul %42, %43, %cst_26 {dimension_numbers = #tpu.dot_dimension_numbers<[1], [0], [0], [1], [0, 0, 1, 1], [], []>} : vector<256x32xf32>, vector<32x32xf32>, vector<256x32xf32> -> vector<256x32xf32>
    %c0_27 = arith.constant 0 : index
    %c0_28 = arith.constant 0 : index
    %45 = vector.load %arg10[%c0_27, %c0_28] : memref<1x32xf32, #tpu.memory_space<vmem>>, vector<1x32xf32>
    %46 = vector.broadcast %45 : vector<1x32xf32> to vector<256x32xf32>
    %47 = arith.addf %44, %46 : vector<256x32xf32>
    %cst_29 = arith.constant 0.000000e+00 : f32
    %cst_30 = arith.constant 1.000000e+00 : f32
    %48 = vector.broadcast %cst_29 : f32 to vector<256x32xf32>
    %49 = arith.maximumf %48, %47 : vector<256x32xf32>
    %50 = vector.broadcast %cst_30 : f32 to vector<256x32xf32>
    %51 = arith.minimumf %50, %49 : vector<256x32xf32>
    %c0_31 = arith.constant 0 : index
    %c0_32 = arith.constant 0 : index
    %52 = vector.load %arg11[%c0_31, %c0_32] : memref<1x32xf32, #tpu.memory_space<vmem>>, vector<1x32xf32>
    %53 = vector.broadcast %52 : vector<1x32xf32> to vector<256x32xf32>
    %54 = arith.mulf %51, %53 : vector<256x32xf32>
    %cst_33 = arith.constant dense<0.000000e+00> : vector<256xf32>
    %55 = vector.multi_reduction <add>, %54, %cst_33 [1] : vector<256x32xf32> to vector<256xf32>
    %56 = vector.shape_cast %55 : vector<256xf32> to vector<256x1xf32>
    %c0_34 = arith.constant 0 : index
    %c0_35 = arith.constant 0 : index
    %57 = vector.load %arg12[%c0_34, %c0_35] : memref<1x1xf32, #tpu.memory_space<vmem>>, vector<1x1xf32>
    %58 = vector.broadcast %57 : vector<1x1xf32> to vector<256x1xf32>
    %59 = arith.addf %56, %58 : vector<256x1xf32>
    %c0_36 = arith.constant 0 : index
    %c0_37 = arith.constant 0 : index
    %60 = vector.load %arg13[%c0_36, %c0_37] : memref<256x1xf32, #tpu.memory_space<vmem>>, vector<256x1xf32>
    tpu.vector_store %arg13[%c0_36, %c0_37], %59 {strides = array<i32>} : memref<256x1xf32, #tpu.memory_space<vmem>>, vector<256x1xf32>,
    return
  }
  func.func @transform_0(%arg0: i32) -> (i32, i32) {
    %c0_i32 = arith.constant 0 : i32
    %c0_i32_0 = arith.constant 0 : i32
    return %arg0, %c0_i32 : i32, i32
  }
  func.func @transform_1(%arg0: i32) -> (i32, i32) {
    %c0_i32 = arith.constant 0 : i32
    %c0_i32_0 = arith.constant 0 : i32
    return %arg0, %c0_i32 : i32, i32
  }
  func.func @transform_2(%arg0: i32) -> (i32, i32) {
    %c0_i32 = arith.constant 0 : i32
    %c0_i32_0 = arith.constant 0 : i32
    return %arg0, %c0_i32 : i32, i32
  }
  func.func @transform_3(%arg0: i32) -> (i32, i32) {
    %c0_i32 = arith.constant 0 : i32
    %c0_i32_0 = arith.constant 0 : i32
    %c0_i32_1 = arith.constant 0 : i32
    return %c0_i32, %c0_i32_0 : i32, i32
  }
  func.func @transform_4(%arg0: i32) -> (i32, i32) {
    %c0_i32 = arith.constant 0 : i32
    %c0_i32_0 = arith.constant 0 : i32
    %c0_i32_1 = arith.constant 0 : i32
    return %c0_i32, %c0_i32_0 : i32, i32
  }
  func.func @transform_5(%arg0: i32) -> (i32, i32) {
    %c0_i32 = arith.constant 0 : i32
    %c0_i32_0 = arith.constant 0 : i32
    %c0_i32_1 = arith.constant 0 : i32
    return %c0_i32, %c0_i32_0 : i32, i32
  }
  func.func @transform_6(%arg0: i32) -> (i32, i32) {
    %c0_i32 = arith.constant 0 : i32
    %c0_i32_0 = arith.constant 0 : i32
    %c0_i32_1 = arith.constant 0 : i32
    return %c0_i32, %c0_i32_0 : i32, i32
  }
  func.func @transform_7(%arg0: i32) -> (i32, i32) {
    %c0_i32 = arith.constant 0 : i32
    %c0_i32_0 = arith.constant 0 : i32
    %c0_i32_1 = arith.constant 0 : i32
    return %c0_i32, %c0_i32_0 : i32, i32
  }
  func.func @transform_8(%arg0: i32) -> (i32, i32) {
    %c0_i32 = arith.constant 0 : i32
    %c0_i32_0 = arith.constant 0 : i32
    %c0_i32_1 = arith.constant 0 : i32
    return %c0_i32, %c0_i32_0 : i32, i32
  }
  func.func @transform_9(%arg0: i32) -> (i32, i32) {
    %c0_i32 = arith.constant 0 : i32
    %c0_i32_0 = arith.constant 0 : i32
    %c0_i32_1 = arith.constant 0 : i32
    return %c0_i32, %c0_i32_0 : i32, i32
  }
  func.func @transform_10(%arg0: i32) -> (i32, i32) {
    %c0_i32 = arith.constant 0 : i32
    %c0_i32_0 = arith.constant 0 : i32
    %c0_i32_1 = arith.constant 0 : i32
    return %c0_i32, %c0_i32_0 : i32, i32
  }
  func.func @transform_11(%arg0: i32) -> (i32, i32) {
    %c0_i32 = arith.constant 0 : i32
    %c0_i32_0 = arith.constant 0 : i32
    %c0_i32_1 = arith.constant 0 : i32
    return %c0_i32, %c0_i32_0 : i32, i32
  }
  func.func @transform_12(%arg0: i32) -> (i32, i32) {
    %c0_i32 = arith.constant 0 : i32
    %c0_i32_0 = arith.constant 0 : i32
    return %arg0, %c0_i32 : i32, i32
  }
}

</mosaic_0001>

<bundles_post_ra>
// kernel: tpu_custom_call.1
= control target key start
LH: loop header
LB: loop body
LE: loop exit
PB: predicated region body
PF: predicated region fallthrough
CT: control target
= control target key end

     0   :  { %s3981_s23 = smov 0   ;;  %s6229_s0 = inlined_call_operand.vmem [shape: f32[512,2], index: 0, kind: input, shape index: {}]   ;;  %s6230_s1 = inlined_call_operand.vmem [shape: bf16[512,128], index: 1, kind: input, shape index: {}]   ;;  %s6231_s2 = inlined_call_operand.vmem [shape: bf16[512,128], index: 2, kind: input, shape index: {}]   ;;  %s6232_s3 = inlined_call_operand.vmem [shape: f32[128,256], index: 3, kind: input, shape index: {}]   ;;  %s6233_s4 = inlined_call_operand.vmem [shape: f32[1,256], index: 4, kind: input, shape index: {}]   ;;  %s6234_s5 = inlined_call_operand.vmem [shape: f32[256,32], index: 5, kind: input, shape index: {}]   ;;  %s6235_s6 = inlined_call_operand.vmem [shape: f32[256,32], index: 6, kind: input, shape index: {}]   ;;  %s6236_s7 = inlined_call_operand.vmem [shape: f32[1,32], index: 7, kind: input, shape index: {}]   ;;  %s6237_s8 = inlined_call_operand.vmem [shape: f32[32,32], index: 8, kind: input, shape index: {}]   ;;  %s6238_s9 = inlined_call_operand.vmem [shape: f32[1,32], index: 9, kind: input, shape index: {}]   ;;  %s6239_s10 = inlined_call_operand.vmem [shape: f32[1,32], index: 10, kind: input, shape index: {}]   ;;  %s6240_s11 = inlined_call_operand.<no memory space> [shape: f32[1,1], index: 11, kind: input, shape index: {}]   ;;  %s6241_s12 = inlined_call_operand.vmem [shape: f32[512,1], index: 12, kind: output, shape index: {}]  }
   0x1   :  { %v17_v0 = vstv %s6240_s11 }
   0x2   :  { %18 = vst [vmem:[#allocation2] sm:$0x1] %v17_v0 }
   0x3 LB: > { %s3537_s24 = sadd.s32 4294967295, %s3907_s23   ;;  %p3541_p0 = scmp.ge.s32.totalorder %s3907_s23, 1  ;;  %s3907_s23 = sphi %s3981_s23, %s24_s23  }
   0x4   : > { %p387_p1 = scmp.lt.s32.totalorder %s3907_s23, 3 }
   0x6   : > { %p388_p2 = pnand %p3541_p0, %p387_p1 }
   0x8   : > { %391 = sbr.rel (%p388_p2) target bundleno = 1259 (0x4eb), region = 68 }
   0xf   : > { %v784_v1 = vld [vmem:[%s6232_s3 + $0x8] sm:$0xff]  ;;  %v786_v2 = vld [vmem:[%s6232_s3 + $0x18] sm:$0xff]  ;;  %v783_v3 = vld [vmem:[%s6232_s3] sm:$0xff]  ;;  %s3542_s30 = sshll.u32 %s3537_s24, 5  ;;  %v3909_v8 = vmov 0.0   ;;  %v3910_v9 = vmov 0  }
  0x10   : > { %v3712_v4 = vpack.c.bf16 %v786_v2, %v784_v1  ;;  %v785_v5 = vld [vmem:[%s6232_s3 + $0x10] sm:$0xff]  ;;  %v788_v6 = vld [vmem:[%s6232_s3 + $0x28] sm:$0xff]  ;;  %v790_v7 = vld [vmem:[%s6232_s3 + $0x38] sm:$0xff]  ;;  %891 = vmatprep.mubr.f32.mxu0 %v3909_v8  ;;  %p440_p3 = scmp.lt.s32.totalorder %s3542_s30, 63  ;;  %3864 = vset.pattern.permute.xlu0 %v3910_v9  ;;  %v3911_v52 = vmov 1   ;;  %vm2864_vm0 = vcmask 261120  }
  0x11   : > { %v3714_v10 = vpack.c.bf16 %v785_v5, %v783_v3  ;;  %v3716_v11 = vpack.c.bf16 %v790_v7, %v788_v6  ;;  %v787_v12 = vld [vmem:[%s6232_s3 + $0x20] sm:$0xff]  ;;  %v789_v13 = vld [vmem:[%s6232_s3 + $0x30] sm:$0xff]  ;;  %v792_v14 = vld [vmem:[%s6232_s3 + $0x48] sm:$0xff]  ;;  %3866 = vset.pattern.permute.xlu1 %v3910_v9  ;;  %vm3424_vm1 = vcmask 7168  }
  0x12   : > { %3713 = vmatprep.subr.bf16.mxu0 %v3712_v4  ;;  %v794_v15 = vld [vmem:[%s6232_s3 + $0x58] sm:$0xff]  ;;  %s6714_s30 = smov (!%p440_p3, %s3542_s30), 63  ;;  %v3718_v16 = vpack.c.bf16 %v789_v13, %v787_v12  ;;  %v791_v18 = vld [vmem:[%s6232_s3 + $0x40] sm:$0xff]  ;;  %v793_v19 = vld [vmem:[%s6232_s3 + $0x50] sm:$0xff] }
  0x13   : > { %3715 = vmatpush1.bf16.msra.mxu0 %v3714_v10  ;;  %v3720_v17 = vpack.c.bf16 %v794_v15, %v792_v14  ;;  %v796_v20 = vld [vmem:[%s6232_s3 + $0x68] sm:$0xff]  ;;  %v798_v21 = vld [vmem:[%s6232_s3 + $0x78] sm:$0xff]  ;;  %s3545_s18 = sshll.u32 %s6714_s30, 2  ;;  %v3722_v22 = vpack.c.bf16 %v793_v19, %v791_v18  ;;  %v795_v24 = vld [vmem:[%s6232_s3 + $0x60] sm:$0xff]  ;;  %s3543_s25 = sshll.u32 %s6714_s30, 3 }
  0x14   : > { %3717 = vmatprep.subr.bf16.mxu0 %v3716_v11  ;;  %v3724_v23 = vpack.c.bf16 %v798_v21, %v796_v20  ;;  %v797_v25 = vld [vmem:[%s6232_s3 + $0x70] sm:$0xff]  ;;  %s4048_s26 = scalar_lea.vmem %s6230_s1, %s3545_s18  ;;  %v800_v26 = vld [vmem:[%s6232_s3 + $0x88] sm:$0xff]  ;;  %v802_v27 = vld [vmem:[%s6232_s3 + $0x98] sm:$0xff]  ;;  %s4086_s17 = scalar_lea.vmem %s6229_s0, %s3543_s25 }
  0x15   : > { %v799_v28 = vld [vmem:[%s6232_s3 + $0x80] sm:$0xff]  ;;  %v3726_v29 = vpack.c.bf16 %v797_v25, %v795_v24  ;;  %v801_v30 = vld [vmem:[%s6232_s3 + $0x90] sm:$0xff]  ;;  %v3728_v31 = vpack.c.bf16 %v802_v27, %v800_v26  ;;  %v804_v32 = vld [vmem:[%s6232_s3 + $0xa8] sm:$0xff]  ;;  %s4115_s20 = scalar_lea.vmem %s6231_s2, %s3545_s18  ;;  %s6128_s24 = scalar_lea.vmem %s6241_s12, %s3543_s25 }
  0x16   : > { %v806_v33 = vld [vmem:[%s6232_s3 + $0xb8] sm:$0xff]  ;;  %v803_v34 = vld [vmem:[%s6232_s3 + $0xa0] sm:$0xff]  ;;  %v3730_v35 = vpack.c.bf16 %v801_v30, %v799_v28  ;;  %v805_v36 = vld [vmem:[%s6232_s3 + $0xb0] sm:$0xff] }
  0x17   : > { %3719 = vmatpush1.bf16.msra.mxu0 %v3718_v16  ;;  %v3732_v37 = vpack.c.bf16 %v806_v33, %v804_v32  ;;  %v808_v38 = vld [vmem:[%s6232_s3 + $0xc8] sm:$0xff]  ;;  %v810_v39 = vld [vmem:[%s6232_s3 + $0xd8] sm:$0xff]  ;;  %v807_v40 = vld [vmem:[%s6232_s3 + $0xc0] sm:$0xff]  ;;  %v3734_v42 = vpack.c.bf16 %v805_v36, %v803_v34 }
  0x18   : > { %3721 = vmatprep.subr.bf16.mxu0 %v3720_v17  ;;  %v809_v41 = vld [vmem:[%s6232_s3 + $0xd0] sm:$0xff]  ;;  %v812_v43 = vld [vmem:[%s6232_s3 + $0xe8] sm:$0xff]  ;;  %v3736_v44 = vpack.c.bf16 %v810_v39, %v808_v38  ;;  %v814_v45 = vld [vmem:[%s6232_s3 + $0xf8] sm:$0xff] }
  0x19   : > { %v1276_v46 = vld [vmem:[%s4086_s17] sm:$0xff]  ;;  %v1277_v47 = vld [vmem:[%s4086_s17 + $0x8] sm:$0xff]  ;;  %v3738_v48 = vpack.c.bf16 %v809_v41, %v807_v40  ;;  %v3740_v50 = vpack.c.bf16 %v814_v45, %v812_v43  ;;  %v813_v51 = vld [vmem:[%s6232_s3 + $0xf0] sm:$0xff] }
  0x1a   : > { %1310 = vperm.xlu0 %3864, %v1276_v46   ;;  %1315 = vperm.xlu1 %3866, %v1277_v47   ;;  %v811_v49 = vld [vmem:[%s6232_s3 + $0xe0] sm:$0xff]  ;;  %v1278_v55 = vld [vmem:[%s4086_s17 + $0x10] sm:$0xff]  ;;  %v1279_v57 = vld [vmem:[%s4086_s17 + $0x18] sm:$0xff] }
  0x1b   : > { %3723 = vmatpush1.bf16.msra.mxu0 %v3722_v22  ;;  %v3869_v53 = vld [vmem:[%s4048_s26] sm:$0xff]   ;;  %v3742_v54 = vpack.c.bf16 %v813_v51, %v811_v49  ;;  %v3870_v58 = vld [vmem:[%s4048_s26 + $0x8] sm:$0xff]   ;;  %v3871_v0 = vld [vmem:[%s4048_s26 + $0x10] sm:$0xff]  }
  0x1c   : > { %3725 = vmatprep.subr.bf16.mxu0 %v3724_v23  ;;  %v719_v56 = vunpack.c.l.bf16 %v3869_v53  ;;  %v720_v59 = vunpack.c.h.bf16 %v3869_v53  ;;  %v1280_v60 = vld [vmem:[%s4086_s17 + $0x20] sm:$0xff]  ;;  %v721_v61 = vunpack.c.l.bf16 %v3870_v58  ;;  %v1281_v62 = vld [vmem:[%s4086_s17 + $0x28] sm:$0xff]  ;;  %v722_v63 = vunpack.c.h.bf16 %v3870_v58  ;;  %v1282_v1 = vld [vmem:[%s4086_s17 + $0x30] sm:$0xff] }
  0x1d   : > { %v723_v2 = vunpack.c.l.bf16 %v3871_v0  ;;  %v1283_v3 = vld [vmem:[%s4086_s17 + $0x38] sm:$0xff]  ;;  %v724_v4 = vunpack.c.h.bf16 %v3871_v0  ;;  %v1284_v6 = vld [vmem:[%s4086_s17 + $0x40] sm:$0xff]  ;;  %v1286_v12 = vld [vmem:[%s4086_s17 + $0x50] sm:$0xff] }
  0x1e   : > { %3865 = vset.pattern.permute.xlu0 %v3911_v52  ;;  %3867 = vset.pattern.permute.xlu1 %v3911_v52  ;;  %v3872_v5 = vld [vmem:[%s4048_s26 + $0x18] sm:$0xff]   ;;  %v3873_v11 = vld [vmem:[%s4048_s26 + $0x20] sm:$0xff]   ;;  %v3874_v16 = vld [vmem:[%s4048_s26 + $0x28] sm:$0xff]  }
  0x1f   : > { %3727 = vmatpush1.bf16.msra.mxu0 %v3726_v29  ;;  %1533 = vperm.xlu0 %3865, %v1276_v46   ;;  %v725_v7 = vunpack.c.l.bf16 %v3872_v5  ;;  %v726_v10 = vunpack.c.h.bf16 %v3872_v5  ;;  %v727_v13 = vunpack.c.l.bf16 %v3873_v11  ;;  %v1287_v14 = vld [vmem:[%s4086_s17 + $0x58] sm:$0xff]  ;;  %v728_v15 = vunpack.c.h.bf16 %v3873_v11  ;;  %v1288_v17 = vld [vmem:[%s4086_s17 + $0x60] sm:$0xff]  ;;  %v1289_v19 = vld [vmem:[%s4086_s17 + $0x68] sm:$0xff] }
  0x20   : > { %3729 = vmatprep.subr.bf16.mxu0 %v3728_v31  ;;  %1537 = vperm.xlu1 %3867, %v1277_v47   ;;  %v729_v18 = vunpack.c.l.bf16 %v3874_v16  ;;  %v730_v20 = vunpack.c.h.bf16 %v3874_v16  ;;  %v3875_v21 = vld [vmem:[%s4048_s26 + $0x30] sm:$0xff]   ;;  %v1291_v24 = vld [vmem:[%s4086_s17 + $0x78] sm:$0xff]  ;;  %v1292_v27 = vld [vmem:[%s4086_s17 + $0x80] sm:$0xff] }
  0x21   : > { %v1290_v22 = vld [vmem:[%s4086_s17 + $0x70] sm:$0xff]  ;;  %v731_v23 = vunpack.c.l.bf16 %v3875_v21  ;;  %v732_v25 = vunpack.c.h.bf16 %v3875_v21  ;;  %v3876_v26 = vld [vmem:[%s4048_s26 + $0x38] sm:$0xff]   ;;  %v1293_v29 = vld [vmem:[%s4086_s17 + $0x88] sm:$0xff] }
  0x22   : > { %v733_v28 = vunpack.c.l.bf16 %v3876_v26  ;;  %v734_v30 = vunpack.c.h.bf16 %v3876_v26  ;;  %v3877_v31 = vld [vmem:[%s4048_s26 + $0x40] sm:$0xff]   ;;  %v1294_v32 = vld [vmem:[%s4086_s17 + $0x90] sm:$0xff]  ;;  %v1295_v34 = vld [vmem:[%s4086_s17 + $0x98] sm:$0xff] }
  0x23   : > { %3731 = vmatpush1.bf16.msra.mxu0 %v3730_v35  ;;  %1541 = vperm.xlu0 %3865, %v1278_v55   ;;  %v735_v33 = vunpack.c.l.bf16 %v3877_v31  ;;  %v736_v35 = vunpack.c.h.bf16 %v3877_v31  ;;  %v3878_v36 = vld [vmem:[%s4048_s26 + $0x48] sm:$0xff]   ;;  %v3879_v41 = vld [vmem:[%s4048_s26 + $0x50] sm:$0xff]   ;;  %v3880_v46 = vld [vmem:[%s4048_s26 + $0x58] sm:$0xff]  }
  0x24   : > { %3733 = vmatprep.subr.bf16.mxu0 %v3732_v37  ;;  %3868 = vset.pattern.permute.xlu1 %v3910_v9  ;;  %v1285_v9 = vld [vmem:[%s4086_s17 + $0x48] sm:$0xff]  ;;  %v1296_v37 = vld [vmem:[%s4086_s17 + $0xa0] sm:$0xff]  ;;  %v737_v38 = vunpack.c.l.bf16 %v3878_v36  ;;  %v738_v40 = vunpack.c.h.bf16 %v3878_v36  ;;  %v739_v43 = vunpack.c.l.bf16 %v3879_v41  ;;  %v740_v45 = vunpack.c.h.bf16 %v3879_v41  ;;  %v1302_v52 = vld [vmem:[%s4086_s17 + $0xd0] sm:$0xff] }
  0x25   : > { %1320 = vperm.xlu1 %3868, %v1278_v55   ;;  %v1297_v39 = vld [vmem:[%s4086_s17 + $0xa8] sm:$0xff]  ;;  %v1300_v47 = vld [vmem:[%s4086_s17 + $0xc0] sm:$0xff]  ;;  %v1307_v0 = vld [vmem:[%s4086_s17 + $0xf8] sm:$0xff] }
  0x26   : > { %v1301_v49 = vld [vmem:[%s4086_s17 + $0xc8] sm:$0xff]  ;;  %v3881_v51 = vld [vmem:[%s4048_s26 + $0x60] sm:$0xff]   ;;  %v2270_v26 = vld [vmem:[%s6235_s6 + $0x10] sm:$0xff] }
  0x27   : > { %3735 = vmatpush1.bf16.msra.mxu0 %v3734_v42  ;;  %1545 = vperm.xlu0 %3865, %v1279_v57   ;;  %v1298_v42 = vld [vmem:[%s4086_s17 + $0xb0] sm:$0xff]  ;;  %v743_v53 = vunpack.c.l.bf16 %v3881_v51  ;;  %v744_v55 = vunpack.c.h.bf16 %v3881_v51  ;;  %v3885_v5 = vld [vmem:[%s4115_s20] sm:$0xff]   ;;  %v2269_v21 = vld [vmem:[%s6235_s6 + $0x8] sm:$0xff] }
  0x28   : > { %3737 = vmatprep.subr.bf16.mxu0 %v3736_v44  ;;  %v1299_v44 = vld [vmem:[%s4086_s17 + $0xb8] sm:$0xff]  ;;  %v2273_v31 = vld [vmem:[%s6235_s6 + $0x28] sm:$0xff] }
  0x29   : > { %1325 = vperm.xlu1 %3868, %v1279_v57   ;;  %v1304_v57 = vld [vmem:[%s4086_s17 + $0xe0] sm:$0xff]  ;;  %v2275_v36 = vld [vmem:[%s6235_s6 + $0x38] sm:$0xff] }
  0x2b   : > { %3739 = vmatpush1.bf16.msra.mxu0 %v3738_v48  ;;  %1549 = vperm.xlu0 %3865, %v1280_v60   ;;  %v741_v48 = vunpack.c.l.bf16 %v3880_v46 }
  0x2c   : > { %3741 = vmatprep.subr.bf16.mxu0 %v3740_v50  ;;  %v742_v50 = vunpack.c.h.bf16 %v3880_v46 }
  0x2d   : > { %1330 = vperm.xlu1 %3868, %v1280_v60  }
  0x2f   : > { %3743 = vmatpush1.bf16.msra.mxu0 %v3742_v54  ;;  %1553 = vperm.xlu0 %3865, %v1281_v62   ;;  %v1303_v54 = vld [vmem:[%s4086_s17 + $0xd8] sm:$0xff] }
  0x31   : > { %1335 = vperm.xlu1 %3868, %v1281_v62   ;;  %v1306_v62 = vld [vmem:[%s4086_s17 + $0xf0] sm:$0xff] }
  0x32   : > { %892 = vmatmul.mubr.f32.vlgmr.msra.gmra.mrb[0].mxu0 %v719_v56  ;;  %v3882_v56 = vld [vmem:[%s4048_s26 + $0x68] sm:$0xff]  }
  0x33   : > { %897 = vmatprep.mubr.f32.mxu0 %v3909_v8  ;;  %1557 = vperm.xlu0 %3865, %v1282_v1   ;;  %v745_v58 = vunpack.c.l.bf16 %v3882_v56  ;;  %v746_v60 = vunpack.c.h.bf16 %v3882_v56 }
  0x35   : > { %1340 = vperm.xlu1 %3868, %v1282_v1  }
  0x36   : > { %898 = vmatmul.mubr.f32.gmra.mrb[2].mxu0 %v720_v59  ;;  %v1305_v59 = vld [vmem:[%s4086_s17 + $0xe8] sm:$0xff] }
  0x37   : > { %903 = vmatprep.mubr.f32.mxu0 %v3909_v8  ;;  %1561 = vperm.xlu0 %3865, %v1283_v3  }
  0x39   : > { %1345 = vperm.xlu1 %3868, %v1283_v3  }
  0x3a   : > { %904 = vmatmul.mubr.f32.gmra.mrb[4].mxu0 %v721_v61  ;;  %v3883_v61 = vld [vmem:[%s4048_s26 + $0x70] sm:$0xff]  }
  0x3b   : > { %909 = vmatprep.mubr.f32.mxu0 %v3909_v8  ;;  %1565 = vperm.xlu0 %3865, %v1284_v6   ;;  %v748_v1 = vunpack.c.h.bf16 %v3883_v61 }
  0x3d   : > { %1350 = vperm.xlu1 %3868, %v1284_v6   ;;  %v751_v6 = vunpack.c.l.bf16 %v3885_v5 }
  0x3e   : > { %910 = vmatmul.mubr.f32.gmra.mrb[6].mxu0 %v722_v63  ;;  %v747_v63 = vunpack.c.l.bf16 %v3883_v61  ;;  %v3894_v61 = vld [vmem:[%s4115_s20 + $0x48] sm:$0xff]  }
  0x3f   : > { %915 = vmatprep.mubr.f32.mxu0 %v3909_v8  ;;  %1569 = vperm.xlu0 %3865, %v1285_v9  }
  0x41   : > { %1355 = vperm.xlu1 %3868, %v1285_v9   ;;  %v3886_v9 = vld [vmem:[%s4115_s20 + $0x8] sm:$0xff]  }
  0x42   : > { %916 = vmatmul.mubr.f32.gmra.mrb[8].mxu0 %v723_v2  ;;  %v3884_v2 = vld [vmem:[%s4048_s26 + $0x78] sm:$0xff]   ;;  %v754_v11 = vunpack.c.h.bf16 %v3886_v9 }
  0x43   : > { %921 = vmatprep.mubr.f32.mxu0 %v3909_v8  ;;  %1573 = vperm.xlu0 %3865, %v1286_v12   ;;  %v749_v3 = vunpack.c.l.bf16 %v3884_v2 }
  0x45   : > { %1360 = vperm.xlu1 %3868, %v1286_v12   ;;  %v3887_v12 = vld [vmem:[%s4115_s20 + $0x10] sm:$0xff]  }
  0x46   : > { %922 = vmatmul.mubr.f32.gmra.mrb[10].mxu0 %v724_v4  ;;  %v750_v4 = vunpack.c.h.bf16 %v3884_v2  ;;  %v2288_v2 = vld [vmem:[%s6235_s6 + $0xa0] sm:$0xff] }
  0x47   : > { %927 = vmatprep.mubr.f32.mxu0 %v3909_v8  ;;  %1577 = vperm.xlu0 %3865, %v1287_v14  }
  0x49   : > { %1365 = vperm.xlu1 %3868, %v1287_v14   ;;  %v756_v14 = vunpack.c.h.bf16 %v3887_v12 }
  0x4a   : > { %928 = vmatmul.mubr.f32.gmra.mrb[12].mxu0 %v725_v7  ;;  %v752_v7 = vunpack.c.h.bf16 %v3885_v5  ;;  %v770_v5 = vunpack.c.h.bf16 %v3894_v61 }
  0x4b   : > { %933 = vmatprep.mubr.f32.mxu0 %v3909_v8  ;;  %1581 = vperm.xlu0 %3865, %v1288_v17  }
  0x4d   : > { %1370 = vperm.xlu1 %3868, %v1288_v17  }
  0x4e   : > { %934 = vmatmul.mubr.f32.gmra.mrb[14].mxu0 %v726_v10  ;;  %v753_v10 = vunpack.c.l.bf16 %v3886_v9  ;;  %v2291_v9 = vld [vmem:[%s6235_s6 + $0xb8] sm:$0xff] }
  0x4f   : > { %939 = vmatprep.mubr.f32.mxu0 %v3909_v8  ;;  %1585 = vperm.xlu0 %3865, %v1289_v19  }
  0x51   : > { %1375 = vperm.xlu1 %3868, %v1289_v19  }
  0x52   : > { %940 = vmatmul.mubr.f32.gmra.mrb[16].mxu0 %v727_v13  ;;  %v755_v13 = vunpack.c.l.bf16 %v3887_v12  ;;  %v2292_v12 = vld [vmem:[%s6235_s6 + $0xc0] sm:$0xff] }
  0x53   : > { %945 = vmatprep.mubr.f32.mxu0 %v3909_v8  ;;  %1589 = vperm.xlu0 %3865, %v1290_v22  }
  0x55   : > { %1380 = vperm.xlu1 %3868, %v1290_v22  }
  0x56   : > { %946 = vmatmul.mubr.f32.gmra.mrb[18].mxu0 %v728_v15  ;;  %v3888_v15 = vld [vmem:[%s4115_s20 + $0x18] sm:$0xff]  }
  0x57   : > { %951 = vmatprep.mubr.f32.mxu0 %v3909_v8  ;;  %1593 = vperm.xlu0 %3865, %v1291_v24   ;;  %v757_v16 = vunpack.c.l.bf16 %v3888_v15  ;;  %v758_v17 = vunpack.c.h.bf16 %v3888_v15 }
  0x59   : > { %1385 = vperm.xlu1 %3868, %v1291_v24   ;;  %v3890_v24 = vld [vmem:[%s4115_s20 + $0x28] sm:$0xff]  }
  0x5a   : > { %952 = vmatmul.mubr.f32.gmra.mrb[20].mxu0 %v729_v18  ;;  %v3889_v18 = vld [vmem:[%s4115_s20 + $0x20] sm:$0xff]  }
  0x5b   : > { %957 = vmatprep.mubr.f32.mxu0 %v3909_v8  ;;  %1597 = vperm.xlu0 %3865, %v1292_v27   ;;  %v759_v19 = vunpack.c.l.bf16 %v3889_v18 }
  0x5d   : > { %1390 = vperm.xlu1 %3868, %v1292_v27   ;;  %v2271_v27 = vld [vmem:[%s6235_s6 + $0x18] sm:$0xff] }
  0x5e   : > { %958 = vmatmul.mubr.f32.gmra.mrb[22].mxu0 %v730_v20  ;;  %v2268_v20 = vld [vmem:[%s6235_s6] sm:$0xff] }
  0x5f   : > { %963 = vmatprep.mubr.f32.mxu0 %v3909_v8  ;;  %1601 = vperm.xlu0 %3865, %v1293_v29   ;;  %v3745_v22 = vpack.c.bf16 %v2269_v21, %v2268_v20  ;;  %v2295_v20 = vld [vmem:[%s6235_s6 + $0xd8] sm:$0xff] }
  0x61   : > { %1395 = vperm.xlu1 %3868, %v1293_v29   ;;  %v761_v29 = vunpack.c.l.bf16 %v3890_v24 }
  0x62   : > { %964 = vmatmul.mubr.f32.gmra.mrb[24].mxu0 %v731_v23  ;;  %v760_v23 = vunpack.c.h.bf16 %v3889_v18 }
  0x63   : > { %969 = vmatprep.mubr.f32.mxu0 %v3909_v8  ;;  %1605 = vperm.xlu0 %3865, %v1294_v32  }
  0x65   : > { %1400 = vperm.xlu1 %3868, %v1294_v32  }
  0x66   : > { %970 = vmatmul.mubr.f32.gmra.mrb[26].mxu0 %v732_v25  ;;  %v6242_v25 = vmov 0.0|0.0  }
  0x67   : > { %975 = vmatprep.mubr.f32.mxu0 %v3909_v8  ;;  %1609 = vperm.xlu0 %3865, %v1295_v34  }
  0x68   : > { %3744 = vmatprep.subr.bf16.mxu1 %v6242_v25 }
  0x69   : > { %1405 = vperm.xlu1 %3868, %v1295_v34   ;;  %3746 = vmatpush1.bf16.msra.mxu1 %v3745_v22  ;;  %v3891_v34 = vld [vmem:[%s4115_s20 + $0x30] sm:$0xff]  }
  0x6a   : > { %976 = vmatmul.mubr.f32.gmra.mrb[28].mxu0 %v733_v28  ;;  %3747 = vmatprep.subr.bf16.mxu1 %v6242_v25  ;;  %v3748_v28 = vpack.c.bf16 %v2271_v27, %v2270_v26  ;;  %v2296_v27 = vld [vmem:[%s6235_s6 + $0xe0] sm:$0xff] }
  0x6b   : > { %981 = vmatprep.mubr.f32.mxu0 %v3909_v8  ;;  %1613 = vperm.xlu0 %3865, %v1296_v37  }
  0x6d   : > { %1410 = vperm.xlu1 %3868, %v1296_v37   ;;  %3749 = vmatpush1.bf16.msra.mxu1 %v3748_v28  ;;  %v2297_v28 = vld [vmem:[%s6235_s6 + $0xe8] sm:$0xff] }
  0x6e   : > { %982 = vmatmul.mubr.f32.gmra.mrb[30].mxu0 %v734_v30  ;;  %3750 = vmatprep.subr.bf16.mxu1 %v6242_v25  ;;  %v2272_v30 = vld [vmem:[%s6235_s6 + $0x20] sm:$0xff] }
  0x6f   : > { %987 = vmatprep.mubr.f32.mxu0 %v3909_v8  ;;  %1617 = vperm.xlu0 %3865, %v1297_v39   ;;  %v3751_v32 = vpack.c.bf16 %v2273_v31, %v2272_v30  ;;  %v3787_v31 = vpack.c.bf16 %v2297_v28, %v2296_v27 }
  0x71   : > { %1415 = vperm.xlu1 %3868, %v1297_v39   ;;  %3752 = vmatpush1.bf16.msra.mxu1 %v3751_v32  ;;  %v2276_v39 = vld [vmem:[%s6235_s6 + $0x40] sm:$0xff] }
  0x72   : > { %988 = vmatmul.mubr.f32.gmra.mrb[32].mxu0 %v735_v33  ;;  %v762_v33 = vunpack.c.h.bf16 %v3890_v24  ;;  %3753 = vmatprep.subr.bf16.mxu1 %v6242_v25 }
  0x73   : > { %993 = vmatprep.mubr.f32.mxu0 %v3909_v8  ;;  %1621 = vperm.xlu0 %3865, %v1298_v42  }
  0x75   : > { %1420 = vperm.xlu1 %3868, %v1298_v42   ;;  %v764_v42 = vunpack.c.h.bf16 %v3891_v34 }
  0x76   : > { %994 = vmatmul.mubr.f32.gmra.mrb[34].mxu0 %v736_v35  ;;  %v2274_v35 = vld [vmem:[%s6235_s6 + $0x30] sm:$0xff] }
  0x77   : > { %999 = vmatprep.mubr.f32.mxu0 %v3909_v8  ;;  %1625 = vperm.xlu0 %3865, %v1299_v44   ;;  %v3754_v37 = vpack.c.bf16 %v2275_v36, %v2274_v35  ;;  %v2298_v35 = vld [vmem:[%s6235_s6 + $0xf0] sm:$0xff]  ;;  %v2299_v36 = vld [vmem:[%s6235_s6 + $0xf8] sm:$0xff] }
  0x79   : > { %1425 = vperm.xlu1 %3868, %v1299_v44   ;;  %3755 = vmatpush1.bf16.msra.mxu1 %v3754_v37  ;;  %v2278_v44 = vld [vmem:[%s6235_s6 + $0x50] sm:$0xff] }
  0x7a   : > { %1000 = vmatmul.mubr.f32.gmra.mrb[36].mxu0 %v737_v38  ;;  %v763_v38 = vunpack.c.l.bf16 %v3891_v34  ;;  %3756 = vmatprep.subr.bf16.mxu1 %v6242_v25  ;;  %v3897_v34 = vld [vmem:[%s4115_s20 + $0x60] sm:$0xff]  }
  0x7b   : > { %1005 = vmatprep.mubr.f32.mxu0 %v3909_v8  ;;  %1629 = vperm.xlu0 %3865, %v1300_v47  }
  0x7d   : > { %1430 = vperm.xlu1 %3868, %v1300_v47  }
  0x7e   : > { %1006 = vmatmul.mubr.f32.gmra.mrb[38].mxu0 %v738_v40  ;;  %v2277_v40 = vld [vmem:[%s6235_s6 + $0x48] sm:$0xff] }
  0x7f   : > { %1011 = vmatprep.mubr.f32.mxu0 %v3909_v8  ;;  %1633 = vperm.xlu0 %3865, %v1301_v49   ;;  %v3757_v41 = vpack.c.bf16 %v2277_v40, %v2276_v39  ;;  %v3790_v39 = vpack.c.bf16 %v2299_v36, %v2298_v35 }
  0x81   : > { %1435 = vperm.xlu1 %3868, %v1301_v49   ;;  %3758 = vmatpush1.bf16.msra.mxu1 %v3757_v41  ;;  %v2281_v49 = vld [vmem:[%s6235_s6 + $0x68] sm:$0xff] }
  0x82   : > { %1012 = vmatmul.mubr.f32.gmra.mrb[40].mxu0 %v739_v43  ;;  %v3892_v43 = vld [vmem:[%s4115_s20 + $0x38] sm:$0xff]   ;;  %3759 = vmatprep.subr.bf16.mxu1 %v6242_v25 }
  0x83   : > { %1017 = vmatprep.mubr.f32.mxu0 %v3909_v8  ;;  %1637 = vperm.xlu0 %3865, %v1302_v52   ;;  %v765_v47 = vunpack.c.l.bf16 %v3892_v43  ;;  %v766_v51 = vunpack.c.h.bf16 %v3892_v43 }
  0x85   : > { %1440 = vperm.xlu1 %3868, %v1302_v52   ;;  %v3893_v52 = vld [vmem:[%s4115_s20 + $0x40] sm:$0xff]  }
  0x86   : > { %1018 = vmatmul.mubr.f32.gmra.mrb[42].mxu0 %v740_v45  ;;  %v2279_v45 = vld [vmem:[%s6235_s6 + $0x58] sm:$0xff]  ;;  %v767_v56 = vunpack.c.l.bf16 %v3893_v52 }
  0x87   : > { %1023 = vmatprep.mubr.f32.mxu0 %v3909_v8  ;;  %1641 = vperm.xlu0 %3865, %v1303_v54   ;;  %v3760_v46 = vpack.c.bf16 %v2279_v45, %v2278_v44  ;;  %v776_v45 = vunpack.c.h.bf16 %v3897_v34 }
  0x89   : > { %1445 = vperm.xlu1 %3868, %v1303_v54   ;;  %3761 = vmatpush1.bf16.msra.mxu1 %v3760_v46  ;;  %v2283_v54 = vld [vmem:[%s6235_s6 + $0x78] sm:$0xff]  ;;  %v3898_v46 = vld [vmem:[%s4115_s20 + $0x68] sm:$0xff]  }
  0x8a   : > { %1024 = vmatmul.mubr.f32.gmra.mrb[44].mxu0 %v741_v48  ;;  %3762 = vmatprep.subr.bf16.mxu1 %v6242_v25  ;;  %v2280_v48 = vld [vmem:[%s6235_s6 + $0x60] sm:$0xff] }
  0x8b   : > { %1029 = vmatprep.mubr.f32.mxu0 %v3909_v8  ;;  %1645 = vperm.xlu0 %3865, %v1304_v57  }
  0x8d   : > { %1450 = vperm.xlu1 %3868, %v1304_v57   ;;  %v2284_v57 = vld [vmem:[%s6235_s6 + $0x80] sm:$0xff] }
  0x8e   : > { %1030 = vmatmul.mubr.f32.gmra.mrb[46].mxu0 %v742_v50  ;;  %v3763_v50 = vpack.c.bf16 %v2281_v49, %v2280_v48 }
  0x8f   : > { %1035 = vmatprep.mubr.f32.mxu0 %v3909_v8  ;;  %1649 = vperm.xlu0 %3865, %v1305_v59  }
  0x90   : > { %3764 = vmatpush1.bf16.msra.mxu1 %v3763_v50 }
  0x91   : > { %1455 = vperm.xlu1 %3868, %v1305_v59   ;;  %3765 = vmatprep.subr.bf16.mxu1 %v6242_v25 }
  0x92   : > { %1036 = vmatmul.mubr.f32.gmra.mrb[48].mxu0 %v743_v53  ;;  %v2282_v53 = vld [vmem:[%s6235_s6 + $0x70] sm:$0xff] }
  0x93   : > { %1041 = vmatprep.mubr.f32.mxu0 %v3909_v8  ;;  %1653 = vperm.xlu0 %3865, %v1306_v62  }
  0x95   : > { %1460 = vperm.xlu1 %3868, %v1306_v62   ;;  %v2286_v62 = vld [vmem:[%s6235_s6 + $0x90] sm:$0xff] }
  0x96   : > { %1042 = vmatmul.mubr.f32.gmra.mrb[50].mxu0 %v744_v55  ;;  %v3766_v55 = vpack.c.bf16 %v2283_v54, %v2282_v53 }
  0x97   : > { %1047 = vmatprep.mubr.f32.mxu0 %v3909_v8  ;;  %1657 = vperm.xlu0 %3865, %v1307_v0  }
  0x98   : > { %3767 = vmatpush1.bf16.msra.mxu1 %v3766_v55 }
  0x99   : > { %1465 = vperm.xlu1 %3868, %v1307_v0   ;;  %3768 = vmatprep.subr.bf16.mxu1 %v6242_v25  ;;  %v4319_v18 = vpop.permute.xlu0 %1310 }
  0x9a   : > { %1048 = vmatmul.mubr.f32.gmra.mrb[52].mxu0 %v745_v58  ;;  %v2285_v58 = vld [vmem:[%s6235_s6 + $0x88] sm:$0xff] }
  0x9b   : > { %1053 = vmatprep.mubr.f32.mxu0 %v3909_v8  ;;  %v3769_v59 = vpack.c.bf16 %v2285_v58, %v2284_v57  ;;  %v3899_v57 = vld [vmem:[%s4115_s20 + $0x70] sm:$0xff]  }
  0x9d   : > { %3770 = vmatpush1.bf16.msra.mxu1 %v3769_v59 }
  0x9e   : > { %1054 = vmatmul.mubr.f32.gmra.mrb[54].mxu0 %v746_v60  ;;  %v768_v60 = vunpack.c.h.bf16 %v3893_v52  ;;  %3771 = vmatprep.subr.bf16.mxu1 %v6242_v25 }
  0x9f   : > { %1059 = vmatprep.mubr.f32.mxu0 %v3909_v8 }
  0xa2   : > { %1060 = vmatmul.mubr.f32.gmra.mrb[56].mxu0 %v747_v63  ;;  %v2287_v63 = vld [vmem:[%s6235_s6 + $0x98] sm:$0xff] }
  0xa3   : > { %1065 = vmatprep.mubr.f32.mxu0 %v3909_v8  ;;  %v3772_v0 = vpack.c.bf16 %v2287_v63, %v2286_v62 }
  0xa5   : > { %3773 = vmatpush1.bf16.msra.mxu1 %v3772_v0 }
  0xa6   : > { %1066 = vmatmul.mubr.f32.gmra.mrb[58].mxu0 %v748_v1  ;;  %v769_v1 = vunpack.c.l.bf16 %v3894_v61  ;;  %3774 = vmatprep.subr.bf16.mxu1 %v6242_v25 }
  0xa7   : > { %1071 = vmatprep.mubr.f32.mxu0 %v3909_v8 }
  0xaa   : > { %1072 = vmatmul.mubr.f32.gmra.mrb[60].mxu0 %v749_v3  ;;  %v2289_v3 = vld [vmem:[%s6235_s6 + $0xa8] sm:$0xff] }
  0xab   : > { %1077 = vmatprep.mubr.f32.mxu0 %v3909_v8 }
  0xae   : > { %1078 = vmatmul.mubr.f32.gmra.mrb[62].mxu0 %v750_v4  ;;  %v3775_v4 = vpack.c.bf16 %v2289_v3, %v2288_v2  ;;  %v3900_v2 = vld [vmem:[%s4115_s20 + $0x78] sm:$0xff]  }
  0xaf   : > { %1083 = vmatprep.mubr.f32.mxu0 %v3909_v8 }
  0xb0   : > { %3776 = vmatpush1.bf16.msra.mxu1 %v3775_v4 }
  0xb1   : > { %3777 = vmatprep.subr.bf16.mxu1 %v6242_v25 }
  0xb2   : > { %1084 = vmatmul.mubr.f32.gmra.mrb[64].mxu0 %v751_v6  ;;  %v3895_v6 = vld [vmem:[%s4115_s20 + $0x50] sm:$0xff]  }
  0xb3   : > { %1089 = vmatprep.mubr.f32.mxu0 %v3909_v8  ;;  %v772_v15 = vunpack.c.h.bf16 %v3895_v6 }
  0xb6   : > { %1090 = vmatmul.mubr.f32.gmra.mrb[66].mxu0 %v752_v7  ;;  %v2290_v7 = vld [vmem:[%s6235_s6 + $0xb0] sm:$0xff] }
  0xb7   : > { %1095 = vmatprep.mubr.f32.mxu0 %v3909_v8 }
  0xba   : > { %1096 = vmatmul.mubr.f32.gmra.mrb[68].mxu0 %v753_v10  ;;  %v3778_v10 = vpack.c.bf16 %v2291_v9, %v2290_v7  ;;  %v781_v7 = vunpack.c.l.bf16 %v3900_v2 }
  0xbb   : > { %1101 = vmatprep.mubr.f32.mxu0 %v3909_v8 }
  0xbc   : > { %3779 = vmatpush1.bf16.msra.mxu1 %v3778_v10 }
  0xbd   : > { %3780 = vmatprep.subr.bf16.mxu1 %v6242_v25 }
  0xbe   : > { %1102 = vmatmul.mubr.f32.gmra.mrb[70].mxu0 %v754_v11  ;;  %v771_v11 = vunpack.c.l.bf16 %v3895_v6 }
  0xbf   : > { %1107 = vmatprep.mubr.f32.mxu0 %v3909_v8 }
  0xc2   : > { %1108 = vmatmul.mubr.f32.gmra.mrb[72].mxu0 %v755_v13  ;;  %v2293_v13 = vld [vmem:[%s6235_s6 + $0xc8] sm:$0xff] }
  0xc3   : > { %1113 = vmatprep.mubr.f32.mxu0 %v3909_v8 }
  0xc6   : > { %1114 = vmatmul.mubr.f32.gmra.mrb[74].mxu0 %v756_v14  ;;  %v3781_v14 = vpack.c.bf16 %v2293_v13, %v2292_v12 }
  0xc7   : > { %1119 = vmatprep.mubr.f32.mxu0 %v3909_v8 }
  0xc8   : > { %3782 = vmatpush1.bf16.msra.mxu1 %v3781_v14 }
  0xc9   : > { %3783 = vmatprep.subr.bf16.mxu1 %v6242_v25 }
  0xca   : > { %1120 = vmatmul.mubr.f32.gmra.mrb[76].mxu0 %v757_v16  ;;  %v4316_v16 = vpop.permute.xlu1 %1315 }
  0xcb   : > { %1125 = vmatprep.mubr.f32.mxu0 %v3909_v8 }
  0xce   : > { %1126 = vmatmul.mubr.f32.gmra.mrb[78].mxu0 %v758_v17  ;;  %v3896_v17 = vld [vmem:[%s4115_s20 + $0x58] sm:$0xff]   ;;  %v4334_v26 = vpop.permute.xlu1 %1537 }
  0xcf   : > { %1131 = vmatprep.mubr.f32.mxu0 %v3909_v8  ;;  %v773_v24 = vunpack.c.l.bf16 %v3896_v17 }
  0xd2   : > { %1132 = vmatmul.mubr.f32.gmra.mrb[80].mxu0 %v759_v19  ;;  %v2294_v19 = vld [vmem:[%s6235_s6 + $0xd0] sm:$0xff]  ;;  %v4364_v41 = vpop.permute.xlu1 %1320 }
  0xd3   : > { %1137 = vmatprep.mubr.f32.mxu0 %v3909_v8  ;;  %v3784_v22 = vpack.c.bf16 %v2295_v20, %v2294_v19  ;;  %6306 = vst [vmem:[#allocation3_spill] sm:$0xff] %v4364_v41 }
  0xd5   : > { %3785 = vmatpush1.bf16.msra.mxu1 %v3784_v22 }
  0xd6   : > { %1138 = vmatmul.mubr.f32.gmra.mrb[82].mxu0 %v760_v23  ;;  %3786 = vmatprep.subr.bf16.mxu1 %v6242_v25  ;;  %v4376_v48 = vpop.permute.xlu1 %1325 }
  0xd7   : > { %1143 = vmatprep.mubr.f32.mxu0 %v3909_v8 }
  0xd9   : > { %3788 = vmatpush1.bf16.msra.mxu1 %v3787_v31 }
  0xda   : > { %1144 = vmatmul.mubr.f32.gmra.mrb[84].mxu0 %v761_v29  ;;  %v4343_v29 = vpop.permute.xlu0 %1533  ;;  %3789 = vmatprep.subr.bf16.mxu1 %v6242_v25  ;;  %v4387_v54 = vpop.permute.xlu1 %1330 }
  0xdb   : > { %1149 = vmatprep.mubr.f32.mxu0 %v3909_v8  ;;  %6307 = vst [vmem:[#allocation4_spill] sm:$0xff] %v4387_v54 }
  0xdd   : > { %3791 = vmatpush1.bf16.msra.mxu1 %v3790_v39 }
  0xde   : > { %1150 = vmatmul.mubr.f32.gmra.mrb[86].mxu0 %v762_v33  ;;  %v774_v33 = vunpack.c.h.bf16 %v3896_v17  ;;  %3792 = vmatprep.subr.bf16.mxu1 %v6242_v25  ;;  %v4400_v62 = vpop.permute.xlu1 %1335 }
  0xdf   : > { %1155 = vmatprep.mubr.f32.mxu0 %v3909_v8 }
  0xe2   : > { %1156 = vmatmul.mubr.f32.gmra.mrb[88].mxu0 %v763_v38  ;;  %v4360_v38 = vpop.permute.xlu0 %1541 }
  0xe3   : > { %1161 = vmatprep.mubr.f32.mxu0 %v3909_v8 }
  0xe6   : > { %1162 = vmatmul.mubr.f32.gmra.mrb[90].mxu0 %v764_v42  ;;  %v775_v42 = vunpack.c.l.bf16 %v3897_v34 }
  0xe7   : > { %1167 = vmatprep.mubr.f32.mxu0 %v3909_v8 }
  0xea   : > { %1168 = vmatmul.mubr.f32.gmra.mrb[92].mxu0 %v765_v47  ;;  %v4373_v47 = vpop.permute.xlu0 %1545 }
  0xeb   : > { %1173 = vmatprep.mubr.f32.mxu0 %v3909_v8 }
  0xee   : > { %1174 = vmatmul.mubr.f32.gmra.mrb[94].mxu0 %v766_v51  ;;  %v777_v51 = vunpack.c.l.bf16 %v3898_v46  ;;  %v4383_v52 = vpop.permute.xlu0 %1549 }
  0xef   : > { %1179 = vmatprep.mubr.f32.mxu0 %v3909_v8 }
  0xf2   : > { %1180 = vmatmul.mubr.f32.gmra.mrb[96].mxu0 %v767_v56  ;;  %v778_v56 = vunpack.c.h.bf16 %v3898_v46  ;;  %v4397_v61 = vpop.permute.xlu0 %1553 }
  0xf3   : > { %1185 = vmatprep.mubr.f32.mxu0 %v3909_v8 }
  0xf6   : > { %1186 = vmatmul.mubr.f32.gmra.mrb[98].mxu0 %v768_v60  ;;  %v779_v60 = vunpack.c.l.bf16 %v3899_v57  ;;  %v4408_v3 = vpop.permute.xlu0 %1557 }
  0xf7   : > { %1191 = vmatprep.mubr.f32.mxu0 %v3909_v8 }
  0xfa   : > { %1192 = vmatmul.mubr.f32.gmra.mrb[100].mxu0 %v769_v1  ;;  %v780_v1 = vunpack.c.h.bf16 %v3899_v57  ;;  %v4421_v12 = vpop.permute.xlu0 %1561 }
  0xfb   : > { %1197 = vmatprep.mubr.f32.mxu0 %v3909_v8 }
  0xfe   : > { %1198 = vmatmul.mubr.f32.gmra.mrb[102].mxu0 %v770_v5  ;;  %v4412_v5 = vpop.permute.xlu1 %1340  ;;  %v4430_v17 = vpop.permute.xlu0 %1565 }
  0xff   : > { %1203 = vmatprep.mubr.f32.mxu0 %v3909_v8  ;;  %6308 = vst [vmem:[#allocation5_spill] sm:$0xff] %v4430_v17 }
 0x102   : > { %1204 = vmatmul.mubr.f32.gmra.mrb[104].mxu0 %v771_v11  ;;  %v782_v11 = vunpack.c.h.bf16 %v3900_v2  ;;  %v4424_v13 = vpop.permute.xlu1 %1345 }
 0x103   : > { %1209 = vmatprep.mubr.f32.mxu0 %v3909_v8 }
 0x105   : > { %v4329_v21 = vpop.f32.mrb[0].mxu0 }
 0x106   : > { %v4331_v23 = vpop.f32.mrb[1].mxu0  ;;  %1210 = vmatmul.mubr.f32.gmra.mrb[106].mxu0 %v772_v15  ;;  %v4434_v20 = vpop.permute.xlu1 %1350 }
 0x107   : > { %1215 = vmatprep.mubr.f32.mxu0 %v3909_v8  ;;  %6309 = vst [vmem:[#allocation6_spill] sm:$0xff] %v4434_v20 }
 0x109   : > { %v4345_v30 = vpop.f32.mrb[2].mxu0 }
 0x10a   : > { %v4347_v32 = vpop.f32.mrb[3].mxu0  ;;  %1216 = vmatmul.mubr.f32.gmra.mrb[108].mxu0 %v773_v24  ;;  %v4444_v28 = vpop.permute.xlu1 %1355 }
 0x10b   : > { %1221 = vmatprep.mubr.f32.mxu0 %v3909_v8  ;;  %6311 = vst [vmem:[#allocation8_spill] sm:$0xff] %v4444_v28 }
 0x10d   : > { %v4358_v37 = vpop.f32.mrb[4].mxu0 }
 0x10e   : > { %v4362_v40 = vpop.f32.mrb[5].mxu0  ;;  %1222 = vmatmul.mubr.f32.gmra.mrb[110].mxu0 %v774_v33  ;;  %v4454_v36 = vpop.permute.xlu1 %1360 }
 0x10f   : > { %1227 = vmatprep.mubr.f32.mxu0 %v3909_v8  ;;  %6315 = vst [vmem:[#allocation12_spill] sm:$0xff] %v4454_v36 }
 0x111   : > { %v4368_v43 = vpop.f32.mrb[6].mxu0 }
 0x112   : > { %v4370_v44 = vpop.f32.mrb[7].mxu0  ;;  %1228 = vmatmul.mubr.f32.gmra.mrb[112].mxu0 %v775_v42 }
 0x113   : > { %1233 = vmatprep.mubr.f32.mxu0 %v3909_v8 }
 0x115   : > { %v4378_v49 = vpop.f32.mrb[8].mxu0 }
 0x116   : > { %v4380_v50 = vpop.f32.mrb[9].mxu0  ;;  %1234 = vmatmul.mubr.f32.gmra.mrb[114].mxu0 %v776_v45 }
 0x117   : > { %1239 = vmatprep.mubr.f32.mxu0 %v3909_v8 }
 0x119   : > { %v4385_v53 = vpop.f32.mrb[10].mxu0 }
 0x11a   : > { %v4389_v55 = vpop.f32.mrb[11].mxu0  ;;  %1240 = vmatmul.mubr.f32.gmra.mrb[116].mxu0 %v777_v51  ;;  %v4464_v51 = vpop.permute.xlu1 %1365 }
 0x11b   : > { %1245 = vmatprep.mubr.f32.mxu0 %v3909_v8  ;;  %6320 = vst [vmem:[#allocation17_spill] sm:$0xff] %v4464_v51 }
 0x11d   : > { %v4393_v58 = vpop.f32.mrb[12].mxu0 }
 0x11e   : > { %v4395_v59 = vpop.f32.mrb[13].mxu0  ;;  %1246 = vmatmul.mubr.f32.gmra.mrb[118].mxu0 %v778_v56  ;;  %v4474_v2 = vpop.permute.xlu1 %1370 }
 0x11f   : > { %1251 = vmatprep.mubr.f32.mxu0 %v3909_v8  ;;  %6325 = vst [vmem:[#allocation22_spill] sm:$0xff] %v4474_v2 }
 0x121   : > { %v4402_v63 = vpop.f32.mrb[14].mxu0 }
 0x122   : > { %v4404_v0 = vpop.f32.mrb[15].mxu0  ;;  %1252 = vmatmul.mubr.f32.gmra.mrb[120].mxu0 %v779_v60 }
 0x123   : > { %1257 = vmatprep.mubr.f32.mxu0 %v3909_v8 }
 0x125   : > { %v4410_v4 = vpop.f32.mrb[16].mxu0 }
 0x126   : > { %v4414_v6 = vpop.f32.mrb[17].mxu0  ;;  %1258 = vmatmul.mubr.f32.gmra.mrb[122].mxu0 %v780_v1 }
 0x127   : > { %1263 = vmatprep.mubr.f32.mxu0 %v3909_v8 }
 0x129   : > { %v4417_v9 = vpop.f32.mrb[18].mxu0 }
 0x12a   : > { %v4419_v10 = vpop.f32.mrb[19].mxu0  ;;  %1264 = vmatmul.mubr.f32.gmra.mrb[124].mxu0 %v781_v7 }
 0x12b   : > { %1269 = vmatprep.mubr.f32.mxu0 %v3909_v8  ;;  %v4442_v8 = vpop.permute.xlu0 %1569 }
 0x12c   : > { %6310 = vst [vmem:[#allocation7_spill] sm:$0xff] %v4442_v8 }
 0x12d   : > { %v4426_v14 = vpop.f32.mrb[20].mxu0 }
 0x12e   : > { %v4428_v15 = vpop.f32.mrb[21].mxu0  ;;  %1270 = vmatmul.mubr.f32.gmra.mrb[126].mxu0 %v782_v11 }
 0x12f   : > { %v4450_v34 = vpop.permute.xlu0 %1573 }
 0x130   : > { %6313 = vst [vmem:[#allocation10_spill] sm:$0xff] %v4450_v34 }
 0x131   : > { %v4432_v19 = vpop.f32.mrb[22].mxu0 }
 0x132   : > { %v4436_v22 = vpop.f32.mrb[23].mxu0 }
 0x133   : > { %v4462_v46 = vpop.permute.xlu0 %1577 }
 0x134   : > { %6319 = vst [vmem:[#allocation16_spill] sm:$0xff] %v4462_v46 }
 0x135   : > { %v4438_v24 = vpop.f32.mrb[24].mxu0 }
 0x136   : > { %v4440_v27 = vpop.f32.mrb[25].mxu0 }
 0x137   : > { %v4470_v60 = vpop.permute.xlu0 %1581 }
 0x138   : > { %6323 = vst [vmem:[#allocation20_spill] sm:$0xff] %v4470_v60 }
 0x139   : > { %v4446_v31 = vpop.f32.mrb[26].mxu0 }
 0x13a   : > { %v4448_v33 = vpop.f32.mrb[27].mxu0 }
 0x13b   : > { %6312 = vst [vmem:[#allocation9_spill] sm:$0xff] %v4448_v33 }
 0x13d   : > { %v4452_v35 = vpop.f32.mrb[28].mxu0 }
 0x13e   : > { %6314 = vst [vmem:[#allocation11_spill] sm:$0xff] %v4452_v35  ;;  %v4456_v39 = vpop.f32.mrb[29].mxu0 }
 0x13f   : > { %6316 = vst [vmem:[#allocation13_spill] sm:$0xff] %v4456_v39  ;;  %v817_v39 = vlaneseq }
 0x141   : > { %v4458_v42 = vpop.f32.mrb[30].mxu0  ;;  %v818_v60 = vshrl.u32 %v817_v39, 7 }
 0x142   : > { %6317 = vst [vmem:[#allocation14_spill] sm:$0xff] %v4458_v42  ;;  %v4460_v45 = vpop.f32.mrb[31].mxu0  ;;  %v4484_v42 = vpop.permute.xlu1 %1375 }
 0x143   : > { %6318 = vst [vmem:[#allocation15_spill] sm:$0xff] %v4460_v45  ;;  %v4482_v45 = vpop.permute.xlu0 %1585  ;;  %6330 = vst [vmem:[#allocation27_spill] sm:$0xff] %v4484_v42  ;;  %v823_v42 = vsub.s32 1, %v818_v60 }
 0x144   : > { %6329 = vst [vmem:[#allocation26_spill] sm:$0xff] %v4482_v45  ;;  %v815_v45 = vld [vmem:[%s6233_s4] sm:$0x3] }
 0x145   : > { %v4466_v56 = vpop.f32.mrb[32].mxu0 }
 0x146   : > { %6321 = vst [vmem:[#allocation18_spill] sm:$0xff] %v4466_v56  ;;  %v4468_v57 = vpop.f32.mrb[33].mxu0  ;;  %v4494_v2 = vpop.permute.xlu1 %1380 }
 0x147   : > { %6322 = vst [vmem:[#allocation19_spill] sm:$0xff] %v4468_v57  ;;  %v4490_v35 = vpop.permute.xlu0 %1589  ;;  %6335 = vst [vmem:[#allocation32_spill] sm:$0xff] %v4494_v2  ;;  %v4513_v2 = vrot.slane %v815_v45, %v823_v42 }
 0x148   : > { %6333 = vst [vmem:[#allocation30_spill] sm:$0xff] %v4490_v35 }
 0x149   : > { %v4472_v1 = vpop.f32.mrb[34].mxu0 }
 0x14a   : > { %6324 = vst [vmem:[#allocation21_spill] sm:$0xff] %v4472_v1  ;;  %v4476_v7 = vpop.f32.mrb[35].mxu0  ;;  %v4507_v39 = vpop.permute.xlu1 %1385 }
 0x14b   : > { %6326 = vst [vmem:[#allocation23_spill] sm:$0xff] %v4476_v7  ;;  %6340 = vst [vmem:[#allocation37_spill] sm:$0xff] %v4507_v39 }
 0x14d   : > { %v4478_v11 = vpop.f32.mrb[36].mxu0 }
 0x14e   : > { %6327 = vst [vmem:[#allocation24_spill] sm:$0xff] %v4478_v11  ;;  %v4480_v25 = vpop.f32.mrb[37].mxu0  ;;  %v819_v11 = vsub.s32 0, %v818_v60 }
 0x14f   : > { %6328 = vst [vmem:[#allocation25_spill] sm:$0xff] %v4480_v25 }
 0x150   : > { %v4509_v35 = vrot.slane %v815_v45, %v819_v11  ;;  %v902_v45 = vadd.f32 %v4347_v32, %v4513_v2 }
 0x151   : > { %v4486_v56 = vpop.f32.mrb[38].mxu0 }
 0x152   : > { %6331 = vst [vmem:[#allocation28_spill] sm:$0xff] %v4486_v56  ;;  %v4488_v57 = vpop.f32.mrb[39].mxu0  ;;  %v900_v42 = vadd.f32 %v4345_v30, %v4509_v35  ;;  %v912_v30 = vadd.f32 %v4368_v43, %v4509_v35  ;;  %v4568_v43 = vmul.f32 %v4316_v16, %v902_v45 }
 0x153   : > { %6332 = vst [vmem:[#allocation29_spill] sm:$0xff] %v4488_v57  ;;  %v4505_v57 = vpop.permute.xlu0 %1593 }
 0x154   : > { %6339 = vst [vmem:[#allocation36_spill] sm:$0xff] %v4505_v57  ;;  %v4525_v57 = vpop.permute.xlu1 %1390 }
 0x155   : > { %v4492_v1 = vpop.f32.mrb[40].mxu0  ;;  %6345 = vst [vmem:[#allocation42_spill] sm:$0xff] %v4525_v57 }
 0x156   : > { %6334 = vst [vmem:[#allocation31_spill] sm:$0xff] %v4492_v1  ;;  %v4496_v7 = vpop.f32.mrb[41].mxu0 }
 0x157   : > { %6336 = vst [vmem:[#allocation33_spill] sm:$0xff] %v4496_v7  ;;  %v4519_v33 = vpop.permute.xlu0 %1597 }
 0x158   : > { %6343 = vst [vmem:[#allocation40_spill] sm:$0xff] %v4519_v33 }
 0x159   : > { %v4498_v25 = vpop.f32.mrb[42].mxu0 }
 0x15a   : > { %6337 = vst [vmem:[#allocation34_spill] sm:$0xff] %v4498_v25  ;;  %v4503_v56 = vpop.f32.mrb[43].mxu0  ;;  %v894_v25 = vadd.f32 %v4329_v21, %v4509_v35  ;;  %v906_v21 = vadd.f32 %v4358_v37, %v4509_v35 }
 0x15b   : > { %6338 = vst [vmem:[#allocation35_spill] sm:$0xff] %v4503_v56  ;;  %v896_v56 = vadd.f32 %v4331_v23, %v4513_v2 }
 0x15d   : > { %v4511_v1 = vpop.f32.mrb[44].mxu0  ;;  %v4553_v37 = vmul.f32 %v4343_v29, %v896_v56 }
 0x15e   : > { %6341 = vst [vmem:[#allocation38_spill] sm:$0xff] %v4511_v1  ;;  %v4515_v7 = vpop.f32.mrb[45].mxu0  ;;  %v4543_v1 = vmul.f32 %v4319_v18, %v896_v56  ;;  %v4571_v56 = vmul.f32 %v4334_v26, %v902_v45  ;;  %v924_v45 = vadd.f32 %v4385_v53, %v4509_v35  ;;  %v926_v53 = vadd.f32 %v4389_v55, %v4513_v2 }
 0x15f   : > { %6342 = vst [vmem:[#allocation39_spill] sm:$0xff] %v4515_v7  ;;  %v4536_v7 = vmul.f32 %v4319_v18, %v894_v25  ;;  %v932_v55 = vadd.f32 %v4395_v59, %v4513_v2 }
 0x160   : > { %6349 = vst [vmem:[#allocation46_spill] sm:$0xff] %v4543_v1  ;;  %v4565_v1 = vpop.permute.xlu0 %1601  ;;  %6353 = vst [vmem:[#allocation50_spill] sm:$0xff] %v4571_v56  ;;  %v4650_v59 = vmul.f32 %v4400_v62, %v924_v45 }
 0x161   : > { %v4521_v60 = vpop.f32.mrb[46].mxu0  ;;  %6347 = vst [vmem:[#allocation44_spill] sm:$0xff] %v4536_v7  ;;  %v4556_v7 = vmul.f32 %v4316_v16, %v900_v42 }
 0x162   : > { %6344 = vst [vmem:[#allocation41_spill] sm:$0xff] %v4521_v60  ;;  %v4527_v11 = vpop.f32.mrb[47].mxu0  ;;  %v908_v60 = vadd.f32 %v4362_v40, %v4513_v2  ;;  %v4559_v40 = vmul.f32 %v4334_v26, %v900_v42  ;;  %v920_v42 = vadd.f32 %v4380_v50, %v4513_v2  ;;  %v4596_v50 = vld [vmem:[%s6234_s5] sm:$0xff]  ;;  %6366 = vst [vmem:[#allocation63_spill] sm:$0xff] %v4650_v59 }
 0x163   : > { %6346 = vst [vmem:[#allocation43_spill] sm:$0xff] %v4527_v11  ;;  %v4546_v11 = vmul.f32 %v4343_v29, %v894_v25  ;;  %6351 = vst [vmem:[#allocation48_spill] sm:$0xff] %v4556_v7  ;;  %v918_v25 = vadd.f32 %v4378_v49, %v4509_v35  ;;  %v4584_v49 = vmul.f32 %v4360_v38, %v906_v21 }
 0x164   : > { %6352 = vst [vmem:[#allocation49_spill] sm:$0xff] %v4559_v40  ;;  %v4578_v40 = vpop.permute.xlu1 %1395  ;;  %v4587_v7 = vmul.f32 %v4360_v38, %v908_v60 }
 0x165   : > { %v4540_v23 = vpop.f32.mrb[48].mxu0  ;;  %6355 = vst [vmem:[#allocation52_spill] sm:$0xff] %v4578_v40  ;;  %6357 = vst [vmem:[#allocation54_spill] sm:$0xff] %v4584_v49 }
 0x166   : > { %6348 = vst [vmem:[#allocation45_spill] sm:$0xff] %v4540_v23  ;;  %v4550_v32 = vpop.f32.mrb[49].mxu0  ;;  %v914_v23 = vadd.f32 %v4370_v44, %v4513_v2  ;;  %v4581_v44 = vmul.f32 %v4364_v41, %v908_v60  ;;  %6358 = vst [vmem:[#allocation55_spill] sm:$0xff] %v4587_v7  ;;  %v4607_v60 = vmul.f32 %v4373_v47, %v912_v30 }
 0x167   : > { %6350 = vst [vmem:[#allocation47_spill] sm:$0xff] %v4550_v32  ;;  %v4574_v32 = vmul.f32 %v4364_v41, %v906_v21  ;;  %v4604_v21 = vmul.f32 %v4376_v48, %v912_v30  ;;  %v4622_v41 = vmul.f32 %v4387_v54, %v918_v25  ;;  %v4625_v30 = vmul.f32 %v4383_v52, %v918_v25  ;;  %v4644_v25 = vld [vmem:[%s6234_s5 + $0x18] sm:$0xff] }
 0x168   : > { %6356 = vst [vmem:[#allocation53_spill] sm:$0xff] %v4581_v44  ;;  %v4601_v44 = vld [vmem:[%s6234_s5 + $0x8] sm:$0xff]  ;;  %6360 = vst [vmem:[#allocation57_spill] sm:$0xff] %v4607_v60  ;;  %v4616_v49 = vmul.f32 %v4376_v48, %v914_v23  ;;  %v4628_v60 = vmul.f32 %v4387_v54, %v920_v42  ;;  %v4662_v54 = vmul.f32 %v4400_v62, %v926_v53 }
 0x169   : > { %6354 = vst [vmem:[#allocation51_spill] sm:$0xff] %v4574_v32  ;;  %v4591_v56 = vpop.f32.mrb[50].mxu0  ;;  %v4619_v32 = vmul.f32 %v4373_v47, %v914_v23  ;;  %6363 = vst [vmem:[#allocation60_spill] sm:$0xff] %v4622_v41  ;;  %v4639_v23 = vld [vmem:[%s6234_s5 + $0x10] sm:$0xff] }
 0x16a   : > { %6359 = vst [vmem:[#allocation56_spill] sm:$0xff] %v4591_v56  ;;  %v930_v56 = vadd.f32 %v4393_v58, %v4509_v35  ;;  %v4613_v7 = vpop.f32.mrb[51].mxu0  ;;  %6364 = vst [vmem:[#allocation61_spill] sm:$0xff] %v4625_v30  ;;  %v936_v58 = vadd.f32 %v4402_v63, %v4509_v35  ;;  %v4653_v63 = vmul.f32 %v4397_v61, %v924_v45  ;;  %v4657_v30 = vpop.permute.xlu0 %1605 }
 0x16b   : > { %6361 = vst [vmem:[#allocation58_spill] sm:$0xff] %v4613_v7  ;;  %6362 = vst [vmem:[#allocation59_spill] sm:$0xff] %v4619_v32  ;;  %v938_v7 = vadd.f32 %v4404_v0, %v4513_v2  ;;  %v4665_v32 = vmul.f32 %v4397_v61, %v926_v53  ;;  %v942_v45 = vadd.f32 %v4410_v4, %v4509_v35  ;;  %v4688_v4 = vld [vmem:[%s6234_s5 + $0x20] sm:$0xff] }
 0x16c   : > { %6365 = vst [vmem:[#allocation62_spill] sm:$0xff] %v4628_v60  ;;  %v4647_v60 = vmul.f32 %v4383_v52, %v920_v42  ;;  %6367 = vst [vmem:[#allocation64_spill] sm:$0xff] %v4653_v63  ;;  %v4668_v42 = vmul.f32 %v4412_v5, %v930_v56  ;;  %v4672_v63 = vpop.permute.xlu1 %1400  ;;  %v4677_v0 = vmul.f32 %v4408_v3, %v930_v56 }
 0x16d   : > { %6368 = vst [vmem:[#allocation65_spill] sm:$0xff] %v4657_v30  ;;  %v4659_v41 = vpop.f32.mrb[52].mxu0  ;;  %6370 = vst [vmem:[#allocation67_spill] sm:$0xff] %v4662_v54  ;;  %v948_v53 = vadd.f32 %v4417_v9, %v4509_v35  ;;  %v4696_v56 = vmul.f32 %v4412_v5, %v932_v55  ;;  %v4702_v9 = vmul.f32 %v4424_v13, %v936_v58 }
 0x16e   : > { %6369 = vst [vmem:[#allocation66_spill] sm:$0xff] %v4659_v41  ;;  %6371 = vst [vmem:[#allocation68_spill] sm:$0xff] %v4665_v32  ;;  %v4674_v59 = vpop.f32.mrb[53].mxu0  ;;  %v944_v41 = vadd.f32 %v4414_v6, %v4513_v2  ;;  %v4699_v6 = vmul.f32 %v4408_v3, %v932_v55  ;;  %v950_v32 = vadd.f32 %v4419_v10, %v4513_v2 }
 0x16f   : > { %6372 = vst [vmem:[#allocation69_spill] sm:$0xff] %v4668_v42  ;;  %6373 = vst [vmem:[#allocation70_spill] sm:$0xff] %v4672_v63  ;;  %v4710_v42 = vmul.f32 %v4421_v12, %v936_v58  ;;  %v4713_v54 = vmul.f32 %v4421_v12, %v938_v7  ;;  %v956_v10 = vadd.f32 %v4428_v15, %v4513_v2  ;;  %v4747_v15 = vld [vmem:[%s6234_s5 + $0x30] sm:$0xff] }
 0x170   : > { %6374 = vst [vmem:[#allocation71_spill] sm:$0xff] %v4674_v59  ;;  %6375 = vst [vmem:[#allocation72_spill] sm:$0xff] %v4677_v0  ;;  %v4693_v59 = vld [vmem:[%s6234_s5 + $0x28] sm:$0xff]  ;;  %v4707_v0 = vmul.f32 %v4424_v13, %v938_v7  ;;  %v4732_v58 = vmul.f32 %v4434_v20, %v944_v41  ;;  %v4752_v7 = vld [vmem:[%s6234_s5 + $0x38] sm:$0xff] }
 0x171   : > { %6376 = vst [vmem:[#allocation73_spill] sm:$0xff] %v4696_v56  ;;  %6377 = vst [vmem:[#allocation74_spill] sm:$0xff] %v4699_v6  ;;  %v954_v56 = vadd.f32 %v4426_v14, %v4509_v35  ;;  %v4717_v55 = vpop.f32.mrb[54].mxu0  ;;  %v4720_v6 = vmul.f32 %v4434_v20, %v942_v45  ;;  %v4735_v14 = vmul.f32 %v4430_v17, %v944_v41 }
 0x172   : > { %6378 = vst [vmem:[#allocation75_spill] sm:$0xff] %v4702_v9  ;;  %6379 = vst [vmem:[#allocation76_spill] sm:$0xff] %v4707_v0  ;;  %v4723_v9 = vmul.f32 %v4430_v17, %v942_v45  ;;  %v4727_v0 = vpop.f32.mrb[55].mxu0  ;;  %v960_v45 = vadd.f32 %v4432_v19, %v4509_v35  ;;  %v4755_v41 = vmul.f32 %v4444_v28, %v950_v32 }
 0x173   : > { %6380 = vst [vmem:[#allocation77_spill] sm:$0xff] %v4713_v54  ;;  %6381 = vst [vmem:[#allocation78_spill] sm:$0xff] %v4717_v55  ;;  %v4738_v55 = vmul.f32 %v4444_v28, %v948_v53  ;;  %v962_v19 = vadd.f32 %v4436_v22, %v4513_v2  ;;  %v4773_v28 = vmul.f32 %v4450_v34, %v954_v56 }
 0x174   : > { %6382 = vst [vmem:[#allocation79_spill] sm:$0xff] %v4720_v6  ;;  %6383 = vst [vmem:[#allocation80_spill] sm:$0xff] %v4723_v9  ;;  %v4742_v9 = vpop.permute.xlu0 %1609  ;;  %v4770_v6 = vmul.f32 %v4454_v36, %v954_v56  ;;  %v4780_v22 = vmul.f32 %v4454_v36, %v956_v10  ;;  %v6402_v56 = vld [vmem:[#allocation11_spill] sm:$0xff]  ;;  %v6405_v36 = vld [vmem:[#allocation22_spill] sm:$0xff] }
 0x175   : > { %6384 = vst [vmem:[#allocation81_spill] sm:$0xff] %v4727_v0  ;;  %6385 = vst [vmem:[#allocation82_spill] sm:$0xff] %v4732_v58  ;;  %v4758_v0 = vmul.f32 %v4442_v8, %v948_v53  ;;  %v4767_v58 = vmul.f32 %v4442_v8, %v950_v32  ;;  %v968_v53 = vadd.f32 %v4440_v27, %v4513_v2  ;;  %v4794_v27 = vld [vmem:[%s6234_s5 + $0x40] sm:$0xff] }
 0x176   : > { %6386 = vst [vmem:[#allocation83_spill] sm:$0xff] %v4735_v14  ;;  %6387 = vst [vmem:[#allocation84_spill] sm:$0xff] %v4738_v55  ;;  %v966_v55 = vadd.f32 %v4438_v24, %v4509_v35  ;;  %v4764_v14 = vpop.permute.xlu1 %1405  ;;  %v4783_v24 = vmul.f32 %v4450_v34, %v956_v10  ;;  %v972_v32 = vadd.f32 %v4446_v31, %v4509_v35 }
 0x177   : > { %6388 = vst [vmem:[#allocation85_spill] sm:$0xff] %v4742_v9  ;;  %6389 = vst [vmem:[#allocation86_spill] sm:$0xff] %v4755_v41  ;;  %v4777_v41 = vpop.f32.mrb[56].mxu0  ;;  %v4802_v10 = vmul.f32 %v4464_v51, %v960_v45  ;;  %v4805_v31 = vmul.f32 %v4462_v46, %v960_v45  ;;  %v4823_v45 = vmul.f32 %v6405_v36, %v968_v53 }
 0x178   : > { %6390 = vst [vmem:[#allocation87_spill] sm:$0xff] %v4758_v0  ;;  %6391 = vst [vmem:[#allocation88_spill] sm:$0xff] %v4764_v14  ;;  %v4818_v34 = vmul.f32 %v6405_v36, %v966_v55 }
 0x179   : > { %6392 = vst [vmem:[#allocation89_spill] sm:$0xff] %v4767_v58  ;;  %6393 = vst [vmem:[#allocation90_spill] sm:$0xff] %v4770_v6  ;;  %v4787_v58 = vpop.f32.mrb[57].mxu0  ;;  %v4815_v6 = vmul.f32 %v4462_v46, %v962_v19 }
 0x17a   : > { %6394 = vst [vmem:[#allocation91_spill] sm:$0xff] %v4773_v28  ;;  %6395 = vst [vmem:[#allocation92_spill] sm:$0xff] %v4777_v41  ;;  %v4799_v41 = vld [vmem:[%s6234_s5 + $0x48] sm:$0xff]  ;;  %v4812_v28 = vmul.f32 %v4464_v51, %v962_v19  ;;  %v4830_v51 = vpop.permute.xlu0 %1613 }
 0x17b   : > { %6396 = vst [vmem:[#allocation93_spill] sm:$0xff] %v4780_v22  ;;  %6397 = vst [vmem:[#allocation94_spill] sm:$0xff] %v4783_v24  ;;  %v978_v22 = vadd.f32 %v6402_v56, %v4509_v35  ;;  %v6411_v56 = vld [vmem:[#allocation14_spill] sm:$0xff]  ;;  %v6419_v19 = vld [vmem:[#allocation15_spill] sm:$0xff] }
 0x17c   : > { %6398 = vst [vmem:[#allocation95_spill] sm:$0xff] %v4787_v58  ;;  %6399 = vst [vmem:[#allocation96_spill] sm:$0xff] %v4802_v10  ;;  %v6401_v58 = vld [vmem:[#allocation9_spill] sm:$0xff]  ;;  %v984_v8 = vadd.f32 %v6411_v56, %v4509_v35  ;;  %v6415_v56 = vld [vmem:[#allocation27_spill] sm:$0xff]  ;;  %v986_v36 = vadd.f32 %v6419_v19, %v4513_v2 }
 0x17d   : > { %6400 = vst [vmem:[#allocation97_spill] sm:$0xff] %v4805_v31  ;;  %v974_v24 = vadd.f32 %v6401_v58, %v4513_v2  ;;  %6403 = vst [vmem:[#allocation9_spill] sm:$0xff] %v4812_v28  ;;  %v6407_v10 = vld [vmem:[#allocation13_spill] sm:$0xff]  ;;  %v6409_v31 = vld [vmem:[#allocation20_spill] sm:$0xff]  ;;  %v4832_v28 = vpop.f32.mrb[58].mxu0 }
 0x17e   : > { %6404 = vst [vmem:[#allocation11_spill] sm:$0xff] %v4815_v6  ;;  %6406 = vst [vmem:[#allocation98_spill] sm:$0xff] %v4818_v34  ;;  %v980_v0 = vadd.f32 %v6407_v10, %v4513_v2  ;;  %v4826_v58 = vmul.f32 %v6409_v31, %v966_v55  ;;  %v4839_v10 = vld [vmem:[%s6234_s5 + $0x50] sm:$0xff]  ;;  %v4844_v55 = vld [vmem:[%s6234_s5 + $0x58] sm:$0xff]  ;;  %v4857_v6 = vpop.permute.xlu1 %1410  ;;  %v4859_v46 = vpop.f32.mrb[59].mxu0 }
 0x17f   : > { %6408 = vst [vmem:[#allocation13_spill] sm:$0xff] %v4823_v45  ;;  %6412 = vst [vmem:[#allocation14_spill] sm:$0xff] %v4830_v51  ;;  %v4847_v45 = vmul.f32 %v6409_v31, %v968_v53  ;;  %v4862_v20 = vmul.f32 %v6415_v56, %v974_v24  ;;  %v6424_v53 = vld [vmem:[#allocation32_spill] sm:$0xff]  ;;  %v6428_v19 = vld [vmem:[#allocation30_spill] sm:$0xff] }
 0x180   : > { %6410 = vst [vmem:[#allocation99_spill] sm:$0xff] %v4826_v58  ;;  %6413 = vst [vmem:[#allocation100_spill] sm:$0xff] %v4832_v28  ;;  %v4850_v58 = vmul.f32 %v6415_v56, %v972_v32  ;;  %v6417_v28 = vld [vmem:[#allocation26_spill] sm:$0xff]  ;;  %v4876_v31 = vmul.f32 %v6428_v19, %v978_v22  ;;  %v6437_v56 = vld [vmem:[#allocation36_spill] sm:$0xff] }
 0x181   : > { %6414 = vst [vmem:[#allocation101_spill] sm:$0xff] %v4847_v45  ;;  %v4853_v34 = vmul.f32 %v6417_v28, %v972_v32  ;;  %6420 = vst [vmem:[#allocation15_spill] sm:$0xff] %v4857_v6  ;;  %v4865_v17 = vmul.f32 %v6417_v28, %v974_v24  ;;  %v4868_v45 = vmul.f32 %v6424_v53, %v978_v22  ;;  %v4885_v24 = vld [vmem:[%s6234_s5 + $0x60] sm:$0xff] }
 0x182   : > { %6416 = vst [vmem:[#allocation102_spill] sm:$0xff] %v4850_v58  ;;  %6421 = vst [vmem:[#allocation104_spill] sm:$0xff] %v4859_v46  ;;  %v6426_v58 = vld [vmem:[#allocation18_spill] sm:$0xff]  ;;  %v6430_v46 = vld [vmem:[#allocation19_spill] sm:$0xff]  ;;  %v4896_v22 = vmul.f32 %v4507_v39, %v984_v8  ;;  %v4908_v28 = vmul.f32 %v6437_v56, %v984_v8 }
 0x183   : > { %6418 = vst [vmem:[#allocation103_spill] sm:$0xff] %v4853_v34  ;;  %6422 = vst [vmem:[#allocation105_spill] sm:$0xff] %v4862_v20  ;;  %v990_v32 = vadd.f32 %v6426_v58, %v4509_v35  ;;  %v4873_v34 = vmul.f32 %v6424_v53, %v980_v0  ;;  %v992_v54 = vadd.f32 %v6430_v46, %v4513_v2  ;;  %v4890_v58 = vld [vmem:[%s6234_s5 + $0x68] sm:$0xff]  ;;  %v6433_v46 = vld [vmem:[#allocation21_spill] sm:$0xff]  ;;  %v4902_v53 = vpop.f32.mrb[60].mxu0 }
 0x184   : > { %6423 = vst [vmem:[#allocation106_spill] sm:$0xff] %v4865_v17  ;;  %6425 = vst [vmem:[#allocation107_spill] sm:$0xff] %v4868_v45  ;;  %v6434_v20 = vld [vmem:[#allocation23_spill] sm:$0xff]  ;;  %v4905_v17 = vmul.f32 %v4507_v39, %v986_v36  ;;  %v4925_v39 = vpop.permute.xlu0 %1617  ;;  %v4949_v8 = vld [vmem:[%s6234_s5 + $0x78] sm:$0xff] }
 0x185   : > { %6427 = vst [vmem:[#allocation18_spill] sm:$0xff] %v4873_v34  ;;  %6429 = vst [vmem:[#allocation108_spill] sm:$0xff] %v4876_v31  ;;  %v4893_v34 = vmul.f32 %v6428_v19, %v980_v0  ;;  %v996_v31 = vadd.f32 %v6433_v46, %v4509_v35  ;;  %v998_v45 = vadd.f32 %v6434_v20, %v4513_v2  ;;  %v4915_v19 = vpop.f32.mrb[61].mxu0 }
 0x186   : > { %6432 = vst [vmem:[#allocation109_spill] sm:$0xff] %v4896_v22  ;;  %6435 = vst [vmem:[#allocation21_spill] sm:$0xff] %v4902_v53  ;;  %v4911_v0 = vmul.f32 %v6437_v56, %v986_v36  ;;  %v4918_v46 = vmul.f32 %v4525_v57, %v990_v32  ;;  %v4921_v20 = vmul.f32 %v4519_v33, %v990_v32  ;;  %v6444_v53 = vld [vmem:[#allocation25_spill] sm:$0xff] }
 0x187   : > { %6431 = vst [vmem:[#allocation19_spill] sm:$0xff] %v4893_v34  ;;  %6436 = vst [vmem:[#allocation23_spill] sm:$0xff] %v4905_v17  ;;  %v6440_v34 = vld [vmem:[#allocation24_spill] sm:$0xff]  ;;  %v1004_v17 = vadd.f32 %v6444_v53, %v4513_v2  ;;  %v4930_v36 = vmul.f32 %v4525_v57, %v992_v54  ;;  %v6449_v32 = vld [vmem:[#allocation29_spill] sm:$0xff]  ;;  %v4962_v57 = vpop.f32.mrb[62].mxu0 }
 0x188   : > { %6438 = vst [vmem:[#allocation110_spill] sm:$0xff] %v4908_v28  ;;  %6439 = vst [vmem:[#allocation111_spill] sm:$0xff] %v4911_v0  ;;  %v1002_v22 = vadd.f32 %v6440_v34, %v4509_v35  ;;  %v4933_v34 = vmul.f32 %v4519_v33, %v992_v54  ;;  %v4939_v0 = vpop.permute.xlu1 %1415  ;;  %v4944_v53 = vld [vmem:[%s6234_s5 + $0x70] sm:$0xff]  ;;  %v4952_v54 = vmul.f32 %v4578_v40, %v996_v31 }
 0x189   : > { %6441 = vst [vmem:[#allocation24_spill] sm:$0xff] %v4915_v19  ;;  %6442 = vst [vmem:[#allocation112_spill] sm:$0xff] %v4918_v46  ;;  %v6448_v19 = vld [vmem:[#allocation28_spill] sm:$0xff]  ;;  %v4965_v33 = vmul.f32 %v4565_v1, %v998_v45 }
 0x18a   : > { %6443 = vst [vmem:[#allocation113_spill] sm:$0xff] %v4921_v20  ;;  %6445 = vst [vmem:[#allocation25_spill] sm:$0xff] %v4925_v39  ;;  %v1008_v46 = vadd.f32 %v6448_v19, %v4509_v35  ;;  %v1010_v20 = vadd.f32 %v6449_v32, %v4513_v2  ;;  %v4955_v19 = vmul.f32 %v4578_v40, %v998_v45  ;;  %v4975_v40 = vpop.f32.mrb[63].mxu0  ;;  %v6461_v45 = vld [vmem:[#allocation34_spill] sm:$0xff] }
 0x18b   : > { %6446 = vst [vmem:[#allocation114_spill] sm:$0xff] %v4930_v36  ;;  %6447 = vst [vmem:[#allocation115_spill] sm:$0xff] %v4933_v34  ;;  %v4958_v32 = vmul.f32 %v4565_v1, %v996_v31  ;;  %v6453_v34 = vld [vmem:[#allocation31_spill] sm:$0xff]  ;;  %v4968_v28 = vmul.f32 %v4672_v63, %v1002_v22  ;;  %v4971_v56 = vmul.f32 %v4657_v30, %v1002_v22 }
 0x18c   : > { %6450 = vst [vmem:[#allocation28_spill] sm:$0xff] %v4939_v0  ;;  %6451 = vst [vmem:[#allocation29_spill] sm:$0xff] %v4952_v54  ;;  %v1014_v36 = vadd.f32 %v6453_v34, %v4509_v35  ;;  %v6457_v54 = vld [vmem:[#allocation33_spill] sm:$0xff]  ;;  %v4978_v31 = vmul.f32 %v4672_v63, %v1004_v17  ;;  %v4981_v34 = vmul.f32 %v4657_v30, %v1004_v17  ;;  %v4990_v22 = vld [vmem:[%s6234_s5 + $0x80] sm:$0xff] }
 0x18d   : > { %6452 = vst [vmem:[#allocation116_spill] sm:$0xff] %v4955_v19  ;;  %6454 = vst [vmem:[#allocation31_spill] sm:$0xff] %v4962_v57  ;;  %v1016_v19 = vadd.f32 %v6457_v54, %v4513_v2  ;;  %v1020_v57 = vadd.f32 %v6461_v45, %v4509_v35  ;;  %v4995_v54 = vld [vmem:[%s6234_s5 + $0x88] sm:$0xff]  ;;  %v5001_v17 = vmul.f32 %v4764_v14, %v1010_v20 }
 0x18e   : > { %6455 = vst [vmem:[#allocation117_spill] sm:$0xff] %v4968_v28  ;;  %6456 = vst [vmem:[#allocation118_spill] sm:$0xff] %v4971_v56  ;;  %v5004_v45 = vmul.f32 %v4742_v9, %v1008_v46  ;;  %v6465_v28 = vld [vmem:[#allocation35_spill] sm:$0xff]  ;;  %v5012_v56 = vmul.f32 %v4857_v6, %v1014_v36  ;;  %v5015_v63 = vmul.f32 %v4830_v51, %v1014_v36 }
 0x18f   : > { %6458 = vst [vmem:[#allocation33_spill] sm:$0xff] %v4975_v40  ;;  %6459 = vst [vmem:[#allocation119_spill] sm:$0xff] %v4978_v31  ;;  %v4998_v40 = vmul.f32 %v4764_v14, %v1008_v46  ;;  %v5009_v31 = vmul.f32 %v4742_v9, %v1010_v20  ;;  %v5019_v14 = vpop.permute.xlu0 %1621  ;;  %v5022_v46 = vmul.f32 %v4857_v6, %v1016_v19  ;;  %v5027_v20 = vpop.permute.xlu1 %1420  ;;  %v6476_v6 = vld [vmem:[#allocation39_spill] sm:$0xff] }
 0x190   : > { %6460 = vst [vmem:[#allocation120_spill] sm:$0xff] %v4981_v34  ;;  %6463 = vst [vmem:[#allocation121_spill] sm:$0xff] %v5001_v17  ;;  %v1022_v34 = vadd.f32 %v6465_v28, %v4513_v2  ;;  %v1085_v17 = vpop.f32.mrb[64].mxu0  ;;  %v5025_v28 = vmul.f32 %v4830_v51, %v1016_v19 }
 0x191   : > { %6462 = vst [vmem:[#allocation34_spill] sm:$0xff] %v4998_v40  ;;  %6464 = vst [vmem:[#allocation122_spill] sm:$0xff] %v5004_v45  ;;  %v6469_v40 = vld [vmem:[#allocation38_spill] sm:$0xff] }
 0x192   : > { %6466 = vst [vmem:[#allocation35_spill] sm:$0xff] %v5009_v31  ;;  %6467 = vst [vmem:[#allocation123_spill] sm:$0xff] %v5012_v56  ;;  %v1026_v30 = vadd.f32 %v6469_v40, %v4509_v35  ;;  %v1086_v31 = vadd.f32 %v1085_v17, %v4509_v35  ;;  %v1087_v56 = vpop.f32.mrb[65].mxu0  ;;  %v5036_v40 = vmul.f32 %v4925_v39, %v1020_v57  ;;  %v5049_v17 = vld [vmem:[%s6234_s5 + $0x98] sm:$0xff] }
 0x193   : > { %6468 = vst [vmem:[#allocation124_spill] sm:$0xff] %v5015_v63  ;;  %6470 = vst [vmem:[#allocation38_spill] sm:$0xff] %v5019_v14  ;;  %v5033_v63 = vmul.f32 %v4939_v0, %v1020_v57  ;;  %v1088_v19 = vadd.f32 %v1087_v56, %v4513_v2  ;;  %v5052_v36 = vmul.f32 %v4939_v0, %v1022_v34  ;;  %v1091_v9 = vpop.f32.mrb[66].mxu0  ;;  %v6481_v0 = vld [vmem:[#allocation44_spill] sm:$0xff] }
 0x194   : > { %6471 = vst [vmem:[#allocation125_spill] sm:$0xff] %v5022_v46  ;;  %6472 = vst [vmem:[#allocation126_spill] sm:$0xff] %v5025_v28  ;;  %v1028_v46 = vadd.f32 %v6476_v6, %v4513_v2  ;;  %v5044_v28 = vld [vmem:[%s6234_s5 + $0x90] sm:$0xff]  ;;  %v5055_v57 = vmul.f32 %v4925_v39, %v1022_v34  ;;  %v1660_v6 = vmul.f32 %v4343_v29, %v1086_v31  ;;  %v1093_v39 = vpop.f32.mrb[67].mxu0 }
 0x195   : > { %6473 = vst [vmem:[#allocation127_spill] sm:$0xff] %v5027_v20  ;;  %6474 = vst [vmem:[#allocation128_spill] sm:$0xff] %v5033_v63  ;;  %v1916_v56 = vmul.f32 %v4319_v18, %v1086_v31  ;;  %v5063_v63 = vmul.f32 %v5019_v14, %v1026_v30  ;;  %v1661_v51 = vmul.f32 %v4343_v29, %v1088_v19 }
 0x196   : > { %6475 = vst [vmem:[#allocation129_spill] sm:$0xff] %v5036_v40  ;;  %6477 = vst [vmem:[#allocation39_spill] sm:$0xff] %v5052_v36  ;;  %v5060_v40 = vmul.f32 %v5027_v20, %v1026_v30  ;;  %v1917_v45 = vmul.f32 %v4319_v18, %v1088_v19  ;;  %v5068_v36 = vadd.f32 %v1660_v6, %v6481_v0  ;;  %v6484_v30 = vld [vmem:[#allocation46_spill] sm:$0xff]  ;;  %v6487_v6 = vld [vmem:[#allocation41_spill] sm:$0xff] }
 0x197   : > { %6478 = vst [vmem:[#allocation130_spill] sm:$0xff] %v5055_v57  ;;  %6480 = vst [vmem:[#allocation132_spill] sm:$0xff] %v5063_v63  ;;  %v2044_v34 = vadd.f32 %v4546_v11, %v1916_v56  ;;  %v1092_v57 = vadd.f32 %v1091_v9, %v4509_v35  ;;  %v5078_v63 = vadd.f32 %v1661_v51, %v6484_v30  ;;  %v1097_v30 = vpop.f32.mrb[68].mxu0 }
 0x198   : > { %6479 = vst [vmem:[#allocation131_spill] sm:$0xff] %v5060_v40  ;;  %6482 = vst [vmem:[#allocation44_spill] sm:$0xff] %v5068_v36  ;;  %v5075_v40 = vmul.f32 %v5027_v20, %v1028_v46  ;;  %v1094_v18 = vadd.f32 %v1093_v39, %v4513_v2  ;;  %v2045_v29 = vadd.f32 %v4553_v37, %v1917_v45  ;;  %v6488_v39 = vld [vmem:[#allocation43_spill] sm:$0xff]  ;;  %v5093_v45 = vpop.permute.xlu1 %1425 }
 0x199   : > { %6485 = vst [vmem:[#allocation46_spill] sm:$0xff] %v5078_v63  ;;  %v5083_v0 = vmul.f32 %v5019_v14, %v1028_v46  ;;  %v1662_v11 = vmul.f32 %v4334_v26, %v1092_v57  ;;  %v1918_v9 = vmul.f32 %v4316_v16, %v1092_v57  ;;  %v2108_v19 = vmax.f32 %v2044_v34, 0.0  ;;  %v6489_v46 = vld [vmem:[#allocation48_spill] sm:$0xff]  ;;  %v6494_v14 = vld [vmem:[#allocation3_spill] sm:$0xff] }
 0x19a   : > { %6483 = vst [vmem:[#allocation133_spill] sm:$0xff] %v5075_v40  ;;  %v1032_v56 = vadd.f32 %v6487_v6, %v4509_v35  ;;  %v1663_v31 = vmul.f32 %v4334_v26, %v1094_v18  ;;  %v1919_v51 = vmul.f32 %v4316_v16, %v1094_v18  ;;  %v2109_v36 = vmax.f32 %v2045_v29, 0.0  ;;  %v1099_v40 = vpop.f32.mrb[69].mxu0  ;;  %v5100_v6 = vpop.permute.xlu0 %1625  ;;  %v6493_v16 = vld [vmem:[#allocation50_spill] sm:$0xff] }
 0x19b   : > { %6486 = vst [vmem:[#allocation134_spill] sm:$0xff] %v5083_v0  ;;  %v1034_v37 = vadd.f32 %v6488_v39, %v4513_v2  ;;  %v5096_v63 = vadd.f32 %v1662_v11, %v6489_v46  ;;  %v6491_v0 = vld [vmem:[#allocation49_spill] sm:$0xff]  ;;  %v1098_v34 = vadd.f32 %v1097_v30, %v4509_v35  ;;  %v1100_v29 = vadd.f32 %v1099_v40, %v4513_v2 }
 0x19c   : > { %v2046_v57 = vadd.f32 %v6491_v0, %v1918_v9  ;;  %v5103_v26 = vadd.f32 %v1663_v31, %v4568_v43  ;;  %v2047_v18 = vadd.f32 %v6493_v16, %v1919_v51  ;;  %v2173_v39 = vmin.f32 %v2109_v36, 1.0  ;;  %v1103_v43 = vpop.f32.mrb[70].mxu0  ;;  %v6496_v36 = vld [vmem:[#allocation51_spill] sm:$0xff]  ;;  %v6497_v16 = vld [vmem:[#allocation54_spill] sm:$0xff] }
 0x19d   : > { %6490 = vst [vmem:[#allocation41_spill] sm:$0xff] %v5096_v63  ;;  %v1664_v20 = vmul.f32 %v4360_v38, %v1098_v34  ;;  %v1920_v11 = vmul.f32 %v6494_v14, %v1098_v34  ;;  %v2172_v46 = vmin.f32 %v2108_v19, 1.0  ;;  %v5110_v0 = vmul.f32 %v5093_v45, %v1032_v56 }
 0x19e   : > { %6492 = vst [vmem:[#allocation43_spill] sm:$0xff] %v5103_v26  ;;  %v2110_v63 = vmax.f32 %v2046_v57, 0.0  ;;  %v1665_v9 = vmul.f32 %v4360_v38, %v1100_v29  ;;  %v1921_v30 = vmul.f32 %v6494_v14, %v1100_v29  ;;  %2364 = vmatprep.mubr.f32.mxu1 %v2173_v39  ;;  %v2111_v31 = vmax.f32 %v2047_v18, 0.0  ;;  %v1105_v57 = vpop.f32.mrb[71].mxu0  ;;  %v6498_v26 = vld [vmem:[#allocation53_spill] sm:$0xff]  ;;  %v6499_v38 = vld [vmem:[#allocation55_spill] sm:$0xff] }
 0x19f   : > { %6495 = vst [vmem:[#allocation48_spill] sm:$0xff] %v5110_v0  ;;  %v5115_v51 = vmul.f32 %v5100_v6, %v1032_v56  ;;  %v5118_v40 = vadd.f32 %v1664_v20, %v6496_v36  ;;  %v2048_v34 = vadd.f32 %v6497_v16, %v1920_v11  ;;  %v1104_v19 = vadd.f32 %v1103_v43, %v4509_v35  ;;  %v1109_v36 = vpop.f32.mrb[72].mxu0 }
 0x1a0   : > { %2365 = vmatmul.mubr.f32.vlgmr.msra.gmra.mrb[0].mxu1 %v2172_v46  ;;  %v5123_v0 = vadd.f32 %v1665_v9, %v6498_v26  ;;  %v2049_v14 = vadd.f32 %v6499_v38, %v1921_v30  ;;  %v1106_v29 = vadd.f32 %v1105_v57, %v4513_v2  ;;  %v6500_v56 = vpack.c.bf16 %v4601_v44, %v4596_v50 }
 0x1a1   : > { %v2175_v18 = vmin.f32 %v2111_v31, 1.0  ;;  %v1666_v20 = vmul.f32 %v4373_v47, %v1104_v19  ;;  %v1922_v39 = vmul.f32 %v4376_v48, %v1104_v19  ;;  %v2174_v11 = vmin.f32 %v2110_v63, 1.0  ;;  %v6503_v63 = vld [vmem:[#allocation57_spill] sm:$0xff]  ;;  %v1111_v19 = vpop.f32.mrb[73].mxu0 }
 0x1a2   : > { %3794 = vmatpush1.bf16.msra.mxu1 %v6500_v56  ;;  %v6501_v43 = vmov 0.0|0.0   ;;  %v2112_v46 = vmax.f32 %v2048_v34, 0.0  ;;  %v5134_v26 = vmul.f32 %v5093_v45, %v1034_v37  ;;  %v1667_v9 = vmul.f32 %v4373_v47, %v1106_v29  ;;  %v6505_v47 = vld [vmem:[#allocation59_spill] sm:$0xff] }
 0x1a3   : > { %3795 = vmatprep.subr.bf16.mxu1 %v6501_v43  ;;  %v1923_v30 = vmul.f32 %v4376_v48, %v1106_v29  ;;  %2369 = vmatprep.mubr.f32.mxu1 %v2175_v18  ;;  %v2113_v44 = vmax.f32 %v2049_v14, 0.0  ;;  %v5139_v50 = vmul.f32 %v5100_v6, %v1034_v37  ;;  %v5142_v31 = vadd.f32 %v1666_v20, %v4604_v21  ;;  %v6507_v29 = vld [vmem:[#allocation4_spill] sm:$0xff] }
 0x1a4   : > { %v2050_v16 = vadd.f32 %v6503_v63, %v1922_v39  ;;  %v1110_v34 = vadd.f32 %v1109_v36, %v4509_v35  ;;  %2370 = vmatmul.mubr.f32.gmra.mrb[2].mxu1 %v2174_v11  ;;  %v5147_v57 = vadd.f32 %v1667_v9, %v4616_v49  ;;  %v1112_v38 = vadd.f32 %v1111_v19, %v4513_v2  ;;  %v6508_v49 = vld [vmem:[#allocation45_spill] sm:$0xff] }
 0x1a5   : > { %6502 = vst [vmem:[#allocation49_spill] sm:$0xff] %v5142_v31  ;;  %v2051_v48 = vadd.f32 %v6505_v47, %v1923_v30  ;;  %v2177_v14 = vmin.f32 %v2113_v44, 1.0  ;;  %v6506_v37 = vpack.c.bf16 %v4644_v25, %v4639_v23  ;;  %v2176_v18 = vmin.f32 %v2112_v46, 1.0  ;;  %v1115_v30 = vpop.f32.mrb[74].mxu0  ;;  %v6509_v23 = vld [vmem:[#allocation47_spill] sm:$0xff]  ;;  %v5165_v44 = vpop.permute.xlu1 %1430  ;;  %v6510_v46 = vld [vmem:[#allocation60_spill] sm:$0xff] }
 0x1a6   : > { %6504 = vst [vmem:[#allocation50_spill] sm:$0xff] %v5147_v57  ;;  %v1668_v21 = vmul.f32 %v4383_v52, %v1110_v34  ;;  %v1924_v56 = vmul.f32 %v6507_v29, %v1110_v34  ;;  %v2114_v20 = vmax.f32 %v2050_v16, 0.0  ;;  %v1038_v39 = vadd.f32 %v6508_v49, %v4509_v35  ;;  %v6512_v16 = vld [vmem:[#allocation61_spill] sm:$0xff]  ;;  %v1117_v47 = vpop.f32.mrb[75].mxu0 }
 0x1a7   : > { %3797 = vmatpush1.bf16.msra.mxu1 %v6506_v37  ;;  %v1669_v11 = vmul.f32 %v4383_v52, %v1112_v38  ;;  %v1925_v9 = vmul.f32 %v6507_v29, %v1112_v38  ;;  %2374 = vmatprep.mubr.f32.mxu1 %v2177_v14  ;;  %v2115_v36 = vmax.f32 %v2051_v48, 0.0  ;;  %v5163_v25 = vadd.f32 %v6509_v23, %v4513_v2  ;;  %v5172_v52 = vpop.permute.xlu0 %1629  ;;  %v6513_v38 = vld [vmem:[#allocation62_spill] sm:$0xff] }
 0x1a8   : > { %3798 = vmatprep.subr.bf16.mxu1 %v6501_v43  ;;  %v5168_v63 = vadd.f32 %v1668_v21, %v6510_v46  ;;  %v2052_v34 = vadd.f32 %v6512_v16, %v1924_v56  ;;  %v1116_v19 = vadd.f32 %v1115_v30, %v4509_v35  ;;  %2375 = vmatmul.mubr.f32.gmra.mrb[4].mxu1 %v2176_v18  ;;  %v2178_v30 = vmin.f32 %v2114_v20, 1.0  ;;  %v6518_v20 = vld [vmem:[#allocation64_spill] sm:$0xff] }
 0x1a9   : > { %v5175_v14 = vadd.f32 %v1669_v11, %v6513_v38  ;;  %v2053_v48 = vadd.f32 %v4647_v60, %v1925_v9  ;;  %v1118_v37 = vadd.f32 %v1117_v47, %v4513_v2  ;;  %v2179_v29 = vmin.f32 %v2115_v36, 1.0  ;;  %v1121_v36 = vpop.f32.mrb[76].mxu0  ;;  %v6521_v38 = vld [vmem:[#allocation68_spill] sm:$0xff] }
 0x1aa   : > { %6511 = vst [vmem:[#allocation3_spill] sm:$0xff] %v5168_v63  ;;  %v6515_v21 = vpack.c.bf16 %v4693_v59, %v4688_v4  ;;  %v1670_v56 = vmul.f32 %v4397_v61, %v1116_v19  ;;  %v1926_v49 = vmul.f32 %v4400_v62, %v1116_v19  ;;  %v2116_v18 = vmax.f32 %v2052_v34, 0.0  ;;  %v6516_v4 = vld [vmem:[#allocation63_spill] sm:$0xff]  ;;  %v1123_v19 = vpop.f32.mrb[77].mxu0 }
 0x1ab   : > { %6514 = vst [vmem:[#allocation51_spill] sm:$0xff] %v5175_v14  ;;  %v5186_v11 = vmul.f32 %v5165_v44, %v1038_v39  ;;  %v1671_v60 = vmul.f32 %v4397_v61, %v1118_v37  ;;  %v1927_v9 = vmul.f32 %v4400_v62, %v1118_v37  ;;  %2379 = vmatprep.mubr.f32.mxu1 %v2179_v29  ;;  %v2117_v23 = vmax.f32 %v2053_v48, 0.0  ;;  %v5201_v61 = vld [vmem:[%s6234_s5 + $0xa0] sm:$0xff]  ;;  %v5206_v62 = vld [vmem:[%s6234_s5 + $0xa8] sm:$0xff] }
 0x1ac   : > { %3800 = vmatpush1.bf16.msra.mxu1 %v6515_v21  ;;  %v5191_v59 = vmul.f32 %v5172_v52, %v1038_v39  ;;  %v5194_v46 = vadd.f32 %v1670_v56, %v6516_v4  ;;  %v2054_v16 = vadd.f32 %v6518_v20, %v1926_v49  ;;  %v1122_v34 = vadd.f32 %v1121_v36, %v4509_v35  ;;  %v6519_v39 = vld [vmem:[#allocation67_spill] sm:$0xff]  ;;  %v6651_v14 = vld [vmem:[#allocation28_spill] sm:$0xff] }
 0x1ad   : > { %3801 = vmatprep.subr.bf16.mxu1 %v6501_v43  ;;  %2380 = vmatmul.mubr.f32.gmra.mrb[6].mxu1 %v2178_v30  ;;  %v5209_v47 = vadd.f32 %v1671_v60, %v6519_v39  ;;  %v2055_v48 = vadd.f32 %v6521_v38, %v1927_v9  ;;  %v1124_v37 = vadd.f32 %v1123_v19, %v4513_v2  ;;  %v2181_v29 = vmin.f32 %v2117_v23, 1.0  ;;  %v1127_v9 = vpop.f32.mrb[78].mxu0  ;;  %v6528_v38 = vld [vmem:[#allocation74_spill] sm:$0xff] }
 0x1ae   : > { %6517 = vst [vmem:[#allocation54_spill] sm:$0xff] %v5194_v46  ;;  %v6522_v21 = vpack.c.bf16 %v4752_v7, %v4747_v15  ;;  %v1672_v56 = vmul.f32 %v4408_v3, %v1122_v34  ;;  %v1928_v49 = vmul.f32 %v4412_v5, %v1122_v34  ;;  %v2180_v30 = vmin.f32 %v2116_v18, 1.0  ;;  %v6523_v15 = vld [vmem:[#allocation69_spill] sm:$0xff]  ;;  %v6525_v18 = vld [vmem:[#allocation72_spill] sm:$0xff] }
 0x1af   : > { %6520 = vst [vmem:[#allocation53_spill] sm:$0xff] %v5209_v47  ;;  %v2118_v36 = vmax.f32 %v2054_v16, 0.0  ;;  %v1673_v60 = vmul.f32 %v4408_v3, %v1124_v37  ;;  %v1929_v4 = vmul.f32 %v4412_v5, %v1124_v37  ;;  %2384 = vmatprep.mubr.f32.mxu1 %v2181_v29  ;;  %v2119_v20 = vmax.f32 %v2055_v48, 0.0  ;;  %v1129_v3 = vpop.f32.mrb[79].mxu0  ;;  %v6526_v5 = vld [vmem:[#allocation73_spill] sm:$0xff] }
 0x1b0   : > { %3803 = vmatpush1.bf16.msra.mxu1 %v6522_v21  ;;  %v5225_v7 = vmul.f32 %v5165_v44, %v5163_v25  ;;  %v5228_v34 = vadd.f32 %v1672_v56, %v6523_v15  ;;  %v2056_v16 = vadd.f32 %v6525_v18, %v1928_v49  ;;  %v1128_v19 = vadd.f32 %v1127_v9, %v4509_v35  ;;  %v6650_v47 = vld [vmem:[#allocation25_spill] sm:$0xff] }
 0x1b1   : > { %3804 = vmatprep.subr.bf16.mxu1 %v6501_v43  ;;  %2385 = vmatmul.mubr.f32.gmra.mrb[8].mxu1 %v2180_v30  ;;  %v5233_v39 = vadd.f32 %v1673_v60, %v6526_v5  ;;  %v2057_v48 = vadd.f32 %v6528_v38, %v1929_v4  ;;  %v1130_v37 = vadd.f32 %v1129_v3, %v4513_v2  ;;  %v2183_v29 = vmin.f32 %v2119_v20, 1.0  ;;  %v1133_v20 = vpop.f32.mrb[80].mxu0  ;;  %v6531_v3 = vld [vmem:[#allocation75_spill] sm:$0xff] }
 0x1b2   : > { %6524 = vst [vmem:[#allocation55_spill] sm:$0xff] %v5228_v34  ;;  %v6529_v21 = vpack.c.bf16 %v4799_v41, %v4794_v27  ;;  %v1674_v56 = vmul.f32 %v4421_v12, %v1128_v19  ;;  %v1930_v49 = vmul.f32 %v4424_v13, %v1128_v19  ;;  %v2182_v15 = vmin.f32 %v2118_v36, 1.0  ;;  %v6530_v27 = vld [vmem:[#allocation56_spill] sm:$0xff]  ;;  %v1135_v5 = vpop.f32.mrb[81].mxu0  ;;  %v6583_v34 = vld [vmem:[#allocation101_spill] sm:$0xff] }
 0x1b3   : > { %6527 = vst [vmem:[#allocation57_spill] sm:$0xff] %v5233_v39  ;;  %v2120_v9 = vmax.f32 %v2056_v16, 0.0  ;;  %v5245_v30 = vmul.f32 %v5172_v52, %v5163_v25  ;;  %v1675_v60 = vmul.f32 %v4421_v12, %v1130_v37  ;;  %v1931_v4 = vmul.f32 %v4424_v13, %v1130_v37  ;;  %2389 = vmatprep.mubr.f32.mxu1 %v2183_v29  ;;  %v5256_v25 = vpop.permute.xlu1 %1435  ;;  %v6533_v12 = vld [vmem:[#allocation76_spill] sm:$0xff]  ;;  %v6535_v13 = vld [vmem:[#allocation77_spill] sm:$0xff]  ;;  %v6606_v39 = vld [vmem:[#allocation23_spill] sm:$0xff] }
 0x1b4   : > { %3806 = vmatpush1.bf16.msra.mxu1 %v6529_v21  ;;  %v2121_v41 = vmax.f32 %v2057_v48, 0.0  ;;  %v1044_v18 = vadd.f32 %v6530_v27, %v4509_v35  ;;  %v5252_v19 = vadd.f32 %v1674_v56, %v6531_v3  ;;  %v2058_v36 = vadd.f32 %v4710_v42, %v1930_v49  ;;  %v6537_v56 = vld [vmem:[#allocation5_spill] sm:$0xff]  ;;  %v6538_v49 = vld [vmem:[#allocation6_spill] sm:$0xff] }
 0x1b5   : > { %3807 = vmatprep.subr.bf16.mxu1 %v6501_v43  ;;  %v1134_v16 = vadd.f32 %v1133_v20, %v4509_v35  ;;  %2390 = vmatmul.mubr.f32.gmra.mrb[10].mxu1 %v2182_v15  ;;  %v5259_v38 = vadd.f32 %v1675_v60, %v6533_v12  ;;  %v2059_v37 = vadd.f32 %v6535_v13, %v1931_v4  ;;  %v2184_v27 = vmin.f32 %v2120_v9, 1.0  ;;  %v6539_v60 = vld [vmem:[#allocation58_spill] sm:$0xff] }
 0x1b6   : > { %6532 = vst [vmem:[#allocation59_spill] sm:$0xff] %v5252_v19  ;;  %v1136_v48 = vadd.f32 %v1135_v5, %v4513_v2  ;;  %v2185_v29 = vmin.f32 %v2121_v41, 1.0  ;;  %v6536_v21 = vpack.c.bf16 %v4844_v55, %v4839_v10  ;;  %v2122_v15 = vmax.f32 %v2058_v36, 0.0  ;;  %v1139_v41 = vpop.f32.mrb[82].mxu0  ;;  %v5276_v55 = vpop.permute.xlu0 %1633  ;;  %v6542_v36 = vld [vmem:[#allocation80_spill] sm:$0xff] }
 0x1b7   : > { %6534 = vst [vmem:[#allocation4_spill] sm:$0xff] %v5259_v38  ;;  %v1676_v42 = vmul.f32 %v6537_v56, %v1134_v16  ;;  %v1932_v20 = vmul.f32 %v6538_v49, %v1134_v16  ;;  %v1046_v3 = vadd.f32 %v6539_v60, %v4513_v2  ;;  %v2123_v12 = vmax.f32 %v2059_v37, 0.0  ;;  %v6540_v16 = vld [vmem:[#allocation79_spill] sm:$0xff]  ;;  %v1141_v60 = vpop.f32.mrb[83].mxu0  ;;  %v6581_v38 = vld [vmem:[#allocation13_spill] sm:$0xff] }
 0x1b8   : > { %3809 = vmatpush1.bf16.msra.mxu1 %v6536_v21  ;;  %v1677_v4 = vmul.f32 %v6537_v56, %v1136_v48  ;;  %v1933_v5 = vmul.f32 %v6538_v49, %v1136_v48  ;;  %2394 = vmatprep.mubr.f32.mxu1 %v2185_v29  ;;  %v5274_v10 = vmul.f32 %v5256_v25, %v1044_v18  ;;  %v6543_v56 = vld [vmem:[#allocation82_spill] sm:$0xff]  ;;  %v6545_v48 = vld [vmem:[#allocation83_spill] sm:$0xff] }
 0x1b9   : > { %3810 = vmatprep.subr.bf16.mxu1 %v6501_v43  ;;  %v5279_v9 = vadd.f32 %v1676_v42, %v6540_v16  ;;  %v2060_v13 = vadd.f32 %v6542_v36, %v1932_v20  ;;  %v1140_v21 = vadd.f32 %v1139_v41, %v4509_v35  ;;  %2395 = vmatmul.mubr.f32.gmra.mrb[12].mxu1 %v2184_v27  ;;  %v2187_v49 = vmin.f32 %v2123_v12, 1.0  ;;  %v6547_v42 = vld [vmem:[#allocation7_spill] sm:$0xff]  ;;  %v1145_v12 = vpop.f32.mrb[84].mxu0 }
 0x1ba   : > { %v5284_v23 = vadd.f32 %v1677_v4, %v6543_v56  ;;  %v2061_v29 = vadd.f32 %v6545_v48, %v1933_v5  ;;  %v1142_v37 = vadd.f32 %v1141_v60, %v4513_v2  ;;  %v6546_v19 = vpack.c.bf16 %v4890_v58, %v4885_v24  ;;  %v6549_v58 = vld [vmem:[#allocation84_spill] sm:$0xff]  ;;  %v1147_v56 = vpop.f32.mrb[85].mxu0 }
 0x1bb   : > { %6541 = vst [vmem:[#allocation45_spill] sm:$0xff] %v5279_v9  ;;  %v1678_v16 = vmul.f32 %v6547_v42, %v1140_v21  ;;  %v6548_v9 = vld [vmem:[#allocation8_spill] sm:$0xff]  ;;  %v2186_v36 = vmin.f32 %v2122_v15, 1.0  ;;  %v2124_v41 = vmax.f32 %v2060_v13, 0.0  ;;  %v5295_v27 = vmul.f32 %v5276_v55, %v1044_v18  ;;  %2399 = vmatprep.mubr.f32.mxu1 %v2187_v49  ;;  %v6551_v15 = vld [vmem:[#allocation87_spill] sm:$0xff]  ;;  %v6552_v18 = vld [vmem:[#allocation86_spill] sm:$0xff] }
 0x1bc   : > { %6544 = vst [vmem:[#allocation47_spill] sm:$0xff] %v5284_v23  ;;  %3812 = vmatpush1.bf16.msra.mxu1 %v6546_v19  ;;  %v1934_v20 = vmul.f32 %v6548_v9, %v1140_v21  ;;  %v1679_v4 = vmul.f32 %v6547_v42, %v1142_v37  ;;  %v1935_v5 = vmul.f32 %v6548_v9, %v1142_v37  ;;  %v2125_v60 = vmax.f32 %v2061_v29, 0.0  ;;  %v6554_v42 = vld [vmem:[#allocation89_spill] sm:$0xff] }
 0x1bd   : > { %3813 = vmatprep.subr.bf16.mxu1 %v6501_v43  ;;  %v5300_v24 = vmul.f32 %v5256_v25, %v1046_v3  ;;  %v5303_v19 = vadd.f32 %v1678_v16, %v6549_v58  ;;  %v1146_v21 = vadd.f32 %v1145_v12, %v4509_v35  ;;  %2400 = vmatmul.mubr.f32.gmra.mrb[14].mxu1 %v2186_v36  ;;  %v6556_v16 = vld [vmem:[#allocation10_spill] sm:$0xff] }
 0x1be   : > { %v2062_v13 = vadd.f32 %v6551_v15, %v1934_v20  ;;  %v5308_v48 = vadd.f32 %v1679_v4, %v6552_v18  ;;  %v2063_v9 = vadd.f32 %v6554_v42, %v1935_v5  ;;  %v1148_v37 = vadd.f32 %v1147_v56, %v4513_v2  ;;  %v6559_v18 = vld [vmem:[#allocation90_spill] sm:$0xff] }
 0x1bf   : > { %6550 = vst [vmem:[#allocation60_spill] sm:$0xff] %v5303_v19  ;;  %v2189_v29 = vmin.f32 %v2125_v60, 1.0  ;;  %v6555_v49 = vpack.c.bf16 %v4949_v8, %v4944_v53  ;;  %v1680_v58 = vmul.f32 %v6556_v16, %v1146_v21  ;;  %v6557_v19 = vld [vmem:[#allocation12_spill] sm:$0xff]  ;;  %v2188_v15 = vmin.f32 %v2124_v41, 1.0  ;;  %v1151_v60 = vpop.f32.mrb[86].mxu0  ;;  %v6558_v8 = vld [vmem:[#allocation66_spill] sm:$0xff] }
 0x1c0   : > { %6553 = vst [vmem:[#allocation61_spill] sm:$0xff] %v5308_v48  ;;  %v1936_v20 = vmul.f32 %v6557_v19, %v1146_v21  ;;  %v2126_v12 = vmax.f32 %v2062_v13, 0.0  ;;  %v5319_v36 = vmul.f32 %v5276_v55, %v1046_v3  ;;  %v1681_v4 = vmul.f32 %v6556_v16, %v1148_v37  ;;  %v6561_v41 = vld [vmem:[#allocation91_spill] sm:$0xff]  ;;  %v5330_v3 = vpop.permute.xlu1 %1440  ;;  %v6562_v16 = vld [vmem:[#allocation93_spill] sm:$0xff] }
 0x1c1   : > { %3815 = vmatpush1.bf16.msra.mxu1 %v6555_v49  ;;  %v1937_v5 = vmul.f32 %v6557_v19, %v1148_v37  ;;  %2404 = vmatprep.mubr.f32.mxu1 %v2189_v29  ;;  %v2127_v56 = vmax.f32 %v2063_v9, 0.0  ;;  %v1050_v53 = vadd.f32 %v6558_v8, %v4509_v35  ;;  %v5326_v42 = vadd.f32 %v1680_v58, %v6559_v18  ;;  %v1153_v49 = vpop.f32.mrb[87].mxu0  ;;  %v6564_v19 = vld [vmem:[#allocation94_spill] sm:$0xff]  ;;  %v6566_v8 = vld [vmem:[#allocation16_spill] sm:$0xff]  ;;  %v6567_v18 = vld [vmem:[#allocation17_spill] sm:$0xff] }
 0x1c2   : > { %3816 = vmatprep.subr.bf16.mxu1 %v6501_v43  ;;  %v2064_v13 = vadd.f32 %v6561_v41, %v1936_v20  ;;  %v1152_v21 = vadd.f32 %v1151_v60, %v4509_v35  ;;  %2405 = vmatmul.mubr.f32.gmra.mrb[16].mxu1 %v2188_v15  ;;  %v5333_v48 = vadd.f32 %v1681_v4, %v6562_v16  ;;  %v2190_v41 = vmin.f32 %v2126_v12, 1.0  ;;  %v6568_v4 = vld [vmem:[#allocation71_spill] sm:$0xff]  ;;  %v6569_v12 = vld [vmem:[#allocation96_spill] sm:$0xff] }
 0x1c3   : > { %6560 = vst [vmem:[#allocation62_spill] sm:$0xff] %v5326_v42  ;;  %v2065_v37 = vadd.f32 %v6564_v19, %v1937_v5  ;;  %v1154_v9 = vadd.f32 %v1153_v49, %v4513_v2  ;;  %v2191_v29 = vmin.f32 %v2127_v56, 1.0  ;;  %v6565_v58 = vpack.c.bf16 %v4995_v54, %v4990_v22  ;;  %v1157_v49 = vpop.f32.mrb[88].mxu0  ;;  %v5352_v19 = vpop.permute.xlu0 %1637 }
 0x1c4   : > { %6563 = vst [vmem:[#allocation63_spill] sm:$0xff] %v5333_v48  ;;  %v1682_v20 = vmul.f32 %v6566_v8, %v1152_v21  ;;  %v1938_v60 = vmul.f32 %v6567_v18, %v1152_v21  ;;  %v2128_v15 = vmax.f32 %v2064_v13, 0.0  ;;  %v5345_v16 = vadd.f32 %v6568_v4, %v4513_v2  ;;  %v6571_v21 = vld [vmem:[#allocation97_spill] sm:$0xff]  ;;  %v1159_v42 = vpop.f32.mrb[89].mxu0 }
 0x1c5   : > { %3818 = vmatpush1.bf16.msra.mxu1 %v6565_v58  ;;  %v1683_v5 = vmul.f32 %v6566_v8, %v1154_v9  ;;  %v1939_v56 = vmul.f32 %v6567_v18, %v1154_v9  ;;  %2409 = vmatprep.mubr.f32.mxu1 %v2191_v29  ;;  %v2129_v22 = vmax.f32 %v2065_v37, 0.0  ;;  %v5350_v54 = vmul.f32 %v5330_v3, %v1050_v53  ;;  %v6572_v8 = vld [vmem:[#allocation9_spill] sm:$0xff]  ;;  %v6574_v9 = vld [vmem:[#allocation11_spill] sm:$0xff] }
 0x1c6   : > { %3819 = vmatprep.subr.bf16.mxu1 %v6501_v43  ;;  %v5355_v13 = vadd.f32 %v1682_v20, %v6569_v12  ;;  %v2066_v58 = vadd.f32 %v6571_v21, %v1938_v60  ;;  %v1158_v4 = vadd.f32 %v1157_v49, %v4509_v35  ;;  %2410 = vmatmul.mubr.f32.gmra.mrb[18].mxu1 %v2190_v41  ;;  %v2258_v20 = vld [vmem:[%s6234_s5 + $0xb0] sm:$0xff]  ;;  %v2259_v60 = vld [vmem:[%s6234_s5 + $0xb8] sm:$0xff] }
 0x1c7   : > { %v5360_v48 = vadd.f32 %v1683_v5, %v6572_v8  ;;  %v2067_v29 = vadd.f32 %v6574_v9, %v1939_v56  ;;  %v1160_v37 = vadd.f32 %v1159_v42, %v4513_v2  ;;  %v2193_v18 = vmin.f32 %v2129_v22, 1.0  ;;  %v6576_v41 = vld [vmem:[#allocation20_spill] sm:$0xff]  ;;  %v6577_v49 = vld [vmem:[#allocation22_spill] sm:$0xff] }
 0x1c8   : > { %6570 = vst [vmem:[#allocation64_spill] sm:$0xff] %v5355_v13  ;;  %v6575_v23 = vpack.c.bf16 %v5049_v17, %v5044_v28  ;;  %v1684_v5 = vmul.f32 %v6576_v41, %v1158_v4  ;;  %v1940_v12 = vmul.f32 %v6577_v49, %v1158_v4  ;;  %v2192_v56 = vmin.f32 %v2128_v15, 1.0  ;;  %v6578_v8 = vld [vmem:[#allocation98_spill] sm:$0xff]  ;;  %v6580_v13 = vld [vmem:[#allocation99_spill] sm:$0xff] }
 0x1c9   : > { %6573 = vst [vmem:[#allocation67_spill] sm:$0xff] %v5360_v48  ;;  %v2130_v21 = vmax.f32 %v2066_v58, 0.0  ;;  %v5377_v42 = vmul.f32 %v5352_v19, %v1050_v53  ;;  %v1685_v28 = vmul.f32 %v6576_v41, %v1160_v37  ;;  %v1941_v17 = vmul.f32 %v6577_v49, %v1160_v37  ;;  %2414 = vmatprep.mubr.f32.mxu1 %v2193_v18  ;;  %v2261_v18 = vld [vmem:[%s6234_s5 + $0xc8] sm:$0xff] }
 0x1ca   : > { %3821 = vmatpush1.bf16.msra.mxu1 %v6575_v23  ;;  %v1163_v23 = vpop.f32.mrb[90].mxu0  ;;  %v2131_v22 = vmax.f32 %v2067_v29, 0.0  ;;  %v5382_v9 = vadd.f32 %v1684_v5, %v6578_v8  ;;  %v2068_v48 = vadd.f32 %v6580_v13, %v1940_v12  ;;  %v3826_v4 = vpack.c.bf16 %v2259_v60, %v2258_v20  ;;  %v2260_v13 = vld [vmem:[%s6234_s5 + $0xc0] sm:$0xff] }
 0x1cb   : > { %3822 = vmatprep.subr.bf16.mxu1 %v6501_v43  ;;  %v1164_v15 = vadd.f32 %v1163_v23, %v4509_v35  ;;  %v1165_v58 = vpop.f32.mrb[91].mxu0  ;;  %2415 = vmatmul.mubr.f32.gmra.mrb[20].mxu1 %v2192_v56  ;;  %v5387_v53 = vadd.f32 %v1685_v28, %v6581_v38  ;;  %v2069_v41 = vadd.f32 %v6583_v34, %v1941_v17  ;;  %v6585_v20 = vld [vmem:[#allocation26_spill] sm:$0xff]  ;;  %v6586_v60 = vld [vmem:[#allocation27_spill] sm:$0xff]  ;;  %v2194_v34 = vmin.f32 %v2130_v21, 1.0 }
 0x1cc   : > { %6579 = vst [vmem:[#allocation68_spill] sm:$0xff] %v5382_v9  ;;  %v1166_v37 = vadd.f32 %v1165_v58, %v4513_v2  ;;  %v2195_v49 = vmin.f32 %v2131_v22, 1.0  ;;  %v6584_v29 = vpack.c.bf16 %v5206_v62, %v5201_v61  ;;  %v2132_v12 = vmax.f32 %v2068_v48, 0.0  ;;  %v1169_v28 = vpop.f32.mrb[92].mxu0  ;;  %v6587_v23 = vld [vmem:[#allocation102_spill] sm:$0xff]  ;;  %v6589_v8 = vld [vmem:[#allocation103_spill] sm:$0xff] }
 0x1cd   : > { %6582 = vst [vmem:[#allocation69_spill] sm:$0xff] %v5387_v53  ;;  %v1686_v38 = vmul.f32 %v6585_v20, %v1164_v15  ;;  %v1942_v5 = vmul.f32 %v6586_v60, %v1164_v15  ;;  %v5405_v61 = vmul.f32 %v5330_v3, %v5345_v16  ;;  %v2133_v17 = vmax.f32 %v2069_v41, 0.0  ;;  %v1171_v21 = vpop.f32.mrb[93].mxu0  ;;  %v6592_v53 = vld [vmem:[#allocation106_spill] sm:$0xff]  ;;  %v2262_v41 = vld [vmem:[%s6234_s5 + $0xd0] sm:$0xff] }
 0x1ce   : > { %3824 = vmatpush1.bf16.msra.mxu1 %v6584_v29  ;;  %v1687_v62 = vmul.f32 %v6585_v20, %v1166_v37  ;;  %v1943_v56 = vmul.f32 %v6586_v60, %v1166_v37  ;;  %2419 = vmatprep.mubr.f32.mxu1 %v2195_v49  ;;  %v1170_v48 = vadd.f32 %v1169_v28, %v4509_v35  ;;  %v6590_v29 = vld [vmem:[#allocation105_spill] sm:$0xff]  ;;  %v1175_v28 = vpop.f32.mrb[94].mxu0 }
 0x1cf   : > { %3825 = vmatprep.subr.bf16.mxu1 %v6501_v43  ;;  %v5410_v22 = vadd.f32 %v1686_v38, %v6587_v23  ;;  %v2070_v15 = vadd.f32 %v6589_v8, %v1942_v5  ;;  %2420 = vmatmul.mubr.f32.gmra.mrb[22].mxu1 %v2194_v34  ;;  %v3829_v58 = vpack.c.bf16 %v2261_v18, %v2260_v13  ;;  %v2197_v60 = vmin.f32 %v2133_v17, 1.0  ;;  %v2263_v49 = vld [vmem:[%s6234_s5 + $0xd8] sm:$0xff]  ;;  %v6594_v13 = vld [vmem:[#allocation32_spill] sm:$0xff]  ;;  %v6595_v23 = vld [vmem:[#allocation107_spill] sm:$0xff] }
 0x1d0   : > { %v5415_v9 = vadd.f32 %v1687_v62, %v6590_v29  ;;  %v2071_v20 = vadd.f32 %v6592_v53, %v1943_v56  ;;  %v1172_v37 = vadd.f32 %v1171_v21, %v4513_v2  ;;  %v6593_v38 = vld [vmem:[#allocation30_spill] sm:$0xff]  ;;  %v1944_v18 = vmul.f32 %v6594_v13, %v1170_v48  ;;  %v6597_v21 = vld [vmem:[#allocation108_spill] sm:$0xff] }
 0x1d1   : > { %6588 = vst [vmem:[#allocation72_spill] sm:$0xff] %v5410_v22  ;;  %v1688_v5 = vmul.f32 %v6593_v38, %v1170_v48  ;;  %v2196_v34 = vmin.f32 %v2132_v12, 1.0  ;;  %v2134_v62 = vmax.f32 %v2070_v15, 0.0  ;;  %v5430_v53 = vmul.f32 %v5352_v19, %v5345_v16  ;;  %2424 = vmatprep.mubr.f32.mxu1 %v2197_v60  ;;  %v1177_v15 = vpop.f32.mrb[95].mxu0  ;;  %v2853_v16 = vld [vmem:[%s6237_s8] sm:$0xff] }
 0x1d2   : > { %6591 = vst [vmem:[#allocation73_spill] sm:$0xff] %v5415_v9  ;;  %3827 = vmatpush1.bf16.msra.mxu1 %v3826_v4  ;;  %v1689_v4 = vmul.f32 %v6593_v38, %v1172_v37  ;;  %v1945_v56 = vmul.f32 %v6594_v13, %v1172_v37  ;;  %v2135_v17 = vmax.f32 %v2071_v20, 0.0  ;;  %v2072_v48 = vadd.f32 %v6597_v21, %v1944_v18  ;;  %v2854_v37 = vld [vmem:[%s6237_s8 + $0x8] sm:$0xff]  ;;  %v6598_v60 = vld [vmem:[#allocation18_spill] sm:$0xff] }
 0x1d3   : > { %3828 = vmatprep.subr.bf16.mxu1 %v6501_v43  ;;  %v5435_v8 = vadd.f32 %v1688_v5, %v6595_v23  ;;  %v1176_v12 = vadd.f32 %v1175_v28, %v4509_v35  ;;  %2425 = vmatmul.mubr.f32.gmra.mrb[24].mxu1 %v2196_v34  ;;  %v3832_v29 = vpack.c.bf16 %v2263_v49, %v2262_v41  ;;  %v6600_v38 = vld [vmem:[#allocation19_spill] sm:$0xff]  ;;  %v6601_v34 = vld [vmem:[#allocation36_spill] sm:$0xff]  ;;  %v6602_v23 = vld [vmem:[#allocation37_spill] sm:$0xff] }
 0x1d4   : > { %v5446_v20 = vadd.f32 %v1689_v4, %v6598_v60  ;;  %v2073_v5 = vadd.f32 %v6600_v38, %v1945_v56  ;;  %v1178_v13 = vadd.f32 %v1177_v15, %v4513_v2  ;;  %v2199_v18 = vmin.f32 %v2135_v17, 1.0  ;;  %v2264_v41 = vld [vmem:[%s6234_s5 + $0xe0] sm:$0xff]  ;;  %v2265_v49 = vld [vmem:[%s6234_s5 + $0xe8] sm:$0xff]  ;;  %v1181_v17 = vpop.f32.mrb[96].mxu0 }
 0x1d5   : > { %6596 = vst [vmem:[#allocation74_spill] sm:$0xff] %v5435_v8  ;;  %v1690_v28 = vmul.f32 %v6601_v34, %v1176_v12  ;;  %v1946_v21 = vmul.f32 %v6602_v23, %v1176_v12  ;;  %v2198_v4 = vmin.f32 %v2134_v62, 1.0  ;;  %v2136_v60 = vmax.f32 %v2072_v48, 0.0  ;;  %v6603_v8 = vld [vmem:[#allocation109_spill] sm:$0xff]  ;;  %v6605_v22 = vld [vmem:[#allocation110_spill] sm:$0xff]  ;;  %v1183_v62 = vpop.f32.mrb[97].mxu0 }
 0x1d6   : > { %6599 = vst [vmem:[#allocation56_spill] sm:$0xff] %v5446_v20  ;;  %3830 = vmatpush1.bf16.msra.mxu1 %v3829_v58  ;;  %v1691_v56 = vmul.f32 %v6601_v34, %v1178_v13  ;;  %v1947_v58 = vmul.f32 %v6602_v23, %v1178_v13  ;;  %2429 = vmatprep.mubr.f32.mxu1 %v2199_v18  ;;  %v2137_v15 = vmax.f32 %v2073_v5, 0.0  ;;  %v6608_v34 = vld [vmem:[#allocation111_spill] sm:$0xff] }
 0x1d7   : > { %3831 = vmatprep.subr.bf16.mxu1 %v6501_v43  ;;  %v5461_v38 = vpack.c.bf16 %v2854_v37, %v2853_v16  ;;  %v5464_v20 = vadd.f32 %v1690_v28, %v6603_v8  ;;  %v2074_v9 = vadd.f32 %v6605_v22, %v1946_v21  ;;  %v1182_v12 = vadd.f32 %v1181_v17, %v4509_v35  ;;  %v2266_v8 = vld [vmem:[%s6234_s5 + $0xf0] sm:$0xff]  ;;  %v2267_v22 = vld [vmem:[%s6234_s5 + $0xf8] sm:$0xff] }
 0x1d8   : > { %2430 = vmatmul.mubr.f32.gmra.mrb[26].mxu1 %v2198_v4  ;;  %v3835_v48 = vpack.c.bf16 %v2265_v49, %v2264_v41  ;;  %v5469_v46 = vadd.f32 %v1691_v56, %v6606_v39  ;;  %v2075_v13 = vadd.f32 %v6608_v34, %v1947_v58  ;;  %v1184_v18 = vadd.f32 %v1183_v62, %v4513_v2  ;;  %v6609_v16 = vld [vmem:[#allocation40_spill] sm:$0xff]  ;;  %v6610_v39 = vld [vmem:[#allocation42_spill] sm:$0xff]  ;;  %v1187_v56 = vpop.f32.mrb[98].mxu0 }
 0x1d9   : > { %6604 = vst [vmem:[#allocation75_spill] sm:$0xff] %v5464_v20  ;;  %v2201_v5 = vmin.f32 %v2137_v15, 1.0  ;;  %3841 = vmatprep.subr.bf16.mxu0 %v5461_v38  ;;  %v1692_v37 = vmul.f32 %v6609_v16, %v1182_v12  ;;  %v1948_v41 = vmul.f32 %v6610_v39, %v1182_v12  ;;  %v2200_v49 = vmin.f32 %v2136_v60, 1.0  ;;  %v6612_v17 = vld [vmem:[#allocation112_spill] sm:$0xff]  ;;  %v6614_v12 = vld [vmem:[#allocation113_spill] sm:$0xff]  ;;  %v1189_v62 = vpop.f32.mrb[99].mxu0  ;;  %v5493_v20 = vpop.permute.xlu1 %1445 }
 0x1da   : > { %6607 = vst [vmem:[#allocation76_spill] sm:$0xff] %v5469_v46  ;;  %3833 = vmatpush1.bf16.msra.mxu1 %v3832_v29  ;;  %v2138_v28 = vmax.f32 %v2074_v9, 0.0  ;;  %3843 = vmatpush3.bf16.msra.mxu0 %v5461_v38  ;;  %v6611_v29 = vld [vmem:[#allocation78_spill] sm:$0xff]  ;;  %v1693_v21 = vmul.f32 %v6609_v16, %v1184_v18  ;;  %v1949_v4 = vmul.f32 %v6610_v39, %v1184_v18  ;;  %v2139_v58 = vmax.f32 %v2075_v13, 0.0  ;;  %v6617_v16 = vld [vmem:[#allocation115_spill] sm:$0xff]  ;;  %v6618_v39 = vld [vmem:[#allocation52_spill] sm:$0xff] }
 0x1db   : > { %3834 = vmatprep.subr.bf16.mxu1 %v6501_v43  ;;  %v1056_v23 = vadd.f32 %v6611_v29, %v4509_v35  ;;  %2434 = vmatprep.mubr.f32.mxu1 %v2201_v5  ;;  %v5489_v15 = vadd.f32 %v1692_v37, %v6612_v17  ;;  %v2076_v60 = vadd.f32 %v6614_v12, %v1948_v41  ;;  %v6615_v29 = vld [vmem:[#allocation114_spill] sm:$0xff] }
 0x1dc   : > { %v1188_v9 = vadd.f32 %v1187_v56, %v4509_v35  ;;  %2435 = vmatmul.mubr.f32.gmra.mrb[28].mxu1 %v2200_v49  ;;  %v3838_v34 = vpack.c.bf16 %v2267_v22, %v2266_v8  ;;  %v5496_v46 = vadd.f32 %v1693_v21, %v6615_v29  ;;  %v2077_v18 = vadd.f32 %v6617_v16, %v1949_v4  ;;  %v6619_v8 = vld [vmem:[#allocation81_spill] sm:$0xff]  ;;  %v1193_v4 = vpop.f32.mrb[100].mxu0 }
 0x1dd   : > { %6613 = vst [vmem:[#allocation77_spill] sm:$0xff] %v5489_v15  ;;  %v1190_v5 = vadd.f32 %v1189_v62, %v4513_v2  ;;  %v2203_v13 = vmin.f32 %v2139_v58, 1.0  ;;  %v2202_v17 = vmin.f32 %v2138_v28, 1.0  ;;  %v2140_v56 = vmax.f32 %v2076_v60, 0.0  ;;  %v5510_v58 = vpop.permute.xlu0 %1641  ;;  %v1195_v62 = vpop.f32.mrb[101].mxu0 }
 0x1de   : > { %6616 = vst [vmem:[#allocation5_spill] sm:$0xff] %v5496_v46  ;;  %3836 = vmatpush1.bf16.msra.mxu1 %v3835_v48  ;;  %v1694_v37 = vmul.f32 %v4565_v1, %v1188_v9  ;;  %v1950_v41 = vmul.f32 %v6618_v39, %v1188_v9  ;;  %v1058_v22 = vadd.f32 %v6619_v8, %v4513_v2  ;;  %v2141_v12 = vmax.f32 %v2077_v18, 0.0  ;;  %v6620_v9 = vld [vmem:[#allocation29_spill] sm:$0xff]  ;;  %v6625_v8 = vld [vmem:[#allocation70_spill] sm:$0xff] }
 0x1df   : > { %3837 = vmatprep.subr.bf16.mxu1 %v6501_v43  ;;  %v1695_v49 = vmul.f32 %v4565_v1, %v1190_v5  ;;  %v1951_v21 = vmul.f32 %v6618_v39, %v1190_v5  ;;  %2439 = vmatprep.mubr.f32.mxu1 %v2203_v13  ;;  %v5508_v48 = vmul.f32 %v5493_v20, %v1056_v23  ;;  %v6622_v1 = vld [vmem:[#allocation116_spill] sm:$0xff]  ;;  %v6624_v13 = vld [vmem:[#allocation65_spill] sm:$0xff] }
 0x1e0   : > { %v5513_v28 = vadd.f32 %v1694_v37, %v6620_v9  ;;  %v2078_v43 = vadd.f32 %v4958_v32, %v1950_v41  ;;  %v1194_v60 = vadd.f32 %v1193_v4, %v4509_v35  ;;  %2440 = vmatmul.mubr.f32.gmra.mrb[30].mxu1 %v2202_v17  ;;  %v1196_v18 = vadd.f32 %v1195_v62, %v4513_v2 }
 0x1e1   : > { %v5518_v29 = vadd.f32 %v1695_v49, %v6622_v1  ;;  %v2079_v16 = vadd.f32 %v4965_v33, %v1951_v21  ;;  %v2205_v5 = vmin.f32 %v2141_v12, 1.0  ;;  %v2204_v9 = vmin.f32 %v2140_v56, 1.0  ;;  %v1199_v33 = vpop.f32.mrb[102].mxu0  ;;  %v6626_v21 = vld [vmem:[#allocation117_spill] sm:$0xff]  ;;  %v6628_v56 = vld [vmem:[#allocation118_spill] sm:$0xff]  ;;  %v6631_v1 = vld [vmem:[#allocation120_spill] sm:$0xff] }
 0x1e2   : > { %6621 = vst [vmem:[#allocation6_spill] sm:$0xff] %v5513_v28  ;;  %3839 = vmatpush1.bf16.msra.mxu1 %v3838_v34  ;;  %v1696_v39 = vmul.f32 %v6624_v13, %v1194_v60  ;;  %v1952_v37 = vmul.f32 %v6625_v8, %v1194_v60  ;;  %v2142_v28 = vmax.f32 %v2078_v43, 0.0  ;;  %v5526_v32 = vmul.f32 %v5510_v58, %v1056_v23  ;;  %v1201_v60 = vpop.f32.mrb[103].mxu0  ;;  %v6629_v23 = vld [vmem:[#allocation119_spill] sm:$0xff] }
 0x1e3   : > { %6623 = vst [vmem:[#allocation58_spill] sm:$0xff] %v5518_v29  ;;  %3848 = vmatprep.subr.bf16.mxu1 %v5461_v38  ;;  %v1697_v41 = vmul.f32 %v6624_v13, %v1196_v18  ;;  %v1953_v17 = vmul.f32 %v6625_v8, %v1196_v18  ;;  %2444 = vmatprep.mubr.f32.mxu1 %v2205_v5  ;;  %v2143_v49 = vmax.f32 %v2079_v16, 0.0  ;;  %v6632_v13 = vld [vmem:[#allocation85_spill] sm:$0xff]  ;;  %v6633_v29 = vld [vmem:[#allocation88_spill] sm:$0xff] }
 0x1e4   : > { %v5531_v34 = vmul.f32 %v5493_v20, %v1058_v22  ;;  %v5534_v4 = vadd.f32 %v1696_v39, %v6626_v21  ;;  %v2080_v12 = vadd.f32 %v6628_v56, %v1952_v37  ;;  %v1200_v43 = vadd.f32 %v1199_v33, %v4509_v35  ;;  %2445 = vmatmul.mubr.f32.gmra.mrb[32].mxu1 %v2204_v9 }
 0x1e5   : > { %v5539_v62 = vadd.f32 %v1697_v41, %v6629_v23  ;;  %v2081_v18 = vadd.f32 %v6631_v1, %v1953_v17  ;;  %v1202_v5 = vadd.f32 %v1201_v60, %v4513_v2  ;;  %v2207_v16 = vmin.f32 %v2143_v49, 1.0  ;;  %v1205_v41 = vpop.f32.mrb[104].mxu0  ;;  %v6634_v17 = vld [vmem:[#allocation92_spill] sm:$0xff]  ;;  %v6635_v49 = vld [vmem:[#allocation34_spill] sm:$0xff] }
 0x1e6   : > { %6627 = vst [vmem:[#allocation79_spill] sm:$0xff] %v5534_v4  ;;  %v1698_v8 = vmul.f32 %v6632_v13, %v1200_v43  ;;  %v1954_v15 = vmul.f32 %v6633_v29, %v1200_v43  ;;  %v2206_v39 = vmin.f32 %v2142_v28, 1.0  ;;  %v2144_v21 = vmax.f32 %v2080_v12, 0.0  ;;  %v6637_v1 = vld [vmem:[#allocation122_spill] sm:$0xff]  ;;  %v1207_v12 = vpop.f32.mrb[105].mxu0 }
 0x1e7   : > { %6630 = vst [vmem:[#allocation80_spill] sm:$0xff] %v5539_v62  ;;  %v5546_v37 = vmul.f32 %v5510_v58, %v1058_v22  ;;  %v1699_v33 = vmul.f32 %v6632_v13, %v1202_v5  ;;  %v1955_v9 = vmul.f32 %v6633_v29, %v1202_v5  ;;  %2449 = vmatprep.mubr.f32.mxu1 %v2207_v16  ;;  %v2145_v56 = vmax.f32 %v2081_v18, 0.0  ;;  %v5557_v22 = vpop.permute.xlu1 %1450  ;;  %v6638_v13 = vld [vmem:[#allocation121_spill] sm:$0xff]  ;;  %v6640_v29 = vld [vmem:[#allocation35_spill] sm:$0xff] }
 0x1e8   : > { %v1062_v60 = vadd.f32 %v6634_v17, %v4509_v35  ;;  %v5553_v23 = vadd.f32 %v1698_v8, %v6635_v49  ;;  %v2082_v43 = vadd.f32 %v6637_v1, %v1954_v15  ;;  %v1206_v28 = vadd.f32 %v1205_v41, %v4509_v35  ;;  %2450 = vmatmul.mubr.f32.gmra.mrb[34].mxu1 %v2206_v39  ;;  %v6641_v17 = vld [vmem:[#allocation14_spill] sm:$0xff]  ;;  %v6642_v8 = vld [vmem:[#allocation15_spill] sm:$0xff] }
 0x1e9   : > { %v5560_v4 = vadd.f32 %v1699_v33, %v6638_v13  ;;  %v2083_v5 = vadd.f32 %v6640_v29, %v1955_v9  ;;  %v1208_v18 = vadd.f32 %v1207_v12, %v4513_v2  ;;  %v2209_v16 = vmin.f32 %v2145_v56, 1.0  ;;  %v6643_v41 = vld [vmem:[#allocation95_spill] sm:$0xff]  ;;  %v1211_v33 = vpop.f32.mrb[106].mxu0  ;;  %v5573_v56 = vpop.permute.xlu0 %1645 }
 0x1ea   : > { %6636 = vst [vmem:[#allocation82_spill] sm:$0xff] %v5553_v23  ;;  %v1700_v62 = vmul.f32 %v6641_v17, %v1206_v28  ;;  %v1956_v49 = vmul.f32 %v6642_v8, %v1206_v28  ;;  %v2208_v23 = vmin.f32 %v2144_v21, 1.0  ;;  %v2146_v15 = vmax.f32 %v2082_v43, 0.0  ;;  %v6644_v12 = vld [vmem:[#allocation123_spill] sm:$0xff]  ;;  %v6646_v21 = vld [vmem:[#allocation124_spill] sm:$0xff] }
 0x1eb   : > { %6639 = vst [vmem:[#allocation83_spill] sm:$0xff] %v5560_v4  ;;  %v1064_v1 = vadd.f32 %v6643_v41, %v4513_v2  ;;  %v1701_v39 = vmul.f32 %v6641_v17, %v1208_v18  ;;  %v1957_v46 = vmul.f32 %v6642_v8, %v1208_v18  ;;  %2454 = vmatprep.mubr.f32.mxu1 %v2209_v16  ;;  %v2147_v13 = vmax.f32 %v2083_v5, 0.0  ;;  %v1213_v41 = vpop.f32.mrb[107].mxu0  ;;  %v6647_v17 = vld [vmem:[#allocation125_spill] sm:$0xff]  ;;  %v6649_v18 = vld [vmem:[#allocation126_spill] sm:$0xff] }
 0x1ec   : > { %v5571_v9 = vmul.f32 %v5557_v22, %v1062_v60  ;;  %v5576_v29 = vadd.f32 %v1700_v62, %v6644_v12  ;;  %v2084_v43 = vadd.f32 %v6646_v21, %v1956_v49  ;;  %v1212_v28 = vadd.f32 %v1211_v33, %v4509_v35  ;;  %2455 = vmatmul.mubr.f32.gmra.mrb[36].mxu1 %v2208_v23 }
 0x1ed   : > { %v5581_v4 = vadd.f32 %v1701_v39, %v6647_v17  ;;  %v2085_v16 = vadd.f32 %v6649_v18, %v1957_v46  ;;  %v1214_v5 = vadd.f32 %v1213_v41, %v4513_v2  ;;  %v2211_v8 = vmin.f32 %v2147_v13, 1.0  ;;  %v1217_v39 = vpop.f32.mrb[108].mxu0  ;;  %v6652_v13 = vld [vmem:[#allocation128_spill] sm:$0xff]  ;;  %v6654_v17 = vld [vmem:[#allocation129_spill] sm:$0xff] }
 0x1ee   : > { %6645 = vst [vmem:[#allocation7_spill] sm:$0xff] %v5576_v29  ;;  %v1702_v63 = vmul.f32 %v6650_v47, %v1212_v28  ;;  %v1958_v31 = vmul.f32 %v6651_v14, %v1212_v28  ;;  %v2210_v62 = vmin.f32 %v2146_v15, 1.0  ;;  %v2148_v12 = vmax.f32 %v2084_v43, 0.0  ;;  %v1219_v43 = vpop.f32.mrb[109].mxu0 }
 0x1ef   : > { %6648 = vst [vmem:[#allocation8_spill] sm:$0xff] %v5581_v4  ;;  %v5588_v49 = vmul.f32 %v5573_v56, %v1062_v60  ;;  %v1703_v33 = vmul.f32 %v6650_v47, %v1214_v5  ;;  %v1959_v23 = vmul.f32 %v6651_v14, %v1214_v5  ;;  %2459 = vmatprep.mubr.f32.mxu1 %v2211_v8  ;;  %v2149_v21 = vmax.f32 %v2085_v16, 0.0  ;;  %v6655_v60 = vld [vmem:[#allocation39_spill] sm:$0xff]  ;;  %v6656_v47 = vld [vmem:[#allocation130_spill] sm:$0xff] }
 0x1f0   : > { %v5593_v46 = vmul.f32 %v5557_v22, %v1064_v1  ;;  %v5596_v41 = vadd.f32 %v1702_v63, %v6652_v13  ;;  %v2086_v28 = vadd.f32 %v6654_v17, %v1958_v31  ;;  %v1218_v15 = vadd.f32 %v1217_v39, %v4509_v35  ;;  %2460 = vmatmul.mubr.f32.gmra.mrb[38].mxu1 %v2210_v62  ;;  %v6657_v8 = vld [vmem:[#allocation38_spill] sm:$0xff]  ;;  %v6658_v4 = vld [vmem:[#allocation127_spill] sm:$0xff] }
 0x1f1   : > { %v5601_v18 = vadd.f32 %v1703_v33, %v6655_v60  ;;  %v2087_v14 = vadd.f32 %v6656_v47, %v1959_v23  ;;  %v1220_v5 = vadd.f32 %v1219_v43, %v4513_v2  ;;  %v2213_v16 = vmin.f32 %v2149_v21, 1.0  ;;  %v1223_v33 = vpop.f32.mrb[110].mxu0  ;;  %v6659_v23 = vld [vmem:[#allocation100_spill] sm:$0xff]  ;;  %v6660_v21 = vld [vmem:[#allocation131_spill] sm:$0xff] }
 0x1f2   : > { %6653 = vst [vmem:[#allocation84_spill] sm:$0xff] %v5596_v41  ;;  %v1704_v29 = vmul.f32 %v6657_v8, %v1218_v15  ;;  %v1960_v57 = vmul.f32 %v6658_v4, %v1218_v15  ;;  %v2212_v63 = vmin.f32 %v2148_v12, 1.0  ;;  %v2150_v13 = vmax.f32 %v2086_v28, 0.0  ;;  %v6662_v47 = vld [vmem:[#allocation132_spill] sm:$0xff]  ;;  %v1225_v28 = vpop.f32.mrb[111].mxu0 }
 0x1f3   : > { %v5608_v31 = vmul.f32 %v5573_v56, %v1064_v1  ;;  %v1705_v39 = vmul.f32 %v6657_v8, %v1220_v5  ;;  %v1961_v62 = vmul.f32 %v6658_v4, %v1220_v5  ;;  %2464 = vmatprep.mubr.f32.mxu1 %v2213_v16  ;;  %v2151_v17 = vmax.f32 %v2087_v14, 0.0  ;;  %v5619_v1 = vpop.permute.xlu1 %1455  ;;  %v6663_v8 = vld [vmem:[#allocation133_spill] sm:$0xff]  ;;  %v6664_v4 = vld [vmem:[#allocation134_spill] sm:$0xff] }
 0x1f4   : > { %v1068_v43 = vadd.f32 %v6659_v23, %v4509_v35  ;;  %v5615_v60 = vadd.f32 %v1704_v29, %v6660_v21  ;;  %v2088_v15 = vadd.f32 %v6662_v47, %v1960_v57  ;;  %v1224_v12 = vadd.f32 %v1223_v33, %v4509_v35  ;;  %2465 = vmatmul.mubr.f32.gmra.mrb[40].mxu1 %v2212_v63  ;;  %v6665_v33 = vld [vmem:[#allocation104_spill] sm:$0xff] }
 0x1f5   : > { %v5622_v41 = vadd.f32 %v1705_v39, %v6663_v8  ;;  %v2089_v5 = vadd.f32 %v6664_v4, %v1961_v62  ;;  %v1226_v14 = vadd.f32 %v1225_v28, %v4513_v2  ;;  %v2215_v16 = vmin.f32 %v2151_v17, 1.0  ;;  %v1229_v39 = vpop.f32.mrb[112].mxu0  ;;  %v5635_v17 = vpop.permute.xlu0 %1649  ;;  %v6666_v28 = vld [vmem:[#allocation48_spill] sm:$0xff] }
 0x1f6   : > { %6661 = vst [vmem:[#allocation87_spill] sm:$0xff] %v5615_v60  ;;  %v1706_v23 = vmul.f32 %v5100_v6, %v1224_v12  ;;  %v1962_v29 = vmul.f32 %v5093_v45, %v1224_v12  ;;  %v2214_v21 = vmin.f32 %v2150_v13, 1.0  ;;  %v2152_v57 = vmax.f32 %v2088_v15, 0.0  ;;  %v1231_v12 = vpop.f32.mrb[113].mxu0 }
 0x1f7   : > { %v1070_v47 = vadd.f32 %v6665_v33, %v4513_v2  ;;  %v1707_v63 = vmul.f32 %v5100_v6, %v1226_v14  ;;  %v1963_v60 = vmul.f32 %v5093_v45, %v1226_v14  ;;  %2469 = vmatprep.mubr.f32.mxu1 %v2215_v16  ;;  %v2153_v8 = vmax.f32 %v2089_v5, 0.0 }
 0x1f8   : > { %v5633_v62 = vmul.f32 %v5619_v1, %v1068_v43  ;;  %v5638_v4 = vadd.f32 %v1706_v23, %v6666_v28  ;;  %v2090_v13 = vadd.f32 %v5115_v51, %v1962_v29  ;;  %v1230_v15 = vadd.f32 %v1229_v39, %v4509_v35  ;;  %2470 = vmatmul.mubr.f32.gmra.mrb[42].mxu1 %v2214_v21 }
 0x1f9   : > { %v5643_v6 = vadd.f32 %v1707_v63, %v5134_v26  ;;  %v2091_v45 = vadd.f32 %v5139_v50, %v1963_v60  ;;  %v1232_v5 = vadd.f32 %v1231_v12, %v4513_v2  ;;  %v2217_v14 = vmin.f32 %v2153_v8, 1.0  ;;  %v1235_v26 = vpop.f32.mrb[114].mxu0 }
 0x1fa   : > { %v1708_v16 = vmul.f32 %v5172_v52, %v1230_v15  ;;  %v1964_v33 = vmul.f32 %v5165_v44, %v1230_v15  ;;  %v2216_v23 = vmin.f32 %v2152_v57, 1.0  ;;  %v2154_v28 = vmax.f32 %v2090_v13, 0.0  ;;  %v1237_v8 = vpop.f32.mrb[115].mxu0 }
 0x1fb   : > { %v5650_v51 = vmul.f32 %v5635_v17, %v1068_v43  ;;  %v1709_v29 = vmul.f32 %v5172_v52, %v1232_v5  ;;  %v1965_v21 = vmul.f32 %v5165_v44, %v1232_v5  ;;  %2474 = vmatprep.mubr.f32.mxu1 %v2217_v14  ;;  %v2155_v63 = vmax.f32 %v2091_v45, 0.0 }
 0x1fc   : > { %v5655_v50 = vmul.f32 %v5619_v1, %v1070_v47  ;;  %v5658_v60 = vadd.f32 %v1708_v16, %v5186_v11  ;;  %v2092_v39 = vadd.f32 %v5191_v59, %v1964_v33  ;;  %v1236_v57 = vadd.f32 %v1235_v26, %v4509_v35  ;;  %2475 = vmatmul.mubr.f32.gmra.mrb[44].mxu1 %v2216_v23 }
 0x1fd   : > { %v5663_v43 = vadd.f32 %v1709_v29, %v5225_v7  ;;  %v2093_v44 = vadd.f32 %v5245_v30, %v1965_v21  ;;  %v1238_v52 = vadd.f32 %v1237_v8, %v4513_v2  ;;  %v2219_v13 = vmin.f32 %v2155_v63, 1.0  ;;  %v1241_v7 = vpop.f32.mrb[116].mxu0  ;;  %v6667_v30 = vld [vmem:[#allocation21_spill] sm:$0xff]  ;;  %v6668_v8 = vld [vmem:[#allocation24_spill] sm:$0xff] }
 0x1fe   : > { %v1710_v15 = vmul.f32 %v5276_v55, %v1236_v57  ;;  %v1966_v12 = vmul.f32 %v5256_v25, %v1236_v57  ;;  %v2218_v11 = vmin.f32 %v2154_v28, 1.0  ;;  %v2156_v45 = vmax.f32 %v2092_v39, 0.0  ;;  %v1243_v21 = vpop.f32.mrb[117].mxu0 }
 0x1ff   : > { %v5670_v59 = vmul.f32 %v5635_v17, %v1070_v47  ;;  %v1711_v5 = vmul.f32 %v5276_v55, %v1238_v52  ;;  %v1967_v14 = vmul.f32 %v5256_v25, %v1238_v52  ;;  %2479 = vmatprep.mubr.f32.mxu1 %v2219_v13  ;;  %v2157_v16 = vmax.f32 %v2093_v44, 0.0  ;;  %v5681_v47 = vpop.permute.xlu1 %1460 }
 0x200   : > { %v1074_v33 = vadd.f32 %v6667_v30, %v4509_v35  ;;  %v5677_v23 = vadd.f32 %v1710_v15, %v5274_v10  ;;  %v2094_v29 = vadd.f32 %v5295_v27, %v1966_v12  ;;  %v1242_v28 = vadd.f32 %v1241_v7, %v4509_v35  ;;  %2480 = vmatmul.mubr.f32.gmra.mrb[46].mxu1 %v2218_v11  ;;  %v5697_v12 = vpop.permute.xlu0 %1653 }
 0x201   : > { %v5684_v55 = vadd.f32 %v1711_v5, %v5300_v24  ;;  %v2095_v25 = vadd.f32 %v5319_v36, %v1967_v14  ;;  %v1244_v26 = vadd.f32 %v1243_v21, %v4513_v2  ;;  %v2221_v63 = vmin.f32 %v2157_v16, 1.0  ;;  %v1247_v24 = vpop.f32.mrb[118].mxu0 }
 0x202   : > { %v1712_v39 = vmul.f32 %v5352_v19, %v1242_v28  ;;  %v1968_v10 = vmul.f32 %v5330_v3, %v1242_v28  ;;  %v2220_v57 = vmin.f32 %v2156_v45, 1.0  ;;  %v2158_v27 = vmax.f32 %v2094_v29, 0.0  ;;  %v1249_v14 = vpop.f32.mrb[119].mxu0 }
 0x203   : > { %v1076_v44 = vadd.f32 %v6668_v8, %v4513_v2  ;;  %v1713_v52 = vmul.f32 %v5352_v19, %v1244_v26  ;;  %v1969_v13 = vmul.f32 %v5330_v3, %v1244_v26  ;;  %2484 = vmatprep.mubr.f32.mxu1 %v2221_v63  ;;  %v2159_v15 = vmax.f32 %v2095_v25, 0.0 }
 0x204   : > { %v5695_v36 = vmul.f32 %v5681_v47, %v1074_v33  ;;  %v5700_v11 = vadd.f32 %v1712_v39, %v5350_v54  ;;  %v2096_v45 = vadd.f32 %v5377_v42, %v1968_v10  ;;  %v1248_v5 = vadd.f32 %v1247_v24, %v4509_v35  ;;  %2485 = vmatmul.mubr.f32.gmra.mrb[48].mxu1 %v2220_v57 }
 0x205   : > { %v5705_v19 = vadd.f32 %v1713_v52, %v5405_v61  ;;  %v2097_v3 = vadd.f32 %v5430_v53, %v1969_v13  ;;  %v1250_v7 = vadd.f32 %v1249_v14, %v4513_v2  ;;  %v2223_v16 = vmin.f32 %v2159_v15, 1.0  ;;  %v1253_v61 = vpop.f32.mrb[120].mxu0 }
 0x206   : > { %v1714_v30 = vmul.f32 %v5510_v58, %v1248_v5  ;;  %v1970_v29 = vmul.f32 %v5493_v20, %v1248_v5  ;;  %v2222_v54 = vmin.f32 %v2158_v27, 1.0  ;;  %v2160_v28 = vmax.f32 %v2096_v45, 0.0  ;;  %v1255_v57 = vpop.f32.mrb[121].mxu0 }
 0x207   : > { %v5712_v42 = vmul.f32 %v5697_v12, %v1074_v33  ;;  %v1715_v21 = vmul.f32 %v5510_v58, %v1250_v7  ;;  %v1971_v25 = vmul.f32 %v5493_v20, %v1250_v7  ;;  %2489 = vmatprep.mubr.f32.mxu1 %v2223_v16  ;;  %v2161_v26 = vmax.f32 %v2097_v3, 0.0  ;;  %v1259_v45 = vpop.f32.mrb[122].mxu0 }
 0x208   : > { %v5717_v53 = vmul.f32 %v5681_v47, %v1076_v44  ;;  %v5720_v63 = vadd.f32 %v1714_v30, %v5508_v48  ;;  %v2098_v39 = vadd.f32 %v5526_v32, %v1970_v29  ;;  %v1254_v10 = vadd.f32 %v1253_v61, %v4509_v35  ;;  %2490 = vmatmul.mubr.f32.gmra.mrb[50].mxu1 %v2222_v54  ;;  %v1261_v16 = vpop.f32.mrb[123].mxu0 }
 0x209   : > { %v5725_v33 = vadd.f32 %v1715_v21, %v5531_v34  ;;  %v2099_v20 = vadd.f32 %v5546_v37, %v1971_v25  ;;  %v1256_v58 = vadd.f32 %v1255_v57, %v4513_v2  ;;  %v2225_v27 = vmin.f32 %v2161_v26, 1.0  ;;  %v6669_v37 = vld [vmem:[#allocation31_spill] sm:$0xff] }
 0x20a   : > { %v1716_v8 = vmul.f32 %v5573_v56, %v1254_v10  ;;  %v1972_v52 = vmul.f32 %v5557_v22, %v1254_v10  ;;  %v2224_v48 = vmin.f32 %v2160_v28, 1.0  ;;  %v2162_v13 = vmax.f32 %v2098_v39, 0.0  ;;  %v1658_v10 = vpop.permute.xlu0 %1657 }
 0x20b   : > { %v2041_v32 = vmul.f32 %v5697_v12, %v1076_v44  ;;  %v1717_v24 = vmul.f32 %v5573_v56, %v1256_v58  ;;  %v1973_v15 = vmul.f32 %v5557_v22, %v1256_v58  ;;  %2494 = vmatprep.mubr.f32.mxu1 %v2225_v27  ;;  %v2163_v34 = vmax.f32 %v2099_v20, 0.0  ;;  %v1466_v44 = vpop.permute.xlu1 %1465 }
 0x20c   : > { %v1080_v5 = vadd.f32 %v6669_v37, %v4509_v35  ;;  %v5737_v14 = vadd.f32 %v1716_v8, %v5571_v9  ;;  %v2100_v3 = vadd.f32 %v5588_v49, %v1972_v52  ;;  %v1260_v7 = vadd.f32 %v1259_v45, %v4509_v35  ;;  %2495 = vmatmul.mubr.f32.gmra.mrb[52].mxu1 %v2224_v48  ;;  %v6670_v49 = vld [vmem:[#allocation33_spill] sm:$0xff] }
 0x20d   : > { %v5742_v56 = vadd.f32 %v1717_v24, %v5593_v46  ;;  %v2101_v22 = vadd.f32 %v5608_v31, %v1973_v15  ;;  %v1262_v30 = vadd.f32 %v1261_v16, %v4513_v2  ;;  %v2227_v29 = vmin.f32 %v2163_v34, 1.0  ;;  %v1265_v46 = vpop.f32.mrb[124].mxu0 }
 0x20e   : > { %v1718_v54 = vmul.f32 %v5635_v17, %v1260_v7  ;;  %v1974_v9 = vmul.f32 %v5619_v1, %v1260_v7  ;;  %v2226_v28 = vmin.f32 %v2162_v13, 1.0  ;;  %v2164_v21 = vmax.f32 %v2100_v3, 0.0  ;;  %v1267_v27 = vpop.f32.mrb[125].mxu0 }
 0x20f   : > { %v1082_v25 = vadd.f32 %v6670_v49, %v4513_v2  ;;  %v1719_v61 = vmul.f32 %v5635_v17, %v1262_v30  ;;  %v1975_v26 = vmul.f32 %v5619_v1, %v1262_v30  ;;  %2499 = vmatprep.mubr.f32.mxu1 %v2227_v29  ;;  %v2165_v39 = vmax.f32 %v2101_v22, 0.0  ;;  %v1271_v34 = vpop.f32.mrb[126].mxu0 }
 0x210   : > { %v1530_v31 = vmul.f32 %v1466_v44, %v1080_v5  ;;  %v5753_v57 = vadd.f32 %v1718_v54, %v5633_v62  ;;  %v2102_v20 = vadd.f32 %v5650_v51, %v1974_v9  ;;  %v1266_v58 = vadd.f32 %v1265_v46, %v4509_v35  ;;  %2500 = vmatmul.mubr.f32.gmra.mrb[54].mxu1 %v2226_v28  ;;  %v1273_v16 = vpop.f32.mrb[127].mxu0 }
 0x211   : > { %v5758_v8 = vadd.f32 %v1719_v61, %v5655_v50  ;;  %v2103_v17 = vadd.f32 %v5670_v59, %v1975_v26  ;;  %v1268_v1 = vadd.f32 %v1267_v27, %v4513_v2  ;;  %v2229_v52 = vmin.f32 %v2165_v39, 1.0  ;;  %v6671_v39 = vld [vmem:[#allocation46_spill] sm:$0xff]  ;;  %v6673_v27 = vld [vmem:[#allocation43_spill] sm:$0xff] }
 0x212   : > { %v1720_v48 = vmul.f32 %v5697_v12, %v1266_v58  ;;  %v1976_v13 = vmul.f32 %v5681_v47, %v1266_v58  ;;  %v2228_v62 = vmin.f32 %v2164_v21, 1.0  ;;  %v2166_v24 = vmax.f32 %v2102_v20, 0.0 }
 0x213   : > { %v2042_v15 = vmul.f32 %v1658_v10, %v1080_v5  ;;  %v1721_v51 = vmul.f32 %v5697_v12, %v1268_v1  ;;  %v1977_v45 = vmul.f32 %v5681_v47, %v1268_v1  ;;  %2504 = vmatprep.mubr.f32.mxu1 %v2229_v52  ;;  %v2167_v50 = vmax.f32 %v2103_v17, 0.0  ;;  %v6674_v52 = vld [vmem:[#allocation41_spill] sm:$0xff] }
 0x214   : > { %v1531_v37 = vmul.f32 %v1466_v44, %v1082_v25  ;;  %v5767_v59 = vadd.f32 %v1720_v48, %v5695_v36  ;;  %v2104_v3 = vadd.f32 %v5712_v42, %v1976_v13  ;;  %v1272_v7 = vadd.f32 %v1271_v34, %v4509_v35  ;;  %2505 = vmatmul.mubr.f32.gmra.mrb[56].mxu1 %v2228_v62 }
 0x215   : > { %v5772_v22 = vadd.f32 %v1721_v51, %v5717_v53  ;;  %v2105_v5 = vadd.f32 %v2041_v32, %v1977_v45  ;;  %v1274_v12 = vadd.f32 %v1273_v16, %v4513_v2  ;;  %v2231_v47 = vmin.f32 %v2167_v50, 1.0  ;;  %v6675_v45 = vld [vmem:[#allocation50_spill] sm:$0xff]  ;;  %v6677_v16 = vld [vmem:[#allocation51_spill] sm:$0xff] }
 0x216   : > { %v1722_v30 = vmul.f32 %v1658_v10, %v1272_v7  ;;  %v1978_v29 = vmul.f32 %v1466_v44, %v1272_v7  ;;  %v2230_v54 = vmin.f32 %v2166_v24, 1.0  ;;  %v2168_v9 = vmax.f32 %v2104_v3, 0.0 }
 0x217   : > { %v2043_v28 = vmul.f32 %v1658_v10, %v1082_v25  ;;  %v1723_v36 = vmul.f32 %v1658_v10, %v1274_v12  ;;  %v1979_v21 = vmul.f32 %v1466_v44, %v1274_v12  ;;  %2509 = vmatprep.mubr.f32.mxu1 %v2231_v47  ;;  %v2169_v42 = vmax.f32 %v2105_v5, 0.0  ;;  %v6672_v10 = vld [vmem:[#allocation44_spill] sm:$0xff]  ;;  %v6678_v12 = vld [vmem:[#allocation3_spill] sm:$0xff] }
 0x218   : > { %v5775_v49 = vadd.f32 %v1722_v30, %v1530_v31  ;;  %v2106_v35 = vadd.f32 %v2042_v15, %v1978_v29  ;;  %2510 = vmatmul.mubr.f32.gmra.mrb[58].mxu1 %v2230_v54  ;;  %v2232_v26 = vmin.f32 %v2168_v9, 1.0  ;;  %v1789_v20 = vmax.f32 %v6671_v39, 0.0  ;;  %v6679_v30 = vld [vmem:[#allocation53_spill] sm:$0xff]  ;;  %v6680_v54 = vld [vmem:[#allocation54_spill] sm:$0xff]  ;;  %v6684_v39 = vld [vmem:[#allocation59_spill] sm:$0xff] }
 0x219   : > { %v5777_v61 = vadd.f32 %v1723_v36, %v1531_v37  ;;  %v2107_v53 = vadd.f32 %v2043_v28, %v1979_v21  ;;  %v2233_v32 = vmin.f32 %v2169_v42, 1.0  ;;  %v1788_v44 = vmax.f32 %v6672_v10, 0.0  ;;  %v6676_v37 = vld [vmem:[#allocation49_spill] sm:$0xff]  ;;  %v6685_v10 = vld [vmem:[#allocation47_spill] sm:$0xff] }
 0x21a   : > { %v2170_v2 = vmax.f32 %v2106_v35, 0.0  ;;  %v1853_v31 = vmin.f32 %v1789_v20, 1.0  ;;  %v1791_v17 = vmax.f32 %v6673_v27, 0.0  ;;  %v1790_v48 = vmax.f32 %v6674_v52, 0.0  ;;  %v6681_v36 = vld [vmem:[#allocation57_spill] sm:$0xff]  ;;  %v6682_v35 = vld [vmem:[#allocation55_spill] sm:$0xff] }
 0x21b   : > { %2514 = vmatprep.mubr.f32.mxu1 %v2233_v32  ;;  %v2171_v46 = vmax.f32 %v2107_v53, 0.0  ;;  %v1852_v1 = vmin.f32 %v1788_v44, 1.0  ;;  %v1793_v62 = vmax.f32 %v5123_v0, 0.0  ;;  %v1792_v15 = vmax.f32 %v5118_v40, 0.0 }
 0x21c   : > { %2515 = vmatmul.mubr.f32.gmra.mrb[60].mxu1 %v2232_v26  ;;  %v2234_v58 = vmin.f32 %v2170_v2, 1.0  ;;  %v1855_v13 = vmin.f32 %v1791_v17, 1.0  ;;  %v1854_v24 = vmin.f32 %v1790_v48, 1.0  ;;  %v1795_v34 = vmax.f32 %v6675_v45, 0.0  ;;  %v6683_v26 = vld [vmem:[#allocation4_spill] sm:$0xff] }
 0x21d   : > { %v2235_v25 = vmin.f32 %v2171_v46, 1.0  ;;  %v1857_v51 = vmin.f32 %v1793_v62, 1.0  ;;  %v1856_v50 = vmin.f32 %v1792_v15, 1.0  ;;  %v1794_v3 = vmax.f32 %v6676_v37, 0.0  ;;  %v2855_v48 = vld [vmem:[%s6237_s8 + $0x10] sm:$0xff] }
 0x21e   : > { %v1859_v7 = vmin.f32 %v1795_v34, 1.0  ;;  %v1797_v5 = vmax.f32 %v6677_v16, 0.0  ;;  %v1796_v47 = vmax.f32 %v6678_v12, 0.0  ;;  %v1799_v29 = vmax.f32 %v6679_v30, 0.0  ;;  %v6688_v15 = vld [vmem:[#allocation60_spill] sm:$0xff]  ;;  %v6689_v34 = vld [vmem:[#allocation63_spill] sm:$0xff] }
 0x21f   : > { %2519 = vmatprep.mubr.f32.mxu1 %v2235_v25  ;;  %v1858_v0 = vmin.f32 %v1794_v3, 1.0  ;;  %v1798_v9 = vmax.f32 %v6680_v54, 0.0  ;;  %v1801_v21 = vmax.f32 %v6681_v36, 0.0  ;;  %v1800_v53 = vmax.f32 %v6682_v35, 0.0  ;;  %v6690_v3 = vld [vmem:[#allocation62_spill] sm:$0xff] }
 0x220   : > { %2520 = vmatmul.mubr.f32.gmra.mrb[62].mxu1 %v2234_v58  ;;  %v1860_v40 = vmin.f32 %v1796_v47, 1.0  ;;  %v1863_v28 = vmin.f32 %v1799_v29, 1.0  ;;  %v1803_v2 = vmax.f32 %v6683_v26, 0.0  ;;  %v1802_v20 = vmax.f32 %v6684_v39, 0.0  ;;  %v6692_v47 = vld [vmem:[#allocation64_spill] sm:$0xff]  ;;  %v6693_v29 = vld [vmem:[#allocation69_spill] sm:$0xff] }
 0x221   : > { %2589 = vmatprep.mubr.f32.mxu1 %v1853_v31  ;;  %v1862_v42 = vmin.f32 %v1798_v9, 1.0  ;;  %v1865_v32 = vmin.f32 %v1801_v21, 1.0  ;;  %v1864_v46 = vmin.f32 %v1800_v53, 1.0  ;;  %v1805_v44 = vmax.f32 %v6685_v10, 0.0  ;;  %v6686_v31 = vld [vmem:[#allocation45_spill] sm:$0xff]  ;;  %v6694_v9 = vld [vmem:[#allocation68_spill] sm:$0xff] }
 0x222   : > { %v1867_v25 = vmin.f32 %v1803_v2, 1.0  ;;  %v1866_v58 = vmin.f32 %v1802_v20, 1.0  ;;  %v1804_v27 = vmax.f32 %v6686_v31, 0.0  ;;  %v6695_v21 = vld [vmem:[#allocation73_spill] sm:$0xff]  ;;  %v6696_v53 = vld [vmem:[#allocation72_spill] sm:$0xff]  ;;  %v6698_v20 = vld [vmem:[#allocation74_spill] sm:$0xff] }
 0x223   : > { %v1869_v17 = vmin.f32 %v1805_v44, 1.0  ;;  %v6697_v2 = vld [vmem:[#allocation56_spill] sm:$0xff] }
 0x224   : > { %2590 = vmatmul.mubr.f32.vlgmr.msra.gmra.mrb[64].mxu1 %v1852_v1  ;;  %v6687_v1 = vld [vmem:[#allocation61_spill] sm:$0xff]  ;;  %v6699_v44 = vld [vmem:[#allocation76_spill] sm:$0xff] }
 0x225   : > { %2594 = vmatprep.mubr.f32.mxu1 %v1855_v13  ;;  %3850 = vmatpush3.bf16.msra.mxu1 %v5461_v38  ;;  %v1861_v38 = vmin.f32 %v1797_v5, 1.0  ;;  %v1807_v52 = vmax.f32 %v6687_v1, 0.0  ;;  %v2856_v13 = vld [vmem:[%s6237_s8 + $0x18] sm:$0xff]  ;;  %v6691_v5 = vld [vmem:[#allocation67_spill] sm:$0xff] }
 0x226   : > { %v3844_v62 = vpack.c.bf16 %v2856_v13, %v2855_v48 }
 0x227   : > { %v1871_v45 = vmin.f32 %v1807_v52, 1.0  ;;  %v6701_v52 = vld [vmem:[#allocation5_spill] sm:$0xff] }
 0x228   : > { %2595 = vmatmul.mubr.f32.gmra.mrb[66].mxu1 %v1854_v24  ;;  %v1868_v24 = vmin.f32 %v1804_v27, 1.0  ;;  %3845 = vmatprep.subr.bf16.mxu0 %v3844_v62  ;;  %v6700_v27 = vld [vmem:[#allocation75_spill] sm:$0xff]  ;;  %v1821_v48 = vmax.f32 %v6701_v52, 0.0 }
 0x229   : > { %2599 = vmatprep.mubr.f32.mxu1 %v1857_v51  ;;  %v1806_v51 = vmax.f32 %v6688_v15, 0.0  ;;  %3849 = vmatprep.subr.bf16.mxu1 %v3844_v62 }
 0x22a   : > { %3847 = vmatpush3.bf16.msra.mxu0 %v3844_v62  ;;  %3851 = vmatpush3.bf16.msra.mxu1 %v3844_v62  ;;  %v6702_v62 = vld [vmem:[#allocation77_spill] sm:$0xff]  ;;  %v1885_v15 = vmin.f32 %v1821_v48, 1.0 }
 0x22b   : > { %v1870_v37 = vmin.f32 %v1806_v51, 1.0  ;;  %v6703_v51 = vld [vmem:[#allocation58_spill] sm:$0xff] }
 0x22c   : > { %2600 = vmatmul.mubr.f32.gmra.mrb[68].mxu1 %v1856_v50  ;;  %v1809_v50 = vmax.f32 %v6689_v34, 0.0 }
 0x22d   : > { %2604 = vmatprep.mubr.f32.mxu1 %v1859_v7  ;;  %v1808_v7 = vmax.f32 %v6690_v3, 0.0 }
 0x22e   : > { %v1873_v16 = vmin.f32 %v1809_v50, 1.0  ;;  %v6704_v50 = vld [vmem:[#allocation6_spill] sm:$0xff] }
 0x22f   : > { %v1872_v12 = vmin.f32 %v1808_v7, 1.0  ;;  %v6705_v7 = vld [vmem:[#allocation80_spill] sm:$0xff] }
 0x230   : > { %2605 = vmatmul.mubr.f32.gmra.mrb[70].mxu1 %v1858_v0  ;;  %v1811_v0 = vmax.f32 %v6691_v5, 0.0 }
 0x231   : > { %2609 = vmatprep.mubr.f32.mxu1 %v1861_v38  ;;  %v1810_v38 = vmax.f32 %v6692_v47, 0.0 }
 0x232   : > { %v1875_v30 = vmin.f32 %v1811_v0, 1.0  ;;  %v6706_v0 = vld [vmem:[#allocation79_spill] sm:$0xff] }
 0x233   : > { %v1874_v54 = vmin.f32 %v1810_v38, 1.0  ;;  %v6707_v38 = vld [vmem:[#allocation83_spill] sm:$0xff] }
 0x234   : > { %2610 = vmatmul.mubr.f32.gmra.mrb[72].mxu1 %v1860_v40  ;;  %v1813_v40 = vmax.f32 %v6693_v29, 0.0 }
 0x235   : > { %2614 = vmatprep.mubr.f32.mxu1 %v1863_v28  ;;  %v1812_v28 = vmax.f32 %v6694_v9, 0.0 }
 0x236   : > { %v1877_v36 = vmin.f32 %v1813_v40, 1.0  ;;  %v6708_v40 = vld [vmem:[#allocation82_spill] sm:$0xff] }
 0x237   : > { %v1876_v35 = vmin.f32 %v1812_v28, 1.0  ;;  %v6709_v28 = vld [vmem:[#allocation8_spill] sm:$0xff] }
 0x238   : > { %2615 = vmatmul.mubr.f32.gmra.mrb[74].mxu1 %v1862_v42  ;;  %v1815_v42 = vmax.f32 %v6695_v21, 0.0 }
 0x239   : > { %2619 = vmatprep.mubr.f32.mxu1 %v1865_v32  ;;  %v1814_v32 = vmax.f32 %v6696_v53, 0.0 }
 0x23a   : > { %v1879_v26 = vmin.f32 %v1815_v42, 1.0  ;;  %v6710_v42 = vld [vmem:[#allocation7_spill] sm:$0xff] }
 0x23b   : > { %v1878_v39 = vmin.f32 %v1814_v32, 1.0  ;;  %v1831_v32 = vmax.f32 %v5601_v18, 0.0 }
 0x23c   : > { %2620 = vmatmul.mubr.f32.gmra.mrb[76].mxu1 %v1864_v46  ;;  %v1817_v46 = vmax.f32 %v6697_v2, 0.0  ;;  %v6711_v2 = vld [vmem:[#allocation84_spill] sm:$0xff] }
 0x23d   : > { %2624 = vmatprep.mubr.f32.mxu1 %v1867_v25  ;;  %v1816_v25 = vmax.f32 %v6698_v20, 0.0  ;;  %v1833_v20 = vmax.f32 %v5622_v41, 0.0  ;;  %v1837_v41 = vmax.f32 %v5663_v43, 0.0 }
 0x23e   : > { %v1881_v10 = vmin.f32 %v1817_v46, 1.0  ;;  %v1830_v46 = vmax.f32 %v6711_v2, 0.0  ;;  %v1850_v2 = vmax.f32 %v5775_v49, 0.0 }
 0x23f   : > { %v1880_v31 = vmin.f32 %v1816_v25, 1.0 }
 0x240   : > { %2625 = vmatmul.mubr.f32.gmra.mrb[78].mxu1 %v1866_v58  ;;  %v1819_v58 = vmax.f32 %v6699_v44, 0.0  ;;  %v1894_v25 = vmin.f32 %v1830_v46, 1.0 }
 0x241   : > { %2629 = vmatprep.mubr.f32.mxu1 %v1869_v17  ;;  %v1818_v17 = vmax.f32 %v6700_v27, 0.0  ;;  %v1835_v27 = vmax.f32 %v5643_v6, 0.0  ;;  %v1901_v6 = vmin.f32 %v1837_v41, 1.0 }
 0x242   : > { %v1883_v1 = vmin.f32 %v1819_v58, 1.0 }
 0x243   : > { %v1882_v13 = vmin.f32 %v1818_v17, 1.0  ;;  %v1899_v48 = vmin.f32 %v1835_v27, 1.0 }
 0x244   : > { %2630 = vmatmul.mubr.f32.gmra.mrb[80].mxu1 %v1868_v24  ;;  %v1820_v24 = vmax.f32 %v6702_v62, 0.0 }
 0x245   : > { %2634 = vmatprep.mubr.f32.mxu1 %v1871_v45  ;;  %v1823_v45 = vmax.f32 %v6703_v51, 0.0  ;;  %v1839_v51 = vmax.f32 %v5684_v55, 0.0 }
 0x246   : > { %v1884_v34 = vmin.f32 %v1820_v24, 1.0  ;;  %v1836_v24 = vmax.f32 %v5658_v60, 0.0 }
 0x247   : > { %v1887_v3 = vmin.f32 %v1823_v45, 1.0  ;;  %v1903_v43 = vmin.f32 %v1839_v51, 1.0 }
 0x248   : > { %2635 = vmatmul.mubr.f32.gmra.mrb[82].mxu1 %v1870_v37  ;;  %v1822_v37 = vmax.f32 %v6704_v50, 0.0 }
 0x249   : > { %2639 = vmatprep.mubr.f32.mxu1 %v1873_v16  ;;  %v1825_v16 = vmax.f32 %v6705_v7, 0.0  ;;  %v1840_v7 = vmax.f32 %v5700_v11, 0.0 }
 0x24a   : > { %v1886_v5 = vmin.f32 %v1822_v37, 1.0  ;;  %v1841_v37 = vmax.f32 %v5705_v19, 0.0 }
 0x24b   : > { %v1889_v47 = vmin.f32 %v1825_v16, 1.0 }
 0x24c   : > { %2640 = vmatmul.mubr.f32.gmra.mrb[84].mxu1 %v1872_v12  ;;  %v1824_v12 = vmax.f32 %v6706_v0, 0.0  ;;  %v1905_v55 = vmin.f32 %v1841_v37, 1.0 }
 0x24d   : > { %2644 = vmatprep.mubr.f32.mxu1 %v1875_v30  ;;  %v1827_v30 = vmax.f32 %v6707_v38, 0.0  ;;  %v1845_v38 = vmax.f32 %v5742_v56, 0.0 }
 0x24e   : > { %v1888_v29 = vmin.f32 %v1824_v12, 1.0  ;;  %v1842_v12 = vmax.f32 %v5720_v63, 0.0 }
 0x24f   : > { %v1891_v9 = vmin.f32 %v1827_v30, 1.0 }
 0x250   : > { %2645 = vmatmul.mubr.f32.gmra.mrb[86].mxu1 %v1874_v54  ;;  %v1826_v54 = vmax.f32 %v6708_v40, 0.0  ;;  %v1906_v11 = vmin.f32 %v1842_v12, 1.0 }
 0x251   : > { %2649 = vmatprep.mubr.f32.mxu1 %v1877_v36  ;;  %v1829_v36 = vmax.f32 %v6709_v28, 0.0  ;;  %v1846_v28 = vmax.f32 %v5753_v57, 0.0 }
 0x252   : > { %v1890_v21 = vmin.f32 %v1826_v54, 1.0  ;;  %v1847_v54 = vmax.f32 %v5758_v8, 0.0 }
 0x253   : > { %v1893_v53 = vmin.f32 %v1829_v36, 1.0 }
 0x254   : > { %2650 = vmatmul.mubr.f32.gmra.mrb[88].mxu1 %v1876_v35  ;;  %v1828_v35 = vmax.f32 %v6710_v42, 0.0  ;;  %v1911_v56 = vmin.f32 %v1847_v54, 1.0 }
 0x255   : > { %2654 = vmatprep.mubr.f32.mxu1 %v1879_v26 }
 0x256   : > { %v1892_v26 = vmin.f32 %v1828_v35, 1.0  ;;  %v1848_v35 = vmax.f32 %v5767_v59, 0.0 }
 0x258   : > { %2655 = vmatmul.mubr.f32.gmra.mrb[90].mxu1 %v1878_v39  ;;  %v1895_v39 = vmin.f32 %v1831_v32, 1.0  ;;  %v1851_v32 = vmax.f32 %v5777_v61, 0.0  ;;  %v1912_v57 = vmin.f32 %v1848_v35, 1.0  ;;  %v5917_v35 = vld [vmem:[%s6236_s7] ss:$0 sm:$0xff] }
 0x259   : > { %2659 = vmatprep.mubr.f32.mxu1 %v1881_v10  ;;  %v6712_v10 = vld [vmem:[#allocation87_spill] sm:$0xff] }
 0x25a   : > { %v1832_v44 = vmax.f32 %v6712_v10, 0.0 }
 0x25c   : > { %2660 = vmatmul.mubr.f32.gmra.mrb[92].mxu1 %v1880_v31  ;;  %v1897_v31 = vmin.f32 %v1833_v20, 1.0  ;;  %v1896_v18 = vmin.f32 %v1832_v44, 1.0  ;;  %v1914_v20 = vmin.f32 %v1850_v2, 1.0 }
 0x25d   : > { %2664 = vmatprep.mubr.f32.mxu1 %v1883_v1  ;;  %v1834_v1 = vmax.f32 %v5638_v4, 0.0  ;;  %v1900_v4 = vmin.f32 %v1836_v24, 1.0 }
 0x25f   : > { %v1898_v62 = vmin.f32 %v1834_v1, 1.0 }
 0x260   : > { %2665 = vmatmul.mubr.f32.gmra.mrb[94].mxu1 %v1882_v13 }
 0x261   : > { %2669 = vmatprep.mubr.f32.mxu1 %v1885_v15 }
 0x264   : > { %2670 = vmatmul.mubr.f32.gmra.mrb[96].mxu1 %v1884_v34  ;;  %v1838_v34 = vmax.f32 %v5677_v23, 0.0  ;;  %v1904_v23 = vmin.f32 %v1840_v7, 1.0 }
 0x265   : > { %2674 = vmatprep.mubr.f32.mxu1 %v1887_v3 }
 0x266   : > { %v1902_v60 = vmin.f32 %v1838_v34, 1.0 }
 0x268   : > { %2675 = vmatmul.mubr.f32.gmra.mrb[98].mxu1 %v1886_v5  ;;  %v1843_v5 = vmax.f32 %v5725_v33, 0.0  ;;  %v1909_v33 = vmin.f32 %v1845_v38, 1.0 }
 0x269   : > { %2679 = vmatprep.mubr.f32.mxu1 %v1889_v47 }
 0x26a   : > { %v1907_v19 = vmin.f32 %v1843_v5, 1.0 }
 0x26c   : > { %2680 = vmatmul.mubr.f32.gmra.mrb[100].mxu1 %v1888_v29  ;;  %v1844_v29 = vmax.f32 %v5737_v14, 0.0  ;;  %v1910_v14 = vmin.f32 %v1846_v28, 1.0 }
 0x26d   : > { %2684 = vmatprep.mubr.f32.mxu1 %v1891_v9 }
 0x26e   : > { %v1908_v63 = vmin.f32 %v1844_v29, 1.0 }
 0x270   : > { %2685 = vmatmul.mubr.f32.gmra.mrb[102].mxu1 %v1890_v21  ;;  %v1849_v21 = vmax.f32 %v5772_v22, 0.0  ;;  %v1915_v22 = vmin.f32 %v1851_v32, 1.0 }
 0x271   : > { %2689 = vmatprep.mubr.f32.mxu1 %v1893_v53 }
 0x272   : > { %v1913_v8 = vmin.f32 %v1849_v21, 1.0 }
 0x273   : > { %v5832_v58 = vpop.f32.mrb[0].mxu1 }
 0x274   : > { %2690 = vmatmul.mubr.f32.gmra.mrb[104].mxu1 %v1892_v26  ;;  %v2368_v17 = vpop.f32.mrb[1].mxu1 }
 0x275   : > { %2694 = vmatprep.mubr.f32.mxu1 %v1895_v39 }
 0x277   : > { %v5836_v52 = vpop.f32.mrb[2].mxu1 }
 0x278   : > { %2695 = vmatmul.mubr.f32.gmra.mrb[106].mxu1 %v1894_v25  ;;  %v2373_v13 = vpop.f32.mrb[3].mxu1 }
 0x279   : > { %2699 = vmatprep.mubr.f32.mxu1 %v1897_v31 }
 0x27b   : > { %v5840_v15 = vpop.f32.mrb[4].mxu1 }
 0x27c   : > { %2700 = vmatmul.mubr.f32.gmra.mrb[108].mxu1 %v1896_v18  ;;  %v2378_v45 = vpop.f32.mrb[5].mxu1 }
 0x27d   : > { %2704 = vmatprep.mubr.f32.mxu1 %v1899_v48 }
 0x280   : > { %2705 = vmatmul.mubr.f32.gmra.mrb[110].mxu1 %v1898_v62  ;;  %v5844_v50 = vpop.f32.mrb[6].mxu1 }
 0x281   : > { %2709 = vmatprep.mubr.f32.mxu1 %v1901_v6  ;;  %v2383_v3 = vpop.f32.mrb[7].mxu1 }
 0x284   : > { %2710 = vmatmul.mubr.f32.gmra.mrb[112].mxu1 %v1900_v4  ;;  %v5848_v16 = vpop.f32.mrb[8].mxu1 }
 0x285   : > { %2714 = vmatprep.mubr.f32.mxu1 %v1903_v43  ;;  %v2388_v0 = vpop.f32.mrb[9].mxu1 }
 0x288   : > { %2715 = vmatmul.mubr.f32.gmra.mrb[114].mxu1 %v1902_v60  ;;  %v5852_v47 = vpop.f32.mrb[10].mxu1 }
 0x289   : > { %2719 = vmatprep.mubr.f32.mxu1 %v1905_v55  ;;  %v2393_v30 = vpop.f32.mrb[11].mxu1 }
 0x28c   : > { %2720 = vmatmul.mubr.f32.gmra.mrb[116].mxu1 %v1904_v23  ;;  %v5856_v40 = vpop.f32.mrb[12].mxu1 }
 0x28d   : > { %2724 = vmatprep.mubr.f32.mxu1 %v1907_v19  ;;  %v2398_v9 = vpop.f32.mrb[13].mxu1 }
 0x290   : > { %2725 = vmatmul.mubr.f32.gmra.mrb[118].mxu1 %v1906_v11  ;;  %v5860_v36 = vpop.f32.mrb[14].mxu1 }
 0x291   : > { %2729 = vmatprep.mubr.f32.mxu1 %v1909_v33  ;;  %v2403_v42 = vpop.f32.mrb[15].mxu1 }
 0x294   : > { %2730 = vmatmul.mubr.f32.gmra.mrb[120].mxu1 %v1908_v63 }
 0x295   : > { %2734 = vmatprep.mubr.f32.mxu1 %v1911_v56  ;;  %v5864_v53 = vpop.f32.mrb[16].mxu1 }
 0x296   : > { %v2408_v26 = vpop.f32.mrb[17].mxu1 }
 0x298   : > { %2735 = vmatmul.mubr.f32.gmra.mrb[122].mxu1 %v1910_v14 }
 0x299   : > { %2739 = vmatprep.mubr.f32.mxu1 %v1913_v8  ;;  %v5868_v46 = vpop.f32.mrb[18].mxu1 }
 0x29a   : > { %v2413_v39 = vpop.f32.mrb[19].mxu1 }
 0x29c   : > { %2740 = vmatmul.mubr.f32.gmra.mrb[124].mxu1 %v1912_v57 }
 0x29d   : > { %2744 = vmatprep.mubr.f32.mxu1 %v1915_v22 }
 0x29e   : > { %v5870_v25 = vpop.f32.mrb[20].mxu1 }
 0x29f   : > { %v2418_v59 = vpop.f32.mrb[21].mxu1 }
 0x2a0   : > { %2745 = vmatmul.mubr.f32.gmra.mrb[126].mxu1 %v1914_v20 }
 0x2a2   : > { %v5872_v10 = vpop.f32.mrb[22].mxu1 }
 0x2a3   : > { %v2423_v61 = vpop.f32.mrb[23].mxu1 }
 0x2a6   : > { %v5874_v44 = vpop.f32.mrb[24].mxu1 }
 0x2a7   : > { %v2428_v31 = vpop.f32.mrb[25].mxu1 }
 0x2ab   : > { %v5876_v27 = vpop.f32.mrb[26].mxu1 }
 0x2ac   : > { %v2433_v49 = vpop.f32.mrb[27].mxu1 }
 0x2af   : > { %v5878_v17 = vpop.f32.mrb[28].mxu1 }
 0x2b0   : > { %v2438_v18 = vpop.f32.mrb[29].mxu1 }
 0x2b3   : > { %v5880_v1 = vpop.f32.mrb[30].mxu1 }
 0x2b4   : > { %v2443_v48 = vpop.f32.mrb[31].mxu1 }
 0x2b7   : > { %v5882_v41 = vpop.f32.mrb[32].mxu1 }
 0x2b8   : > { %v2448_v13 = vpop.f32.mrb[33].mxu1 }
 0x2bb   : > { %v5884_v62 = vpop.f32.mrb[34].mxu1 }
 0x2bc   : > { %v2453_v24 = vpop.f32.mrb[35].mxu1 }
 0x2bf   : > { %v5886_v6 = vpop.f32.mrb[36].mxu1 }
 0x2c0   : > { %v2458_v51 = vpop.f32.mrb[37].mxu1 }
 0x2c3   : > { %v5888_v45 = vpop.f32.mrb[38].mxu1 }
 0x2c4   : > { %v2463_v4 = vpop.f32.mrb[39].mxu1 }
 0x2c7   : > { %v5890_v34 = vpop.f32.mrb[40].mxu1 }
 0x2c8   : > { %v2468_v43 = vpop.f32.mrb[41].mxu1 }
 0x2cb   : > { %v5892_v37 = vpop.f32.mrb[42].mxu1 }
 0x2cc   : > { %v2473_v3 = vpop.f32.mrb[43].mxu1 }
 0x2cf   : > { %v5894_v60 = vpop.f32.mrb[44].mxu1 }
 0x2d0   : > { %v2478_v7 = vpop.f32.mrb[45].mxu1 }
 0x2d3   : > { %v5896_v55 = vpop.f32.mrb[46].mxu1 }
 0x2d4   : > { %v2483_v5 = vpop.f32.mrb[47].mxu1 }
 0x2d7   : > { %v5898_v0 = vpop.f32.mrb[48].mxu1 }
 0x2d8   : > { %v2488_v23 = vpop.f32.mrb[49].mxu1 }
 0x2db   : > { %v5900_v12 = vpop.f32.mrb[50].mxu1 }
 0x2dc   : > { %v2493_v19 = vpop.f32.mrb[51].mxu1 }
 0x2df   : > { %v5902_v38 = vpop.f32.mrb[52].mxu1 }
 0x2e0   : > { %v2498_v30 = vpop.f32.mrb[53].mxu1 }
 0x2e3   : > { %v5904_v11 = vpop.f32.mrb[54].mxu1 }
 0x2e4   : > { %v2503_v29 = vpop.f32.mrb[55].mxu1 }
 0x2e7   : > { %v5906_v33 = vpop.f32.mrb[56].mxu1 }
 0x2e8   : > { %v2508_v54 = vpop.f32.mrb[57].mxu1 }
 0x2eb   : > { %v5908_v9 = vpop.f32.mrb[58].mxu1 }
 0x2ec   : > { %v2513_v63 = vpop.f32.mrb[59].mxu1 }
 0x2ef   : > { %v5910_v28 = vpop.f32.mrb[60].mxu1 }
 0x2f0   : > { %v2518_v56 = vpop.f32.mrb[61].mxu1 }
 0x2f3   : > { %v5912_v21 = vpop.f32.mrb[62].mxu1 }
 0x2f4   : > { %v2523_v42 = vpop.f32.mrb[63].mxu1 }
 0x2f7   : > { %v2591_v14 = vpop.f32.mrb[64].mxu1 }
 0x2f8   : > { %v2592_v8 = vadd.f32 %v2591_v14, %v5832_v58  ;;  %v2593_v32 = vpop.f32.mrb[65].mxu1 }
 0x2fa   : > { %v2757_v26 = vadd.f32 %v5917_v35, %v2592_v8 }
 0x2fb   : > { %v2596_v57 = vpop.f32.mrb[66].mxu1 }
 0x2fc   : > { %v2789_v2 = vmax.f32 %v2757_v26, 0.0  ;;  %v2597_v22 = vadd.f32 %v2596_v57, %v5836_v52  ;;  %v2598_v39 = vpop.f32.mrb[67].mxu1 }
 0x2fe   : > { %v2821_v20 = vmin.f32 %v2789_v2, 1.0  ;;  %v2758_v59 = vadd.f32 %v5917_v35, %v2597_v22 }
 0x2ff   : > { %v2601_v61 = vpop.f32.mrb[68].mxu1 }
 0x300   : > { %v2790_v31 = vmax.f32 %v2758_v59, 0.0  ;;  %v2602_v49 = vadd.f32 %v2601_v61, %v5840_v15  ;;  %v2603_v18 = vpop.f32.mrb[69].mxu1  ;;  %3664 = vmatprep.mubr.msk.f32.mxu0 %vm2864_vm0, %v2821_v20 }
 0x302   : > { %v2822_v58 = vmin.f32 %v2790_v31, 1.0  ;;  %v2759_v48 = vadd.f32 %v5917_v35, %v2602_v49 }
 0x303   : > { %v2606_v13 = vpop.f32.mrb[70].mxu1 }
 0x304   : > { %v2791_v24 = vmax.f32 %v2759_v48, 0.0  ;;  %v2607_v51 = vadd.f32 %v2606_v13, %v5844_v50  ;;  %v2608_v52 = vpop.f32.mrb[71].mxu1  ;;  %3665 = vmatmul.mubr.msk.f32.vlgmr.msra.gmra.mrb[128].mxu0 %vm2864_vm0, %v2822_v58 }
 0x306   : > { %v2823_v4 = vmin.f32 %v2791_v24, 1.0  ;;  %v2760_v43 = vadd.f32 %v5917_v35, %v2607_v51 }
 0x307   : > { %v2611_v3 = vpop.f32.mrb[72].mxu1 }
 0x308   : > { %v2792_v7 = vmax.f32 %v2760_v43, 0.0  ;;  %v2612_v15 = vadd.f32 %v2611_v3, %v5848_v16  ;;  %v2613_v5 = vpop.f32.mrb[73].mxu1  ;;  %3667 = vmatprep.mubr.msk.f32.mxu0 %vm2864_vm0, %v2823_v4 }
 0x30a   : > { %v2824_v23 = vmin.f32 %v2792_v7, 1.0  ;;  %v2761_v19 = vadd.f32 %v5917_v35, %v2612_v15 }
 0x30b   : > { %v2616_v30 = vpop.f32.mrb[74].mxu1 }
 0x30c   : > { %v2793_v29 = vmax.f32 %v2761_v19, 0.0  ;;  %v2617_v50 = vadd.f32 %v2616_v30, %v5852_v47  ;;  %v2618_v54 = vpop.f32.mrb[75].mxu1  ;;  %3668 = vmatmul.mubr.msk.f32.gmra.mrb[130].mxu0 %vm2864_vm0, %v2824_v23 }
 0x30e   : > { %v2825_v63 = vmin.f32 %v2793_v29, 1.0  ;;  %v2762_v56 = vadd.f32 %v5917_v35, %v2617_v50 }
 0x30f   : > { %v2621_v42 = vpop.f32.mrb[76].mxu1 }
 0x310   : > { %v2794_v14 = vmax.f32 %v2762_v56, 0.0  ;;  %v2622_v16 = vadd.f32 %v2621_v42, %v5856_v40  ;;  %v2623_v8 = vpop.f32.mrb[77].mxu1  ;;  %3670 = vmatprep.mubr.msk.f32.mxu0 %vm2864_vm0, %v2825_v63 }
 0x312   : > { %v2826_v32 = vmin.f32 %v2794_v14, 1.0  ;;  %v2763_v26 = vadd.f32 %v5917_v35, %v2622_v16 }
 0x313   : > { %v2626_v57 = vpop.f32.mrb[78].mxu1 }
 0x314   : > { %v2795_v2 = vmax.f32 %v2763_v26, 0.0  ;;  %v2627_v47 = vadd.f32 %v2626_v57, %v5860_v36  ;;  %v2628_v22 = vpop.f32.mrb[79].mxu1  ;;  %3671 = vmatmul.mubr.msk.f32.gmra.mrb[132].mxu0 %vm2864_vm0, %v2826_v32 }
 0x316   : > { %v2827_v39 = vmin.f32 %v2795_v2, 1.0  ;;  %v2764_v20 = vadd.f32 %v5917_v35, %v2627_v47 }
 0x317   : > { %v2631_v59 = vpop.f32.mrb[80].mxu1 }
 0x318   : > { %v2796_v61 = vmax.f32 %v2764_v20, 0.0  ;;  %v2632_v40 = vadd.f32 %v2631_v59, %v5864_v53  ;;  %v2633_v31 = vpop.f32.mrb[81].mxu1  ;;  %3673 = vmatprep.mubr.msk.f32.mxu0 %vm2864_vm0, %v2827_v39 }
 0x31a   : > { %v2828_v49 = vmin.f32 %v2796_v61, 1.0  ;;  %v2765_v18 = vadd.f32 %v5917_v35, %v2632_v40 }
 0x31b   : > { %v2636_v58 = vpop.f32.mrb[82].mxu1 }
 0x31c   : > { %v2797_v48 = vmax.f32 %v2765_v18, 0.0  ;;  %v2637_v36 = vadd.f32 %v2636_v58, %v5868_v46  ;;  %v2638_v13 = vpop.f32.mrb[83].mxu1  ;;  %3674 = vmatmul.mubr.msk.f32.gmra.mrb[134].mxu0 %vm2864_vm0, %v2828_v49 }
 0x31e   : > { %v2829_v24 = vmin.f32 %v2797_v48, 1.0  ;;  %v2766_v51 = vadd.f32 %v5917_v35, %v2637_v36 }
 0x31f   : > { %v2641_v52 = vpop.f32.mrb[84].mxu1 }
 0x320   : > { %v2798_v4 = vmax.f32 %v2766_v51, 0.0  ;;  %v2642_v53 = vadd.f32 %v2641_v52, %v5870_v25  ;;  %v2643_v43 = vpop.f32.mrb[85].mxu1  ;;  %3676 = vmatprep.mubr.msk.f32.mxu0 %vm2864_vm0, %v2829_v24 }
 0x322   : > { %v2830_v3 = vmin.f32 %v2798_v4, 1.0  ;;  %v2767_v7 = vadd.f32 %v5917_v35, %v2642_v53 }
 0x323   : > { %v2646_v15 = vpop.f32.mrb[86].mxu1 }
 0x324   : > { %v2799_v5 = vmax.f32 %v2767_v7, 0.0  ;;  %v2647_v46 = vadd.f32 %v2646_v15, %v5872_v10  ;;  %v2648_v23 = vpop.f32.mrb[87].mxu1  ;;  %3677 = vmatmul.mubr.msk.f32.gmra.mrb[136].mxu0 %vm2864_vm0, %v2830_v3 }
 0x326   : > { %v2831_v19 = vmin.f32 %v2799_v5, 1.0  ;;  %v2768_v30 = vadd.f32 %v5917_v35, %v2647_v46 }
 0x327   : > { %v2651_v29 = vpop.f32.mrb[88].mxu1 }
 0x328   : > { %v2800_v50 = vmax.f32 %v2768_v30, 0.0  ;;  %v2652_v25 = vadd.f32 %v2651_v29, %v5874_v44  ;;  %v2653_v54 = vpop.f32.mrb[89].mxu1  ;;  %3679 = vmatprep.mubr.msk.f32.mxu0 %vm2864_vm0, %v2831_v19 }
 0x32a   : > { %v2832_v63 = vmin.f32 %v2800_v50, 1.0  ;;  %v2769_v56 = vadd.f32 %v5917_v35, %v2652_v25 }
 0x32b   : > { %v2656_v42 = vpop.f32.mrb[90].mxu1 }
 0x32c   : > { %v2801_v14 = vmax.f32 %v2769_v56, 0.0  ;;  %v2657_v10 = vadd.f32 %v2656_v42, %v5876_v27  ;;  %v2658_v16 = vpop.f32.mrb[91].mxu1  ;;  %3680 = vmatmul.mubr.msk.f32.gmra.mrb[138].mxu0 %vm2864_vm0, %v2832_v63 }
 0x32e   : > { %v2833_v8 = vmin.f32 %v2801_v14, 1.0  ;;  %v2770_v32 = vadd.f32 %v5917_v35, %v2657_v10 }
 0x32f   : > { %v2661_v26 = vpop.f32.mrb[92].mxu1 }
 0x330   : > { %v2802_v57 = vmax.f32 %v2770_v32, 0.0  ;;  %v2662_v44 = vadd.f32 %v2661_v26, %v5878_v17  ;;  %v2663_v2 = vpop.f32.mrb[93].mxu1  ;;  %3682 = vmatprep.mubr.msk.f32.mxu0 %vm2864_vm0, %v2833_v8 }
 0x332   : > { %v2834_v47 = vmin.f32 %v2802_v57, 1.0  ;;  %v2771_v22 = vadd.f32 %v5917_v35, %v2662_v44 }
 0x333   : > { %v2666_v39 = vpop.f32.mrb[94].mxu1 }
 0x334   : > { %v2803_v20 = vmax.f32 %v2771_v22, 0.0  ;;  %v2667_v27 = vadd.f32 %v2666_v39, %v5880_v1  ;;  %v2668_v59 = vpop.f32.mrb[95].mxu1  ;;  %3683 = vmatmul.mubr.msk.f32.gmra.mrb[140].mxu0 %vm2864_vm0, %v2834_v47 }
 0x336   : > { %v2835_v61 = vmin.f32 %v2803_v20, 1.0  ;;  %v2772_v40 = vadd.f32 %v5917_v35, %v2667_v27 }
 0x337   : > { %v2671_v31 = vpop.f32.mrb[96].mxu1 }
 0x338   : > { %v2804_v49 = vmax.f32 %v2772_v40, 0.0  ;;  %v2672_v17 = vadd.f32 %v2671_v31, %v5882_v41  ;;  %v2673_v18 = vpop.f32.mrb[97].mxu1  ;;  %3685 = vmatprep.mubr.msk.f32.mxu0 %vm2864_vm0, %v2835_v61 }
 0x33a   : > { %v2836_v58 = vmin.f32 %v2804_v49, 1.0  ;;  %v2773_v48 = vadd.f32 %v5917_v35, %v2672_v17 }
 0x33b   : > { %v2676_v36 = vpop.f32.mrb[98].mxu1 }
 0x33c   : > { %v2805_v13 = vmax.f32 %v2773_v48, 0.0  ;;  %v2677_v1 = vadd.f32 %v2676_v36, %v5884_v62  ;;  %v2678_v24 = vpop.f32.mrb[99].mxu1  ;;  %3686 = vmatmul.mubr.msk.f32.gmra.mrb[142].mxu0 %vm2864_vm0, %v2836_v58 }
 0x33e   : > { %v2837_v51 = vmin.f32 %v2805_v13, 1.0  ;;  %v2774_v52 = vadd.f32 %v5917_v35, %v2677_v1 }
 0x33f   : > { %v2681_v4 = vpop.f32.mrb[100].mxu1 }
 0x340   : > { %v2806_v53 = vmax.f32 %v2774_v52, 0.0  ;;  %v2682_v41 = vadd.f32 %v2681_v4, %v5886_v6  ;;  %v2683_v43 = vpop.f32.mrb[101].mxu1  ;;  %3688 = vmatprep.mubr.msk.f32.mxu0 %vm2864_vm0, %v2837_v51 }
 0x342   : > { %v2838_v3 = vmin.f32 %v2806_v53, 1.0  ;;  %v2775_v7 = vadd.f32 %v5917_v35, %v2682_v41 }
 0x343   : > { %v2686_v15 = vpop.f32.mrb[102].mxu1 }
 0x344   : > { %v2807_v5 = vmax.f32 %v2775_v7, 0.0  ;;  %v2687_v62 = vadd.f32 %v2686_v15, %v5888_v45  ;;  %v2688_v46 = vpop.f32.mrb[103].mxu1  ;;  %3689 = vmatmul.mubr.msk.f32.gmra.mrb[144].mxu0 %vm2864_vm0, %v2838_v3 }
 0x346   : > { %v2839_v23 = vmin.f32 %v2807_v5, 1.0  ;;  %v2776_v19 = vadd.f32 %v5917_v35, %v2687_v62 }
 0x347   : > { %v2691_v30 = vpop.f32.mrb[104].mxu1 }
 0x348   : > { %v2808_v29 = vmax.f32 %v2776_v19, 0.0  ;;  %v2692_v6 = vadd.f32 %v2691_v30, %v5890_v34  ;;  %v2693_v50 = vpop.f32.mrb[105].mxu1  ;;  %3691 = vmatprep.mubr.msk.f32.mxu0 %vm2864_vm0, %v2839_v23 }
 0x34a   : > { %v2840_v25 = vmin.f32 %v2808_v29, 1.0  ;;  %v2777_v54 = vadd.f32 %v5917_v35, %v2692_v6 }
 0x34b   : > { %v2696_v63 = vpop.f32.mrb[106].mxu1 }
 0x34c   : > { %v2809_v56 = vmax.f32 %v2777_v54, 0.0  ;;  %v2697_v45 = vadd.f32 %v2696_v63, %v5892_v37  ;;  %v2698_v42 = vpop.f32.mrb[107].mxu1  ;;  %3692 = vmatmul.mubr.msk.f32.gmra.mrb[146].mxu0 %vm2864_vm0, %v2840_v25 }
 0x34e   : > { %v2841_v14 = vmin.f32 %v2809_v56, 1.0  ;;  %v2778_v10 = vadd.f32 %v5917_v35, %v2697_v45 }
 0x34f   : > { %v2701_v16 = vpop.f32.mrb[108].mxu1 }
 0x350   : > { %v2810_v8 = vmax.f32 %v2778_v10, 0.0  ;;  %v2702_v34 = vadd.f32 %v2701_v16, %v5894_v60  ;;  %v2703_v32 = vpop.f32.mrb[109].mxu1  ;;  %3694 = vmatprep.mubr.msk.f32.mxu0 %vm2864_vm0, %v2841_v14  ;;  %v6018_v16 = vld [vmem:[%s6238_s9] ss:$0 sm:$0xff] }
 0x352   : > { %v2842_v26 = vmin.f32 %v2810_v8, 1.0  ;;  %v2779_v57 = vadd.f32 %v5917_v35, %v2702_v34 }
 0x353   : > { %v2706_v44 = vpop.f32.mrb[110].mxu1 }
 0x354   : > { %v2811_v2 = vmax.f32 %v2779_v57, 0.0  ;;  %v2707_v37 = vadd.f32 %v2706_v44, %v5896_v55  ;;  %v2708_v47 = vpop.f32.mrb[111].mxu1  ;;  %3695 = vmatmul.mubr.msk.f32.gmra.mrb[148].mxu0 %vm2864_vm0, %v2842_v26 }
 0x356   : > { %v2843_v22 = vmin.f32 %v2811_v2, 1.0  ;;  %v2780_v39 = vadd.f32 %v5917_v35, %v2707_v37 }
 0x357   : > { %v2711_v20 = vpop.f32.mrb[112].mxu1 }
 0x358   : > { %v2812_v27 = vmax.f32 %v2780_v39, 0.0  ;;  %v2712_v60 = vadd.f32 %v2711_v20, %v5898_v0  ;;  %v2713_v59 = vpop.f32.mrb[113].mxu1  ;;  %3697 = vmatprep.mubr.msk.f32.mxu0 %vm2864_vm0, %v2843_v22 }
 0x35a   : > { %v2844_v61 = vmin.f32 %v2812_v27, 1.0  ;;  %v2781_v40 = vadd.f32 %v5917_v35, %v2712_v60 }
 0x35b   : > { %v2716_v31 = vpop.f32.mrb[114].mxu1 }
 0x35c   : > { %v2813_v49 = vmax.f32 %v2781_v40, 0.0  ;;  %v2717_v55 = vadd.f32 %v2716_v31, %v5900_v12  ;;  %v2718_v17 = vpop.f32.mrb[115].mxu1  ;;  %3698 = vmatmul.mubr.msk.f32.gmra.mrb[150].mxu0 %vm2864_vm0, %v2844_v61 }
 0x35e   : > { %v2845_v18 = vmin.f32 %v2813_v49, 1.0  ;;  %v2782_v58 = vadd.f32 %v5917_v35, %v2717_v55 }
 0x35f   : > { %v2721_v48 = vpop.f32.mrb[116].mxu1 }
 0x360   : > { %v2814_v36 = vmax.f32 %v2782_v58, 0.0  ;;  %v2722_v0 = vadd.f32 %v2721_v48, %v5902_v38  ;;  %v2723_v13 = vpop.f32.mrb[117].mxu1  ;;  %3700 = vmatprep.mubr.msk.f32.mxu1 %vm2864_vm0, %v2845_v18 }
 0x362   : > { %v2846_v1 = vmin.f32 %v2814_v36, 1.0  ;;  %v2783_v24 = vadd.f32 %v5917_v35, %v2722_v0 }
 0x363   : > { %v2726_v51 = vpop.f32.mrb[118].mxu1 }
 0x364   : > { %v2815_v52 = vmax.f32 %v2783_v24, 0.0  ;;  %v2727_v12 = vadd.f32 %v2726_v51, %v5904_v11  ;;  %v2728_v4 = vpop.f32.mrb[119].mxu1  ;;  %3701 = vmatmul.mubr.msk.f32.vlgmr.msra.gmra.mrb[128].mxu1 %vm2864_vm0, %v2846_v1 }
 0x366   : > { %v2847_v53 = vmin.f32 %v2815_v52, 1.0  ;;  %v2784_v41 = vadd.f32 %v5917_v35, %v2727_v12 }
 0x367   : > { %v2731_v43 = vpop.f32.mrb[120].mxu1 }
 0x368   : > { %v2816_v3 = vmax.f32 %v2784_v41, 0.0  ;;  %v2732_v38 = vadd.f32 %v2731_v43, %v5906_v33  ;;  %v2733_v7 = vpop.f32.mrb[121].mxu1  ;;  %3703 = vmatprep.mubr.msk.f32.mxu1 %vm2864_vm0, %v2847_v53 }
 0x36a   : > { %v2848_v15 = vmin.f32 %v2816_v3, 1.0  ;;  %v2785_v5 = vadd.f32 %v5917_v35, %v2732_v38 }
 0x36b   : > { %v2736_v62 = vpop.f32.mrb[122].mxu1 }
 0x36c   : > { %v2817_v46 = vmax.f32 %v2785_v5, 0.0  ;;  %v2737_v11 = vadd.f32 %v2736_v62, %v5908_v9  ;;  %v2738_v23 = vpop.f32.mrb[123].mxu1  ;;  %3704 = vmatmul.mubr.msk.f32.gmra.mrb[130].mxu1 %vm2864_vm0, %v2848_v15 }
 0x36e   : > { %v2849_v19 = vmin.f32 %v2817_v46, 1.0  ;;  %v2786_v30 = vadd.f32 %v5917_v35, %v2737_v11 }
 0x36f   : > { %v2741_v29 = vpop.f32.mrb[124].mxu1 }
 0x370   : > { %v2818_v6 = vmax.f32 %v2786_v30, 0.0  ;;  %v2742_v33 = vadd.f32 %v2741_v29, %v5910_v28  ;;  %v2743_v50 = vpop.f32.mrb[125].mxu1  ;;  %3706 = vmatprep.mubr.msk.f32.mxu1 %vm2864_vm0, %v2849_v19 }
 0x372   : > { %v2850_v25 = vmin.f32 %v2818_v6, 1.0  ;;  %v2787_v54 = vadd.f32 %v5917_v35, %v2742_v33 }
 0x373   : > { %v2746_v63 = vpop.f32.mrb[126].mxu1 }
 0x374   : > { %v2819_v56 = vmax.f32 %v2787_v54, 0.0  ;;  %v2747_v9 = vadd.f32 %v2746_v63, %v5912_v21  ;;  %v2748_v45 = vpop.f32.mrb[127].mxu1  ;;  %3707 = vmatmul.mubr.msk.f32.gmra.mrb[132].mxu1 %vm2864_vm0, %v2850_v25 }
 0x376   : > { %v2851_v42 = vmin.f32 %v2819_v56, 1.0  ;;  %v2788_v14 = vadd.f32 %v5917_v35, %v2747_v9  ;;  %v6025_v35 = vld [vmem:[%s6239_s10] ss:$0 sm:$0xff] }
 0x378   : > { %v2820_v10 = vmax.f32 %v2788_v14, 0.0  ;;  %3709 = vmatprep.mubr.msk.f32.mxu1 %vm2864_vm0, %v2851_v42 }
 0x37a   : > { %v2852_v28 = vmin.f32 %v2820_v10, 1.0 }
 0x37c   : > { %3710 = vmatmul.mubr.msk.f32.gmra.mrb[134].mxu1 %vm2864_vm0, %v2852_v28 }
 0x3d7   : > { %v3666_v8 = vpop.f32.mrb[128].mxu0 }
 0x3d8   : > { %v3033_v21 = vadd.f32 %v3666_v8, %v6018_v16  ;;  %v3027_v34 = vpop.f32.mrb[129].mxu0 }
 0x3d9   : > { %v3028_v32 = vadd.f32 %v6018_v16, %v3027_v34 }
 0x3da   : > { %v3187_v26 = vmax.f32 %v3033_v21, 0.0 }
 0x3db   : > { %v3186_v57 = vmax.f32 %v3028_v32, 0.0 }
 0x3dc   : > { %v3219_v44 = vmin.f32 %v3187_v26, 1.0 }
 0x3dd   : > { %v3218_v2 = vmin.f32 %v3186_v57, 1.0 }
 0x3de   : > { %v3258_v37 = vmul.f32 %v6025_v35, %v3219_v44 }
 0x3df   : > { %v3669_v47 = vpop.f32.mrb[130].mxu0  ;;  %v3257_v22 = vmul.f32 %v6025_v35, %v3218_v2 }
 0x3e0   : > { %v3043_v39 = vadd.f32 %v3669_v47, %v6018_v16  ;;  %v3037_v20 = vpop.f32.mrb[131].mxu0  ;;  %v3292_v27 = vsel %vm2864_vm0, %v3258_v37, 0.0 }
 0x3e1   : > { %v3038_v60 = vadd.f32 %v6018_v16, %v3037_v20  ;;  %3293 = vadd.xlane.f32.xlu0 %v3292_v27  ;;  %v3289_v59 = vsel %vm2864_vm0, %v3257_v22, 0.0 }
 0x3e2   : > { %v3189_v61 = vmax.f32 %v3043_v39, 0.0  ;;  %3290 = vadd.xlane.f32.xlu1 %v3289_v59 }
 0x3e3   : > { %v3188_v40 = vmax.f32 %v3038_v60, 0.0 }
 0x3e4   : > { %v3221_v31 = vmin.f32 %v3189_v61, 1.0 }
 0x3e5   : > { %v3220_v49 = vmin.f32 %v3188_v40, 1.0 }
 0x3e6   : > { %v3260_v55 = vmul.f32 %v6025_v35, %v3221_v31 }
 0x3e7   : > { %v3672_v17 = vpop.f32.mrb[132].mxu0  ;;  %v3259_v18 = vmul.f32 %v6025_v35, %v3220_v49 }
 0x3e8   : > { %v3053_v58 = vadd.f32 %v3672_v17, %v6018_v16  ;;  %v3047_v48 = vpop.f32.mrb[133].mxu0  ;;  %v3298_v36 = vsel %vm2864_vm0, %v3260_v55, 0.0 }
 0x3e9   : > { %v3048_v0 = vadd.f32 %v6018_v16, %v3047_v48  ;;  %3299 = vadd.xlane.f32.xlu1 %v3298_v36  ;;  %v3295_v13 = vsel %vm2864_vm0, %v3259_v18, 0.0 }
 0x3ea   : > { %v3191_v1 = vmax.f32 %v3053_v58, 0.0  ;;  %3296 = vadd.xlane.f32.xlu0 %v3295_v13 }
 0x3eb   : > { %v3190_v24 = vmax.f32 %v3048_v0, 0.0 }
 0x3ec   : > { %v3223_v51 = vmin.f32 %v3191_v1, 1.0 }
 0x3ed   : > { %v3222_v52 = vmin.f32 %v3190_v24, 1.0 }
 0x3ee   : > { %v3262_v12 = vmul.f32 %v6025_v35, %v3223_v51 }
 0x3ef   : > { %v3675_v4 = vpop.f32.mrb[134].mxu0  ;;  %v3261_v53 = vmul.f32 %v6025_v35, %v3222_v52 }
 0x3f0   : > { %v3063_v41 = vadd.f32 %v3675_v4, %v6018_v16  ;;  %v3057_v43 = vpop.f32.mrb[135].mxu0  ;;  %v3304_v3 = vsel %vm2864_vm0, %v3262_v12, 0.0 }
 0x3f1   : > { %v3058_v38 = vadd.f32 %v6018_v16, %v3057_v43  ;;  %3305 = vadd.xlane.f32.xlu1 %v3304_v3  ;;  %v3301_v7 = vsel %vm2864_vm0, %v3261_v53, 0.0 }
 0x3f2   : > { %v3193_v15 = vmax.f32 %v3063_v41, 0.0  ;;  %3302 = vadd.xlane.f32.xlu0 %v3301_v7 }
 0x3f3   : > { %v3192_v5 = vmax.f32 %v3058_v38, 0.0 }
 0x3f4   : > { %v3225_v62 = vmin.f32 %v3193_v15, 1.0 }
 0x3f5   : > { %v3224_v46 = vmin.f32 %v3192_v5, 1.0 }
 0x3f6   : > { %v3264_v11 = vmul.f32 %v6025_v35, %v3225_v62 }
 0x3f7   : > { %v3678_v23 = vpop.f32.mrb[136].mxu0  ;;  %v3263_v19 = vmul.f32 %v6025_v35, %v3224_v46 }
 0x3f8   : > { %v3073_v30 = vadd.f32 %v3678_v23, %v6018_v16  ;;  %v3067_v29 = vpop.f32.mrb[137].mxu0  ;;  %v3310_v6 = vsel %vm2864_vm0, %v3264_v11, 0.0 }
 0x3f9   : > { %v3068_v33 = vadd.f32 %v6018_v16, %v3067_v29  ;;  %3311 = vadd.xlane.f32.xlu1 %v3310_v6  ;;  %v3307_v50 = vsel %vm2864_vm0, %v3263_v19, 0.0 }
 0x3fa   : > { %v3195_v25 = vmax.f32 %v3073_v30, 0.0  ;;  %3308 = vadd.xlane.f32.xlu0 %v3307_v50 }
 0x3fb   : > { %v3194_v54 = vmax.f32 %v3068_v33, 0.0 }
 0x3fc   : > { %v3227_v63 = vmin.f32 %v3195_v25, 1.0 }
 0x3fd   : > { %v3226_v56 = vmin.f32 %v3194_v54, 1.0 }
 0x3fe   : > { %v3266_v9 = vmul.f32 %v6025_v35, %v3227_v63 }
 0x3ff   : > { %v3681_v45 = vpop.f32.mrb[138].mxu0  ;;  %v3265_v42 = vmul.f32 %v6025_v35, %v3226_v56 }
 0x400   : > { %v3083_v14 = vadd.f32 %v3681_v45, %v6018_v16  ;;  %v3077_v10 = vpop.f32.mrb[139].mxu0  ;;  %v3316_v28 = vsel %vm2864_vm0, %v3266_v9, 0.0 }
 0x401   : > { %v3078_v8 = vadd.f32 %v6018_v16, %v3077_v10  ;;  %3317 = vadd.xlane.f32.xlu1 %v3316_v28  ;;  %v3313_v21 = vsel %vm2864_vm0, %v3265_v42, 0.0 }
 0x402   : > { %v3197_v34 = vmax.f32 %v3083_v14, 0.0  ;;  %3314 = vadd.xlane.f32.xlu0 %v3313_v21 }
 0x403   : > { %v3196_v32 = vmax.f32 %v3078_v8, 0.0 }
 0x404   : > { %v3229_v26 = vmin.f32 %v3197_v34, 1.0 }
 0x405   : > { %v3228_v57 = vmin.f32 %v3196_v32, 1.0 }
 0x406   : > { %v3268_v44 = vmul.f32 %v6025_v35, %v3229_v26 }
 0x407   : > { %v3684_v2 = vpop.f32.mrb[140].mxu0  ;;  %v3267_v37 = vmul.f32 %v6025_v35, %v3228_v57 }
 0x408   : > { %v3093_v47 = vadd.f32 %v3684_v2, %v6018_v16  ;;  %v3087_v22 = vpop.f32.mrb[141].mxu0  ;;  %v3322_v39 = vsel %vm2864_vm0, %v3268_v44, 0.0 }
 0x409   : > { %v3088_v20 = vadd.f32 %v6018_v16, %v3087_v22  ;;  %3323 = vadd.xlane.f32.xlu1 %v3322_v39  ;;  %v3319_v27 = vsel %vm2864_vm0, %v3267_v37, 0.0 }
 0x40a   : > { %v3199_v60 = vmax.f32 %v3093_v47, 0.0  ;;  %3320 = vadd.xlane.f32.xlu0 %v3319_v27 }
 0x40b   : > { %v3198_v59 = vmax.f32 %v3088_v20, 0.0 }
 0x40c   : > { %v3231_v61 = vmin.f32 %v3199_v60, 1.0 }
 0x40d   : > { %v3230_v40 = vmin.f32 %v3198_v59, 1.0 }
 0x40e   : > { %v3270_v31 = vmul.f32 %v6025_v35, %v3231_v61 }
 0x40f   : > { %v3687_v49 = vpop.f32.mrb[142].mxu0  ;;  %v3269_v55 = vmul.f32 %v6025_v35, %v3230_v40 }
 0x410   : > { %v3103_v17 = vadd.f32 %v3687_v49, %v6018_v16  ;;  %v3097_v18 = vpop.f32.mrb[143].mxu0  ;;  %v3328_v58 = vsel %vm2864_vm0, %v3270_v31, 0.0 }
 0x411   : > { %v3098_v48 = vadd.f32 %v6018_v16, %v3097_v18  ;;  %3329 = vadd.xlane.f32.xlu1 %v3328_v58  ;;  %v3325_v36 = vsel %vm2864_vm0, %v3269_v55, 0.0 }
 0x412   : > { %v3201_v0 = vmax.f32 %v3103_v17, 0.0  ;;  %3326 = vadd.xlane.f32.xlu0 %v3325_v36 }
 0x413   : > { %v3200_v13 = vmax.f32 %v3098_v48, 0.0 }
 0x414   : > { %v3233_v1 = vmin.f32 %v3201_v0, 1.0 }
 0x415   : > { %v3232_v24 = vmin.f32 %v3200_v13, 1.0 }
 0x416   : > { %v3272_v51 = vmul.f32 %v6025_v35, %v3233_v1 }
 0x417   : > { %v3690_v52 = vpop.f32.mrb[144].mxu0  ;;  %v3271_v12 = vmul.f32 %v6025_v35, %v3232_v24 }
 0x418   : > { %v3113_v4 = vadd.f32 %v3690_v52, %v6018_v16  ;;  %v3107_v53 = vpop.f32.mrb[145].mxu0  ;;  %v3334_v41 = vsel %vm2864_vm0, %v3272_v51, 0.0 }
 0x419   : > { %v3108_v43 = vadd.f32 %v6018_v16, %v3107_v53  ;;  %3335 = vadd.xlane.f32.xlu1 %v3334_v41  ;;  %v3331_v3 = vsel %vm2864_vm0, %v3271_v12, 0.0 }
 0x41a   : > { %v3203_v38 = vmax.f32 %v3113_v4, 0.0  ;;  %3332 = vadd.xlane.f32.xlu0 %v3331_v3 }
 0x41b   : > { %v3202_v7 = vmax.f32 %v3108_v43, 0.0 }
 0x41c   : > { %v3235_v15 = vmin.f32 %v3203_v38, 1.0 }
 0x41d   : > { %v3234_v5 = vmin.f32 %v3202_v7, 1.0 }
 0x41e   : > { %v3274_v62 = vmul.f32 %v6025_v35, %v3235_v15 }
 0x41f   : > { %v3693_v46 = vpop.f32.mrb[146].mxu0  ;;  %v3273_v11 = vmul.f32 %v6025_v35, %v3234_v5 }
 0x420   : > { %v3123_v23 = vadd.f32 %v3693_v46, %v6018_v16  ;;  %v3117_v19 = vpop.f32.mrb[147].mxu0  ;;  %v3340_v30 = vsel %vm2864_vm0, %v3274_v62, 0.0 }
 0x421   : > { %v3118_v29 = vadd.f32 %v6018_v16, %v3117_v19  ;;  %3341 = vadd.xlane.f32.xlu1 %v3340_v30  ;;  %v3337_v6 = vsel %vm2864_vm0, %v3273_v11, 0.0 }
 0x422   : > { %v3205_v33 = vmax.f32 %v3123_v23, 0.0  ;;  %3338 = vadd.xlane.f32.xlu0 %v3337_v6 }
 0x423   : > { %v3204_v50 = vmax.f32 %v3118_v29, 0.0 }
 0x424   : > { %v3237_v25 = vmin.f32 %v3205_v33, 1.0 }
 0x425   : > { %v3236_v54 = vmin.f32 %v3204_v50, 1.0 }
 0x426   : > { %v3276_v63 = vmul.f32 %v6025_v35, %v3237_v25 }
 0x427   : > { %v3696_v56 = vpop.f32.mrb[148].mxu0  ;;  %v3275_v9 = vmul.f32 %v6025_v35, %v3236_v54 }
 0x428   : > { %v3133_v45 = vadd.f32 %v3696_v56, %v6018_v16  ;;  %v3127_v42 = vpop.f32.mrb[149].mxu0  ;;  %v3346_v14 = vsel %vm2864_vm0, %v3276_v63, 0.0 }
 0x429   : > { %v3128_v10 = vadd.f32 %v6018_v16, %v3127_v42  ;;  %3347 = vadd.xlane.f32.xlu1 %v3346_v14  ;;  %v3343_v28 = vsel %vm2864_vm0, %v3275_v9, 0.0 }
 0x42a   : > { %v3207_v8 = vmax.f32 %v3133_v45, 0.0  ;;  %3344 = vadd.xlane.f32.xlu0 %v3343_v28 }
 0x42b   : > { %v3206_v21 = vmax.f32 %v3128_v10, 0.0 }
 0x42c   : > { %v3239_v34 = vmin.f32 %v3207_v8, 1.0 }
 0x42d   : > { %v3238_v32 = vmin.f32 %v3206_v21, 1.0 }
 0x42e   : > { %v3278_v26 = vmul.f32 %v6025_v35, %v3239_v34 }
 0x42f   : > { %v3699_v57 = vpop.f32.mrb[150].mxu0  ;;  %v3277_v44 = vmul.f32 %v6025_v35, %v3238_v32 }
 0x430   : > { %v3143_v2 = vadd.f32 %v3699_v57, %v6018_v16  ;;  %v3137_v37 = vpop.f32.mrb[151].mxu0  ;;  %v3352_v47 = vsel %vm2864_vm0, %v3278_v26, 0.0 }
 0x431   : > { %v3138_v22 = vadd.f32 %v6018_v16, %v3137_v37  ;;  %3353 = vadd.xlane.f32.xlu1 %v3352_v47  ;;  %v3349_v39 = vsel %vm2864_vm0, %v3277_v44, 0.0  ;;  %v6121_v44 = vld [vmem:[#allocation2] ss:$0 sm:$0xff] }
 0x432   : > { %v3209_v20 = vmax.f32 %v3143_v2, 0.0  ;;  %3350 = vadd.xlane.f32.xlu0 %v3349_v39 }
 0x433   : > { %v3208_v27 = vmax.f32 %v3138_v22, 0.0 }
 0x434   : > { %v3241_v60 = vmin.f32 %v3209_v20, 1.0 }
 0x435   : > { %v3240_v59 = vmin.f32 %v3208_v27, 1.0 }
 0x436   : > { %v3280_v61 = vmul.f32 %v6025_v35, %v3241_v60 }
 0x437   : > { %v3702_v40 = vpop.f32.mrb[128].mxu1  ;;  %v3279_v31 = vmul.f32 %v6025_v35, %v3240_v59 }
 0x438   : > { %v3153_v49 = vadd.f32 %v3702_v40, %v6018_v16  ;;  %v3147_v55 = vpop.f32.mrb[129].mxu1  ;;  %v3358_v17 = vsel %vm2864_vm0, %v3280_v61, 0.0 }
 0x439   : > { %v3148_v18 = vadd.f32 %v6018_v16, %v3147_v55  ;;  %3359 = vadd.xlane.f32.xlu1 %v3358_v17  ;;  %v3355_v58 = vsel %vm2864_vm0, %v3279_v31, 0.0 }
 0x43a   : > { %v3211_v48 = vmax.f32 %v3153_v49, 0.0  ;;  %3356 = vadd.xlane.f32.xlu0 %v3355_v58 }
 0x43b   : > { %v3210_v36 = vmax.f32 %v3148_v18, 0.0 }
 0x43c   : > { %v3243_v0 = vmin.f32 %v3211_v48, 1.0 }
 0x43d   : > { %v3242_v13 = vmin.f32 %v3210_v36, 1.0 }
 0x43e   : > { %v3282_v1 = vmul.f32 %v6025_v35, %v3243_v0 }
 0x43f   : > { %v3705_v24 = vpop.f32.mrb[130].mxu1  ;;  %v3281_v51 = vmul.f32 %v6025_v35, %v3242_v13 }
 0x440   : > { %v3163_v52 = vadd.f32 %v3705_v24, %v6018_v16  ;;  %v3157_v12 = vpop.f32.mrb[131].mxu1  ;;  %v3364_v4 = vsel %vm2864_vm0, %v3282_v1, 0.0 }
 0x441   : > { %v3158_v53 = vadd.f32 %v6018_v16, %v3157_v12  ;;  %3365 = vadd.xlane.f32.xlu1 %v3364_v4  ;;  %v3361_v41 = vsel %vm2864_vm0, %v3281_v51, 0.0 }
 0x442   : > { %v3213_v43 = vmax.f32 %v3163_v52, 0.0  ;;  %3362 = vadd.xlane.f32.xlu0 %v3361_v41 }
 0x443   : > { %v3212_v3 = vmax.f32 %v3158_v53, 0.0 }
 0x444   : > { %v3245_v38 = vmin.f32 %v3213_v43, 1.0 }
 0x445   : > { %v3244_v7 = vmin.f32 %v3212_v3, 1.0 }
 0x446   : > { %v3284_v15 = vmul.f32 %v6025_v35, %v3245_v38 }
 0x447   : > { %v3708_v5 = vpop.f32.mrb[132].mxu1  ;;  %v3283_v62 = vmul.f32 %v6025_v35, %v3244_v7 }
 0x448   : > { %v3173_v46 = vadd.f32 %v3708_v5, %v6018_v16  ;;  %v3167_v11 = vpop.f32.mrb[133].mxu1  ;;  %v3370_v23 = vsel %vm2864_vm0, %v3284_v15, 0.0 }
 0x449   : > { %v3168_v19 = vadd.f32 %v6018_v16, %v3167_v11  ;;  %3371 = vadd.xlane.f32.xlu1 %v3370_v23  ;;  %v3367_v30 = vsel %vm2864_vm0, %v3283_v62, 0.0 }
 0x44a   : > { %v3215_v29 = vmax.f32 %v3173_v46, 0.0  ;;  %3368 = vadd.xlane.f32.xlu0 %v3367_v30 }
 0x44b   : > { %v3214_v6 = vmax.f32 %v3168_v19, 0.0 }
 0x44c   : > { %v3247_v33 = vmin.f32 %v3215_v29, 1.0 }
 0x44d   : > { %v3246_v50 = vmin.f32 %v3214_v6, 1.0 }
 0x44e   : > { %v3286_v25 = vmul.f32 %v6025_v35, %v3247_v33 }
 0x44f   : > { %v3711_v54 = vpop.f32.mrb[134].mxu1  ;;  %v3285_v63 = vmul.f32 %v6025_v35, %v3246_v50 }
 0x450   : > { %v3183_v56 = vadd.f32 %v3711_v54, %v6018_v16  ;;  %v3177_v9 = vpop.f32.mrb[135].mxu1  ;;  %v3376_v45 = vsel %vm2864_vm0, %v3286_v25, 0.0 }
 0x451   : > { %v3178_v42 = vadd.f32 %v6018_v16, %v3177_v9  ;;  %3377 = vadd.xlane.f32.xlu1 %v3376_v45  ;;  %v3373_v14 = vsel %vm2864_vm0, %v3285_v63, 0.0 }
 0x452   : > { %v3217_v10 = vmax.f32 %v3183_v56, 0.0  ;;  %3374 = vadd.xlane.f32.xlu0 %v3373_v14 }
 0x453   : > { %v3216_v28 = vmax.f32 %v3178_v42, 0.0 }
 0x454   : > { %v3249_v8 = vmin.f32 %v3217_v10, 1.0 }
 0x455   : > { %v3248_v21 = vmin.f32 %v3216_v28, 1.0 }
 0x456   : > { %v3288_v34 = vmul.f32 %v6025_v35, %v3249_v8 }
 0x457   : > { %v3287_v32 = vmul.f32 %v6025_v35, %v3248_v21 }
 0x458   : > { %v3382_v26 = vsel %vm2864_vm0, %v3288_v34, 0.0 }
 0x459   : > { %3383 = vadd.xlane.f32.xlu1 %v3382_v26  ;;  %v3379_v57 = vsel %vm2864_vm0, %v3287_v32, 0.0 }
 0x45a   : > { %3380 = vadd.xlane.f32.xlu0 %v3379_v57 }
 0x46e   : > { %v3294_v16 = vpop.xlane.xlu0 %3293 }
 0x46f   : > { %v3393_v35 = vadd.f32 %v6121_v44, %v3294_v16  ;;  %v3291_v2 = vpop.xlane.xlu1 %3290 }
 0x470   : > { %v3392_v37 = vadd.f32 %v6121_v44, %v3291_v2 }
 0x471   : > { %3426 = vst.msk [vmem:[%s6128_s24 + $0x8] sm:$0xff] %vm3424_vm1, %v3393_v35 }
 0x472   : > { %3425 = vst.msk [vmem:[%s6128_s24] sm:$0xff] %vm3424_vm1, %v3392_v37 }
 0x476   : > { %v3300_v47 = vpop.xlane.xlu1 %3299 }
 0x477   : > { %v3395_v22 = vadd.f32 %v6121_v44, %v3300_v47  ;;  %v3297_v39 = vpop.xlane.xlu0 %3296 }
 0x478   : > { %v3394_v20 = vadd.f32 %v6121_v44, %v3297_v39 }
 0x479   : > { %3428 = vst.msk [vmem:[%s6128_s24 + $0x18] sm:$0xff] %vm3424_vm1, %v3395_v22 }
 0x47a   : > { %3427 = vst.msk [vmem:[%s6128_s24 + $0x10] sm:$0xff] %vm3424_vm1, %v3394_v20 }
 0x47e   : > { %v3306_v27 = vpop.xlane.xlu1 %3305 }
 0x47f   : > { %v3397_v60 = vadd.f32 %v6121_v44, %v3306_v27  ;;  %v3303_v59 = vpop.xlane.xlu0 %3302 }
 0x480   : > { %v3396_v61 = vadd.f32 %v6121_v44, %v3303_v59 }
 0x481   : > { %3430 = vst.msk [vmem:[%s6128_s24 + $0x28] sm:$0xff] %vm3424_vm1, %v3397_v60 }
 0x482   : > { %3429 = vst.msk [vmem:[%s6128_s24 + $0x20] sm:$0xff] %vm3424_vm1, %v3396_v61 }
 0x486   : > { %v3312_v40 = vpop.xlane.xlu1 %3311 }
 0x487   : > { %v3399_v31 = vadd.f32 %v6121_v44, %v3312_v40  ;;  %v3309_v49 = vpop.xlane.xlu0 %3308 }
 0x488   : > { %v3398_v55 = vadd.f32 %v6121_v44, %v3309_v49 }
 0x489   : > { %3432 = vst.msk [vmem:[%s6128_s24 + $0x38] sm:$0xff] %vm3424_vm1, %v3399_v31 }
 0x48a   : > { %3431 = vst.msk [vmem:[%s6128_s24 + $0x30] sm:$0xff] %vm3424_vm1, %v3398_v55 }
 0x48e   : > { %v3318_v17 = vpop.xlane.xlu1 %3317 }
 0x48f   : > { %v3401_v18 = vadd.f32 %v6121_v44, %v3318_v17  ;;  %v3315_v58 = vpop.xlane.xlu0 %3314 }
 0x490   : > { %v3400_v48 = vadd.f32 %v6121_v44, %v3315_v58 }
 0x491   : > { %3434 = vst.msk [vmem:[%s6128_s24 + $0x48] sm:$0xff] %vm3424_vm1, %v3401_v18 }
 0x492   : > { %3433 = vst.msk [vmem:[%s6128_s24 + $0x40] sm:$0xff] %vm3424_vm1, %v3400_v48 }
 0x496   : > { %v3324_v36 = vpop.xlane.xlu1 %3323 }
 0x497   : > { %v3403_v0 = vadd.f32 %v6121_v44, %v3324_v36  ;;  %v3321_v13 = vpop.xlane.xlu0 %3320 }
 0x498   : > { %v3402_v1 = vadd.f32 %v6121_v44, %v3321_v13 }
 0x499   : > { %3436 = vst.msk [vmem:[%s6128_s24 + $0x58] sm:$0xff] %vm3424_vm1, %v3403_v0 }
 0x49a   : > { %3435 = vst.msk [vmem:[%s6128_s24 + $0x50] sm:$0xff] %vm3424_vm1, %v3402_v1 }
 0x49e   : > { %v3330_v24 = vpop.xlane.xlu1 %3329 }
 0x49f   : > { %v3405_v51 = vadd.f32 %v6121_v44, %v3330_v24  ;;  %v3327_v52 = vpop.xlane.xlu0 %3326 }
 0x4a0   : > { %v3404_v12 = vadd.f32 %v6121_v44, %v3327_v52 }
 0x4a1   : > { %3438 = vst.msk [vmem:[%s6128_s24 + $0x68] sm:$0xff] %vm3424_vm1, %v3405_v51 }
 0x4a2   : > { %3437 = vst.msk [vmem:[%s6128_s24 + $0x60] sm:$0xff] %vm3424_vm1, %v3404_v12 }
 0x4a6   : > { %v3336_v4 = vpop.xlane.xlu1 %3335 }
 0x4a7   : > { %v3407_v53 = vadd.f32 %v6121_v44, %v3336_v4  ;;  %v3333_v41 = vpop.xlane.xlu0 %3332 }
 0x4a8   : > { %v3406_v43 = vadd.f32 %v6121_v44, %v3333_v41 }
 0x4a9   : > { %3440 = vst.msk [vmem:[%s6128_s24 + $0x78] sm:$0xff] %vm3424_vm1, %v3407_v53 }
 0x4aa   : > { %3439 = vst.msk [vmem:[%s6128_s24 + $0x70] sm:$0xff] %vm3424_vm1, %v3406_v43 }
 0x4ae   : > { %v3342_v3 = vpop.xlane.xlu1 %3341 }
 0x4af   : > { %v3409_v38 = vadd.f32 %v6121_v44, %v3342_v3  ;;  %v3339_v7 = vpop.xlane.xlu0 %3338 }
 0x4b0   : > { %v3408_v15 = vadd.f32 %v6121_v44, %v3339_v7 }
 0x4b1   : > { %3442 = vst.msk [vmem:[%s6128_s24 + $0x88] sm:$0xff] %vm3424_vm1, %v3409_v38 }
 0x4b2   : > { %3441 = vst.msk [vmem:[%s6128_s24 + $0x80] sm:$0xff] %vm3424_vm1, %v3408_v15 }
 0x4b6   : > { %v3348_v5 = vpop.xlane.xlu1 %3347 }
 0x4b7   : > { %v3411_v62 = vadd.f32 %v6121_v44, %v3348_v5  ;;  %v3345_v46 = vpop.xlane.xlu0 %3344 }
 0x4b8   : > { %v3410_v11 = vadd.f32 %v6121_v44, %v3345_v46 }
 0x4b9   : > { %3444 = vst.msk [vmem:[%s6128_s24 + $0x98] sm:$0xff] %vm3424_vm1, %v3411_v62 }
 0x4ba   : > { %3443 = vst.msk [vmem:[%s6128_s24 + $0x90] sm:$0xff] %vm3424_vm1, %v3410_v11 }
 0x4be   : > { %v3354_v23 = vpop.xlane.xlu1 %3353 }
 0x4bf   : > { %v3413_v19 = vadd.f32 %v6121_v44, %v3354_v23  ;;  %v3351_v30 = vpop.xlane.xlu0 %3350 }
 0x4c0   : > { %v3412_v29 = vadd.f32 %v6121_v44, %v3351_v30 }
 0x4c1   : > { %3446 = vst.msk [vmem:[%s6128_s24 + $0xa8] sm:$0xff] %vm3424_vm1, %v3413_v19 }
 0x4c2   : > { %3445 = vst.msk [vmem:[%s6128_s24 + $0xa0] sm:$0xff] %vm3424_vm1, %v3412_v29 }
 0x4c6   : > { %v3360_v6 = vpop.xlane.xlu1 %3359 }
 0x4c7   : > { %v3415_v33 = vadd.f32 %v6121_v44, %v3360_v6  ;;  %v3357_v50 = vpop.xlane.xlu0 %3356 }
 0x4c8   : > { %v3414_v25 = vadd.f32 %v6121_v44, %v3357_v50 }
 0x4c9   : > { %3448 = vst.msk [vmem:[%s6128_s24 + $0xb8] sm:$0xff] %vm3424_vm1, %v3415_v33 }
 0x4ca   : > { %3447 = vst.msk [vmem:[%s6128_s24 + $0xb0] sm:$0xff] %vm3424_vm1, %v3414_v25 }
 0x4ce   : > { %v3366_v54 = vpop.xlane.xlu1 %3365 }
 0x4cf   : > { %v3417_v63 = vadd.f32 %v6121_v44, %v3366_v54  ;;  %v3363_v56 = vpop.xlane.xlu0 %3362 }
 0x4d0   : > { %v3416_v9 = vadd.f32 %v6121_v44, %v3363_v56 }
 0x4d1   : > { %3450 = vst.msk [vmem:[%s6128_s24 + $0xc8] sm:$0xff] %vm3424_vm1, %v3417_v63 }
 0x4d2   : > { %3449 = vst.msk [vmem:[%s6128_s24 + $0xc0] sm:$0xff] %vm3424_vm1, %v3416_v9 }
 0x4d6   : > { %v3372_v45 = vpop.xlane.xlu1 %3371 }
 0x4d7   : > { %v3419_v42 = vadd.f32 %v6121_v44, %v3372_v45  ;;  %v3369_v14 = vpop.xlane.xlu0 %3368 }
 0x4d8   : > { %v3418_v10 = vadd.f32 %v6121_v44, %v3369_v14 }
 0x4d9   : > { %3452 = vst.msk [vmem:[%s6128_s24 + $0xd8] sm:$0xff] %vm3424_vm1, %v3419_v42 }
 0x4da   : > { %3451 = vst.msk [vmem:[%s6128_s24 + $0xd0] sm:$0xff] %vm3424_vm1, %v3418_v10 }
 0x4de   : > { %v3378_v28 = vpop.xlane.xlu1 %3377 }
 0x4df   : > { %v3421_v8 = vadd.f32 %v6121_v44, %v3378_v28  ;;  %v3375_v21 = vpop.xlane.xlu0 %3374 }
 0x4e0   : > { %v3420_v34 = vadd.f32 %v6121_v44, %v3375_v21 }
 0x4e1   : > { %3454 = vst.msk [vmem:[%s6128_s24 + $0xe8] sm:$0xff] %vm3424_vm1, %v3421_v8 }
 0x4e2   : > { %3453 = vst.msk [vmem:[%s6128_s24 + $0xe0] sm:$0xff] %vm3424_vm1, %v3420_v34 }
 0x4e6   : > { %v3384_v32 = vpop.xlane.xlu1 %3383 }
 0x4e7   : > { %v3423_v26 = vadd.f32 %v6121_v44, %v3384_v32  ;;  %v3381_v57 = vpop.xlane.xlu0 %3380 }
 0x4e8   : > { %v3422_v16 = vadd.f32 %v6121_v44, %v3381_v57 }
 0x4e9   : > { %3456 = vst.msk [vmem:[%s6128_s24 + $0xf8] sm:$0xff] %vm3424_vm1, %v3423_v26 }
 0x4ea   : > { %3455 = vst.msk [vmem:[%s6128_s24 + $0xf0] sm:$0xff] %vm3424_vm1, %v3422_v16 }
 0x4eb PF: > { %s24_s23 = sadd.s32 1, %s3907_s23  }
 0x4ec   : > { %p21_p4 = scmp.ge.s32.totalorder %s24_s23, 4  }
 0x4ee   :  { %23 = sbr.rel (!%p21_p4) target bundleno = 3 (0x3), region = 104 }

</bundles_post_ra>
